<compile_context>
chip_gen: v6e
topology: v6e:2x2x1
jax: 0.10.0
libtpu: 0.0.40
codegen_flags: <defaults>
</compile_context>

<pallas_src>
import jax
import jax.numpy as jnp
from jax.experimental import pallas as pl
from jax.experimental.pallas import tpu as pltpu


def _layernorm(x, w, b, eps=1e-5):
    # One-pass statistics: var = E[x^2] - E[x]^2 (saves a full elementwise pass
    # + one serial reduction per LN).  Cancellation only risky if |mean| >> std,
    # which does not hold for these activations; clamp tiny negatives to 0.
    m = jnp.mean(x, axis=-1, keepdims=True)
    ms = jnp.mean(x * x, axis=-1, keepdims=True)
    var = jnp.maximum(ms - m * m, 0.0)
    return (x - m) * jax.lax.rsqrt(var + eps) * w + b


def _make_kernel(n_ctx, chunk, n_chunks, causal):
    """Build the gMLP-block kernel for one (chunk * n_chunks, ·) row block."""

    def kernel(x_ref, ln_w, ln_b, w_in, b_in, ln2_w, ln2_b,
               d_ref, bc_ref, w_out, b_out, o_ref):
        # Hoist loop-invariant parameter reads (JAX does not CSE these).
        g1w, g1b = ln_w[...], ln_b[...]
        W1, B1 = w_in[...], b_in[...]
        g2w, g2b = ln2_w[...], ln2_b[...]
        W2, B2 = w_out[...], b_out[...]
        # Row-within-context index; chunk % n_ctx == 0 so it is chunk-invariant.
        n_idx = jax.lax.broadcasted_iota(jnp.int32, (chunk, 1), 0) % n_ctx

        def process(rows):
            x = x_ref[rows, :]                                    # (chunk, E) f32
            # Pre-LN over E (f32 on the VPU).
            xn = _layernorm(x, g1w, g1b)
            # proj_in on the MXU: bf16 inputs, f32 accumulation.
            h = jnp.dot(xn.astype(jnp.bfloat16), W1,
                        preferred_element_type=jnp.float32) + B1  # (chunk, 4E)
            # tanh-approx GELU -> transcendental goes to the EUP slot.
            h = jax.nn.gelu(h, approximate=True)
            # nn.Dropout(hidden_dropout) is identity in eval mode — omitted.

            # ---- SpatialGatingUnit: LN(4E) + token mix via masked rolls ----
            hn = _layernorm(h, g2w, g2b)
            d = d_ref[rows, :]                                    # (chunk, N)
            v = d[:, 0:1] * hn                                    # s = 0 term
            for s in range(1, n_ctx):
                # Rows with n >= s take hn[r-s] (same n_ctx block).  Rows with
                # n < s need column (n-s+N) of the SAME block, i.e. a roll by
                # s-N; for a causal weight those coefficients are zero, so the
                # backward roll is skipped and the rows are masked to 0.
                fwd = pltpu.roll(hn, s, axis=0)
                if causal:
                    shifted = jnp.where(n_idx >= s, fwd, 0.0)
                else:
                    bwd = pltpu.roll(hn, chunk - (n_ctx - s), axis=0)
                    shifted = jnp.where(n_idx >= s, fwd, bwd)
                v = v + d[:, s:s + 1] * shifted
            v = v + bc_ref[rows, :]

            # Gate, proj_out (MXU), residual add.
            g = (v * h).astype(jnp.bfloat16)
            out = jnp.dot(g, W2, preferred_element_type=jnp.float32) + B2
            o_ref[rows, :] = x + out

        if n_chunks == 1:
            process(pl.ds(0, chunk))
        else:
            # 256-row blocks (v6e/v7x): run the whole pipeline in 128-row
            # halves to keep h / hn / v liveness under the 64-vreg file.
            def body(c, carry):
                r0 = pl.multiple_of(c * chunk, chunk)
                process(pl.ds(r0, chunk))
                return carry
            jax.lax.fori_loop(0, n_chunks, body, 0, unroll=True)

    return kernel


def choose_block_b(batch, n_ctx, target_rows=None):
    """Rows-per-grid-step heuristic: ~128 MXU rows on v5e, ~256 on v6e/v7x.
    The batch is zero-padded up to whole blocks, so batch % block_b is free."""
    kind = ""
    try:
        kind = jax.devices()[0].device_kind.lower()
    except Exception:
        pass
    if target_rows is None:
        target_rows = 256 if ("v6" in kind or "v7" in kind) else 128
    block_b = max(1, target_rows // max(n_ctx, 1))
    # Packed row count must be sublane-aligned (multiple of 8).
    while (block_b * n_ctx) % 8 != 0:
        block_b += 1
    # v7x has 2 TensorCores: keep >= 2 grid steps so the "parallel" axis can
    # shard across them.  On v5e/v6e (single TC) keep the larger block instead.
    if "v7" in kind:
        while pl.cdiv(batch, block_b) < 2 and block_b > 1:
            nb = block_b // 2
            if nb >= 1 and (nb * n_ctx) % 8 == 0:
                block_b = nb
            else:
                break
    return block_b


def prepare_gmlp(params, n_ctx, block_b):
    """Precompute kernel-ready constants ONCE per parameter set (hoisted out of
    the per-call path): bf16 weight casts, (1,·) LN/bias rows, and the shift
    decomposition table D[n, s] = Wc[n, (n - s) mod N] of the token mix."""
    ln_w, ln_b, w_in, b_in, ln2_w, ln2_b, w_causal, b_causal, w_out, b_out = params
    E = ln_w.shape[0]
    H = w_in.shape[1]
    N = n_ctx
    R = block_b * N
    idx = jnp.arange(N)
    Dn = w_causal[idx[:, None], (idx[:, None] - idx[None, :]) % N]      # (N, N)
    d_rows = jnp.tile(Dn, (block_b, 1)).astype(jnp.float32)             # (R, N)
    bc_col = jnp.tile(b_causal, block_b).reshape(R, 1).astype(jnp.float32)
    return (
        ln_w.reshape(1, E).astype(jnp.float32),
        ln_b.reshape(1, E).astype(jnp.float32),
        w_in.astype(jnp.bfloat16),
        b_in.reshape(1, H).astype(jnp.float32),
        ln2_w.reshape(1, H).astype(jnp.float32),
        ln2_b.reshape(1, H).astype(jnp.float32),
        d_rows, bc_col,
        w_out.astype(jnp.bfloat16),
        b_out.reshape(1, E).astype(jnp.float32),
    )


def gmlp_block(x, params, *, block_b=None, prepared=None, causal=None):
    B, N, E = x.shape
    H = params[2].shape[1]
    if block_b is None:
        block_b = choose_block_b(B, N)
    if prepared is None:
        prepared = prepare_gmlp(params, N, block_b)
    if causal is None:
        try:  # static structure check; falls back to the general path under jit
            causal = bool(jnp.all(jnp.triu(params[6], k=1) == 0))
        except Exception:
            causal = False

    R = block_b * N                       # packed rows per grid step
    n_blocks = pl.cdiv(B, block_b)
    B_pad = n_blocks * block_b            # zero-pad the tail block

    x2 = x.reshape(B * N, E)              # free reshape for row-major arrays
    if B_pad != B:
        x2 = jnp.pad(x2, ((0, (B_pad - B) * N), (0, 0)))

    # Inner row-chunking for liveness (only kicks in for 256-row blocks).
    if R > 128 and R % 128 == 0 and 128 % N == 0:
        chunk, n_chunks = 128, R // 128
    else:
        chunk, n_chunks = R, 1

    kernel = _make_kernel(N, chunk, n_chunks, causal)

    def _full(a):
        nd = a.ndim
        return pl.BlockSpec(a.shape, lambda i, _nd=nd: (0,) * _nd)

    in_specs = [pl.BlockSpec((R, E), lambda i: (i, 0))] + [_full(a) for a in prepared]

    cost = pl.CostEstimate(
        flops=int(4 * B_pad * N * E * H            # proj_in + proj_out
                  + 4 * B_pad * N * N * H          # shift-decomposed token mix
                  + 16 * B_pad * N * (E + H)),     # LNs, GELU poly, gate, residual
        transcendentals=int(B_pad * N * H),        # tanh in approximate GELU
        bytes_accessed=int(2 * B_pad * N * E * 4
                           + sum(a.size * a.dtype.itemsize for a in prepared)),
    )

    out2 = pl.pallas_call(
        kernel,
        out_shape=jax.ShapeDtypeStruct((B_pad * N, E), x.dtype),
        grid=(n_blocks,),
        in_specs=in_specs,
        out_specs=pl.BlockSpec((R, E), lambda i: (i, 0)),
        compiler_params=pltpu.CompilerParams(
            dimension_semantics=("parallel",)),
        cost_estimate=cost,
    )(x2, *prepared)
    return out2[: B * N].reshape(B, N, E)


def init_params(key, N, E):
    """PyTorch-faithful init (_weights_init), stored in f32 / natural shapes."""
    H = 4 * E
    k0, k1, k2 = jax.random.split(key, 3)
    # gMLPBlock.ln
    ln_w = jnp.ones((E,), jnp.float32)
    ln_b = jnp.zeros((E,), jnp.float32)
    # proj_in: PyTorch weight (H, E) applies x @ W.T; stored transposed (E, H).
    w_in = 0.02 * jax.random.normal(k0, (E, H), jnp.float32)
    b_in = jnp.zeros((H,), jnp.float32)
    # SGU LayerNorm over 4E
    ln2_w = jnp.ones((H,), jnp.float32)
    ln2_b = jnp.zeros((H,), jnp.float32)
    # fc_causal: tril(toeplitz(c)), c ~ N(0, 1e-6); bias = 1.
    c = 1e-6 * jax.random.normal(k1, (N,), jnp.float32)
    idx = jnp.arange(N)
    diff = idx[:, None] - idx[None, :]
    w_causal = jnp.where(diff >= 0, c[jnp.clip(diff, 0, N - 1)], 0.0).astype(jnp.float32)
    b_causal = jnp.ones((N,), jnp.float32)
    # proj_out: PyTorch weight (E, H); stored transposed (H, E).
    w_out = 0.02 * jax.random.normal(k2, (H, E), jnp.float32)
    b_out = jnp.zeros((E,), jnp.float32)
    return (ln_w, ln_b, w_in, b_in, ln2_w, ln2_b, w_causal, b_causal, w_out, b_out)


def ref_forward(x, params):
    """Pure-JAX f32 reference mirroring the PyTorch forward (eval mode):
    two-pass LayerNorm, exact-erf GELU, dense (N,N) token-mix einsum."""
    ln_w, ln_b, w_in, b_in, ln2_w, ln2_b, w_causal, b_causal, w_out, b_out = params

    def ln(t, w, b, eps=1e-5):
        mu = jnp.mean(t, axis=-1, keepdims=True)
        var = jnp.mean(jnp.square(t - mu), axis=-1, keepdims=True)
        return (t - mu) * jax.lax.rsqrt(var + eps) * w + b

    xn = ln(x, ln_w, ln_b)
    h = jax.nn.gelu(xn @ w_in + b_in, approximate=False)
    hn = ln(h, ln2_w, ln2_b)
    v = jnp.einsum("nj,bjd->bnd", w_causal, hn) + b_causal[None, :, None]
    g = v * h
    return x + g @ w_out + b_out


if __name__ == "__main__":
    B, N, E = 2, 8, 32          # batch=2, n_ctx=8, embedding_dim=32 (hidden 4E=128)
    key = jax.random.PRNGKey(0)
    kx, kp = jax.random.split(key)
    x = jax.random.normal(kx, (B, N, E), dtype=jnp.float32)
    params = init_params(kp, N, E)

    # Hoisted, once-per-parameter-set prep (kept out of the per-call path).
    block_b = choose_block_b(B, N)
    prepared = prepare_gmlp(params, N, block_b)

    out = gmlp_block(x, params, block_b=block_b, prepared=prepared)
    out = jax.block_until_ready(out)

    ref = ref_forward(x, params)
    max_err = float(jnp.max(jnp.abs(out - ref)))
    assert out.shape == (B, N, E), out.shape
    # Tolerance reflects bf16 matmul inputs (f32 accumulation) + tanh-approx GELU
    # versus the f32 exact-erf reference.
    assert max_err < 2e-2, f"mismatch vs f32 reference: {max_err}"
    print("KERNEL_OK")
</pallas_src>

<mosaic_0001>
module attributes {stable_mosaic.version = 11 : i64} {
  func.func @kernel(%arg0: i32, %arg1: memref<128x32xf32, #tpu.memory_space<vmem>>, %arg2: memref<1x32xf32, #tpu.memory_space<vmem>>, %arg3: memref<1x32xf32, #tpu.memory_space<vmem>>, %arg4: memref<32x128xbf16, #tpu.memory_space<vmem>>, %arg5: memref<1x128xf32, #tpu.memory_space<vmem>>, %arg6: memref<1x128xf32, #tpu.memory_space<vmem>>, %arg7: memref<1x128xf32, #tpu.memory_space<vmem>>, %arg8: memref<128x8xf32, #tpu.memory_space<vmem>>, %arg9: memref<128x1xf32, #tpu.memory_space<vmem>>, %arg10: memref<128x32xbf16, #tpu.memory_space<vmem>>, %arg11: memref<1x32xf32, #tpu.memory_space<vmem>>, %arg12: memref<128x32xf32, #tpu.memory_space<vmem>>) attributes {dimension_semantics = [#tpu.dimension_semantics<parallel>], iteration_bounds = array<i64: 1>, scalar_prefetch = 0 : i64, scratch_operands = 0 : i64, tpu.core_type = #tpu.core_type<tc>, window_params = [{transform_indices = @transform_0, window_bounds = array<i64: 128, 32>}, {pipeline_mode = #tpu.pipeline_mode<synchronous>, transform_indices = @transform_1, window_bounds = array<i64: 1, 32>}, {pipeline_mode = #tpu.pipeline_mode<synchronous>, transform_indices = @transform_2, window_bounds = array<i64: 1, 32>}, {pipeline_mode = #tpu.pipeline_mode<synchronous>, transform_indices = @transform_3, window_bounds = array<i64: 32, 128>}, {pipeline_mode = #tpu.pipeline_mode<synchronous>, transform_indices = @transform_4, window_bounds = array<i64: 1, 128>}, {pipeline_mode = #tpu.pipeline_mode<synchronous>, transform_indices = @transform_5, window_bounds = array<i64: 1, 128>}, {pipeline_mode = #tpu.pipeline_mode<synchronous>, transform_indices = @transform_6, window_bounds = array<i64: 1, 128>}, {pipeline_mode = #tpu.pipeline_mode<synchronous>, transform_indices = @transform_7, window_bounds = array<i64: 128, 8>}, {pipeline_mode = #tpu.pipeline_mode<synchronous>, transform_indices = @transform_8, window_bounds = array<i64: 128, 1>}, {pipeline_mode = #tpu.pipeline_mode<synchronous>, transform_indices = @transform_9, window_bounds = array<i64: 128, 32>}, {pipeline_mode = #tpu.pipeline_mode<synchronous>, transform_indices = @transform_10, window_bounds = array<i64: 1, 32>}, {transform_indices = @transform_11, window_bounds = array<i64: 128, 32>}]} {
    %c0 = arith.constant 0 : index
    %c0_0 = arith.constant 0 : index
    %0 = vector.load %arg2[%c0, %c0_0] : memref<1x32xf32, #tpu.memory_space<vmem>>, vector<1x32xf32>
    %c0_1 = arith.constant 0 : index
    %c0_2 = arith.constant 0 : index
    %1 = vector.load %arg3[%c0_1, %c0_2] : memref<1x32xf32, #tpu.memory_space<vmem>>, vector<1x32xf32>
    %c0_3 = arith.constant 0 : index
    %c0_4 = arith.constant 0 : index
    %2 = vector.load %arg4[%c0_3, %c0_4] : memref<32x128xbf16, #tpu.memory_space<vmem>>, vector<32x128xbf16>
    %c0_5 = arith.constant 0 : index
    %c0_6 = arith.constant 0 : index
    %3 = vector.load %arg5[%c0_5, %c0_6] : memref<1x128xf32, #tpu.memory_space<vmem>>, vector<1x128xf32>
    %c0_7 = arith.constant 0 : index
    %c0_8 = arith.constant 0 : index
    %4 = vector.load %arg6[%c0_7, %c0_8] : memref<1x128xf32, #tpu.memory_space<vmem>>, vector<1x128xf32>
    %c0_9 = arith.constant 0 : index
    %c0_10 = arith.constant 0 : index
    %5 = vector.load %arg7[%c0_9, %c0_10] : memref<1x128xf32, #tpu.memory_space<vmem>>, vector<1x128xf32>
    %c0_11 = arith.constant 0 : index
    %c0_12 = arith.constant 0 : index
    %6 = vector.load %arg10[%c0_11, %c0_12] : memref<128x32xbf16, #tpu.memory_space<vmem>>, vector<128x32xbf16>
    %c0_13 = arith.constant 0 : index
    %c0_14 = arith.constant 0 : index
    %7 = vector.load %arg11[%c0_13, %c0_14] : memref<1x32xf32, #tpu.memory_space<vmem>>, vector<1x32xf32>
    %8 = tpu.iota {dimensions = array<i32: 0>} : vector<128x1xi32>
    %c8_i32 = arith.constant 8 : i32
    %c0_i32 = arith.constant 0 : i32
    %9 = arith.cmpi eq, %c8_i32, %c0_i32 : i32
    %c1_i32 = arith.constant 1 : i32
    %10 = arith.select %9, %c1_i32, %c8_i32 : i32
    %11 = vector.broadcast %10 : i32 to vector<128x1xi32>
    %12 = arith.remsi %8, %11 : vector<128x1xi32>
    %c0_i32_15 = arith.constant 0 : i32
    %13 = vector.broadcast %c0_i32_15 : i32 to vector<128x1xi32>
    %14 = arith.cmpi ne, %12, %13 : vector<128x1xi32>
    %c0_i32_16 = arith.constant 0 : i32
    %15 = vector.broadcast %c0_i32_16 : i32 to vector<128x1xi32>
    %16 = arith.cmpi slt, %12, %15 : vector<128x1xi32>
    %c0_i32_17 = arith.constant 0 : i32
    %17 = arith.cmpi slt, %10, %c0_i32_17 : i32
    %18 = vector.broadcast %17 : i1 to vector<128x1xi1>
    %19 = vector.broadcast %18 : vector<128x1xi1> to vector<128x1xi1>
    %20 = arith.xori %16, %19 : vector<128x1xi1>
    %21 = arith.andi %20, %14 : vector<128x1xi1>
    %22 = vector.broadcast %10 : i32 to vector<128x1xi32>
    %23 = arith.addi %12, %22 : vector<128x1xi32>
    %24 = arith.select %21, %23, %12 : vector<128x1xi1>, vector<128x1xi32>
    %c0_18 = arith.constant 0 : index
    %c0_19 = arith.constant 0 : index
    %25 = vector.load %arg1[%c0_18, %c0_19] : memref<128x32xf32, #tpu.memory_space<vmem>>, vector<128x32xf32>
    %cst = arith.constant dense<0.000000e+00> : vector<128xf32>
    %26 = vector.multi_reduction <add>, %25, %cst [1] : vector<128x32xf32> to vector<128xf32>
    %27 = vector.shape_cast %26 : vector<128xf32> to vector<128x1xf32>
    %cst_20 = arith.constant 3.200000e+01 : f32
    %28 = vector.broadcast %cst_20 : f32 to vector<128x1xf32>
    %29 = arith.divf %27, %28 : vector<128x1xf32>
    %30 = arith.mulf %25, %25 : vector<128x32xf32>
    %cst_21 = arith.constant dense<0.000000e+00> : vector<128xf32>
    %31 = vector.multi_reduction <add>, %30, %cst_21 [1] : vector<128x32xf32> to vector<128xf32>
    %32 = vector.shape_cast %31 : vector<128xf32> to vector<128x1xf32>
    %cst_22 = arith.constant 3.200000e+01 : f32
    %33 = vector.broadcast %cst_22 : f32 to vector<128x1xf32>
    %34 = arith.divf %32, %33 : vector<128x1xf32>
    %35 = arith.mulf %29, %29 : vector<128x1xf32>
    %36 = arith.subf %34, %35 : vector<128x1xf32>
    %cst_23 = arith.constant 0.000000e+00 : f32
    %37 = vector.broadcast %cst_23 : f32 to vector<128x1xf32>
    %38 = arith.maximumf %36, %37 : vector<128x1xf32>
    %39 = vector.broadcast %29 : vector<128x1xf32> to vector<128x32xf32>
    %40 = arith.subf %25, %39 : vector<128x32xf32>
    %cst_24 = arith.constant 9.99999974E-6 : f32
    %41 = vector.broadcast %cst_24 : f32 to vector<128x1xf32>
    %42 = arith.addf %38, %41 : vector<128x1xf32>
    %43 = math.rsqrt %42 : vector<128x1xf32>
    %44 = vector.broadcast %43 : vector<128x1xf32> to vector<128x32xf32>
    %45 = arith.mulf %40, %44 : vector<128x32xf32>
    %46 = vector.broadcast %0 : vector<1x32xf32> to vector<128x32xf32>
    %47 = arith.mulf %45, %46 : vector<128x32xf32>
    %48 = vector.broadcast %1 : vector<1x32xf32> to vector<128x32xf32>
    %49 = arith.addf %47, %48 : vector<128x32xf32>
    %50 = arith.truncf %49 : vector<128x32xf32> to vector<128x32xbf16>
    %cst_25 = arith.constant dense<0.000000e+00> : vector<128x128xf32>
    %51 = tpu.matmul %50, %2, %cst_25 {dimension_numbers = #tpu.dot_dimension_numbers<[1], [0], [0], [1], [0, 0, 1, 1], [], []>} : vector<128x32xbf16>, vector<32x128xbf16>, vector<128x128xf32> -> vector<128x128xf32>
    %52 = vector.broadcast %3 : vector<1x128xf32> to vector<128x128xf32>
    %53 = arith.addf %51, %52 : vector<128x128xf32>
    %54 = arith.mulf %53, %53 : vector<128x128xf32>
    %55 = arith.mulf %53, %54 : vector<128x128xf32>
    %cst_26 = arith.constant 4.471500e-02 : f32
    %56 = vector.broadcast %cst_26 : f32 to vector<128x128xf32>
    %57 = arith.mulf %56, %55 : vector<128x128xf32>
    %58 = arith.addf %53, %57 : vector<128x128xf32>
    %cst_27 = arith.constant 0.797884583 : f32
    %59 = vector.broadcast %cst_27 : f32 to vector<128x128xf32>
    %60 = arith.mulf %59, %58 : vector<128x128xf32>
    %61 = math.tanh %60 : vector<128x128xf32>
    %cst_28 = arith.constant 1.000000e+00 : f32
    %62 = vector.broadcast %cst_28 : f32 to vector<128x128xf32>
    %63 = arith.addf %62, %61 : vector<128x128xf32>
    %cst_29 = arith.constant 5.000000e-01 : f32
    %64 = vector.broadcast %cst_29 : f32 to vector<128x128xf32>
    %65 = arith.mulf %64, %63 : vector<128x128xf32>
    %66 = arith.mulf %53, %65 : vector<128x128xf32>
    %cst_30 = arith.constant dense<0.000000e+00> : vector<128xf32>
    %67 = vector.multi_reduction <add>, %66, %cst_30 [1] : vector<128x128xf32> to vector<128xf32>
    %68 = vector.shape_cast %67 : vector<128xf32> to vector<128x1xf32>
    %cst_31 = arith.constant 1.280000e+02 : f32
    %69 = vector.broadcast %cst_31 : f32 to vector<128x1xf32>
    %70 = arith.divf %68, %69 : vector<128x1xf32>
    %71 = arith.mulf %66, %66 : vector<128x128xf32>
    %cst_32 = arith.constant dense<0.000000e+00> : vector<128xf32>
    %72 = vector.multi_reduction <add>, %71, %cst_32 [1] : vector<128x128xf32> to vector<128xf32>
    %73 = vector.shape_cast %72 : vector<128xf32> to vector<128x1xf32>
    %cst_33 = arith.constant 1.280000e+02 : f32
    %74 = vector.broadcast %cst_33 : f32 to vector<128x1xf32>
    %75 = arith.divf %73, %74 : vector<128x1xf32>
    %76 = arith.mulf %70, %70 : vector<128x1xf32>
    %77 = arith.subf %75, %76 : vector<128x1xf32>
    %cst_34 = arith.constant 0.000000e+00 : f32
    %78 = vector.broadcast %cst_34 : f32 to vector<128x1xf32>
    %79 = arith.maximumf %77, %78 : vector<128x1xf32>
    %80 = vector.broadcast %70 : vector<128x1xf32> to vector<128x128xf32>
    %81 = arith.subf %66, %80 : vector<128x128xf32>
    %cst_35 = arith.constant 9.99999974E-6 : f32
    %82 = vector.broadcast %cst_35 : f32 to vector<128x1xf32>
    %83 = arith.addf %79, %82 : vector<128x1xf32>
    %84 = math.rsqrt %83 : vector<128x1xf32>
    %85 = vector.broadcast %84 : vector<128x1xf32> to vector<128x128xf32>
    %86 = arith.mulf %81, %85 : vector<128x128xf32>
    %87 = vector.broadcast %4 : vector<1x128xf32> to vector<128x128xf32>
    %88 = arith.mulf %86, %87 : vector<128x128xf32>
    %89 = vector.broadcast %5 : vector<1x128xf32> to vector<128x128xf32>
    %90 = arith.addf %88, %89 : vector<128x128xf32>
    %c0_36 = arith.constant 0 : index
    %c0_37 = arith.constant 0 : index
    %91 = vector.load %arg8[%c0_36, %c0_37] : memref<128x8xf32, #tpu.memory_space<vmem>>, vector<128x8xf32>
    %92 = vector.extract_strided_slice %91 {offsets = [0, 0], sizes = [128, 1], strides = [1, 1]} : vector<128x8xf32> to vector<128x1xf32>
    %93 = vector.broadcast %92 : vector<128x1xf32> to vector<128x128xf32>
    %94 = arith.mulf %93, %90 : vector<128x128xf32>
    %c1_i32_38 = arith.constant 1 : i32
    %95 = tpu.dynamic_rotate %90 by %c1_i32_38 dim 0 : vector<128x128xf32>, i32 -> vector<128x128xf32>
    %c1_i32_39 = arith.constant 1 : i32
    %96 = vector.broadcast %c1_i32_39 : i32 to vector<128x1xi32>
    %97 = arith.cmpi sge, %24, %96 : vector<128x1xi32>
    %cst_40 = arith.constant 0.000000e+00 : f32
    %98 = vector.shape_cast %97 : vector<128x1xi1> to vector<128x1xi1>
    %99 = vector.broadcast %98 : vector<128x1xi1> to vector<128x128xi1>
    %100 = vector.broadcast %cst_40 : f32 to vector<128x128xf32>
    %101 = arith.select %99, %95, %100 : vector<128x128xi1>, vector<128x128xf32>
    %102 = vector.extract_strided_slice %91 {offsets = [0, 1], sizes = [128, 1], strides = [1, 1]} : vector<128x8xf32> to vector<128x1xf32>
    %103 = vector.broadcast %102 : vector<128x1xf32> to vector<128x128xf32>
    %104 = arith.mulf %103, %101 : vector<128x128xf32>
    %105 = arith.addf %94, %104 : vector<128x128xf32>
    %c2_i32 = arith.constant 2 : i32
    %106 = tpu.dynamic_rotate %90 by %c2_i32 dim 0 : vector<128x128xf32>, i32 -> vector<128x128xf32>
    %c2_i32_41 = arith.constant 2 : i32
    %107 = vector.broadcast %c2_i32_41 : i32 to vector<128x1xi32>
    %108 = arith.cmpi sge, %24, %107 : vector<128x1xi32>
    %cst_42 = arith.constant 0.000000e+00 : f32
    %109 = vector.shape_cast %108 : vector<128x1xi1> to vector<128x1xi1>
    %110 = vector.broadcast %109 : vector<128x1xi1> to vector<128x128xi1>
    %111 = vector.broadcast %cst_42 : f32 to vector<128x128xf32>
    %112 = arith.select %110, %106, %111 : vector<128x128xi1>, vector<128x128xf32>
    %113 = vector.extract_strided_slice %91 {offsets = [0, 2], sizes = [128, 1], strides = [1, 1]} : vector<128x8xf32> to vector<128x1xf32>
    %114 = vector.broadcast %113 : vector<128x1xf32> to vector<128x128xf32>
    %115 = arith.mulf %114, %112 : vector<128x128xf32>
    %116 = arith.addf %105, %115 : vector<128x128xf32>
    %c3_i32 = arith.constant 3 : i32
    %117 = tpu.dynamic_rotate %90 by %c3_i32 dim 0 : vector<128x128xf32>, i32 -> vector<128x128xf32>
    %c3_i32_43 = arith.constant 3 : i32
    %118 = vector.broadcast %c3_i32_43 : i32 to vector<128x1xi32>
    %119 = arith.cmpi sge, %24, %118 : vector<128x1xi32>
    %cst_44 = arith.constant 0.000000e+00 : f32
    %120 = vector.shape_cast %119 : vector<128x1xi1> to vector<128x1xi1>
    %121 = vector.broadcast %120 : vector<128x1xi1> to vector<128x128xi1>
    %122 = vector.broadcast %cst_44 : f32 to vector<128x128xf32>
    %123 = arith.select %121, %117, %122 : vector<128x128xi1>, vector<128x128xf32>
    %124 = vector.extract_strided_slice %91 {offsets = [0, 3], sizes = [128, 1], strides = [1, 1]} : vector<128x8xf32> to vector<128x1xf32>
    %125 = vector.broadcast %124 : vector<128x1xf32> to vector<128x128xf32>
    %126 = arith.mulf %125, %123 : vector<128x128xf32>
    %127 = arith.addf %116, %126 : vector<128x128xf32>
    %c4_i32 = arith.constant 4 : i32
    %128 = tpu.dynamic_rotate %90 by %c4_i32 dim 0 : vector<128x128xf32>, i32 -> vector<128x128xf32>
    %c4_i32_45 = arith.constant 4 : i32
    %129 = vector.broadcast %c4_i32_45 : i32 to vector<128x1xi32>
    %130 = arith.cmpi sge, %24, %129 : vector<128x1xi32>
    %cst_46 = arith.constant 0.000000e+00 : f32
    %131 = vector.shape_cast %130 : vector<128x1xi1> to vector<128x1xi1>
    %132 = vector.broadcast %131 : vector<128x1xi1> to vector<128x128xi1>
    %133 = vector.broadcast %cst_46 : f32 to vector<128x128xf32>
    %134 = arith.select %132, %128, %133 : vector<128x128xi1>, vector<128x128xf32>
    %135 = vector.extract_strided_slice %91 {offsets = [0, 4], sizes = [128, 1], strides = [1, 1]} : vector<128x8xf32> to vector<128x1xf32>
    %136 = vector.broadcast %135 : vector<128x1xf32> to vector<128x128xf32>
    %137 = arith.mulf %136, %134 : vector<128x128xf32>
    %138 = arith.addf %127, %137 : vector<128x128xf32>
    %c5_i32 = arith.constant 5 : i32
    %139 = tpu.dynamic_rotate %90 by %c5_i32 dim 0 : vector<128x128xf32>, i32 -> vector<128x128xf32>
    %c5_i32_47 = arith.constant 5 : i32
    %140 = vector.broadcast %c5_i32_47 : i32 to vector<128x1xi32>
    %141 = arith.cmpi sge, %24, %140 : vector<128x1xi32>
    %cst_48 = arith.constant 0.000000e+00 : f32
    %142 = vector.shape_cast %141 : vector<128x1xi1> to vector<128x1xi1>
    %143 = vector.broadcast %142 : vector<128x1xi1> to vector<128x128xi1>
    %144 = vector.broadcast %cst_48 : f32 to vector<128x128xf32>
    %145 = arith.select %143, %139, %144 : vector<128x128xi1>, vector<128x128xf32>
    %146 = vector.extract_strided_slice %91 {offsets = [0, 5], sizes = [128, 1], strides = [1, 1]} : vector<128x8xf32> to vector<128x1xf32>
    %147 = vector.broadcast %146 : vector<128x1xf32> to vector<128x128xf32>
    %148 = arith.mulf %147, %145 : vector<128x128xf32>
    %149 = arith.addf %138, %148 : vector<128x128xf32>
    %c6_i32 = arith.constant 6 : i32
    %150 = tpu.dynamic_rotate %90 by %c6_i32 dim 0 : vector<128x128xf32>, i32 -> vector<128x128xf32>
    %c6_i32_49 = arith.constant 6 : i32
    %151 = vector.broadcast %c6_i32_49 : i32 to vector<128x1xi32>
    %152 = arith.cmpi sge, %24, %151 : vector<128x1xi32>
    %cst_50 = arith.constant 0.000000e+00 : f32
    %153 = vector.shape_cast %152 : vector<128x1xi1> to vector<128x1xi1>
    %154 = vector.broadcast %153 : vector<128x1xi1> to vector<128x128xi1>
    %155 = vector.broadcast %cst_50 : f32 to vector<128x128xf32>
    %156 = arith.select %154, %150, %155 : vector<128x128xi1>, vector<128x128xf32>
    %157 = vector.extract_strided_slice %91 {offsets = [0, 6], sizes = [128, 1], strides = [1, 1]} : vector<128x8xf32> to vector<128x1xf32>
    %158 = vector.broadcast %157 : vector<128x1xf32> to vector<128x128xf32>
    %159 = arith.mulf %158, %156 : vector<128x128xf32>
    %160 = arith.addf %149, %159 : vector<128x128xf32>
    %c7_i32 = arith.constant 7 : i32
    %161 = tpu.dynamic_rotate %90 by %c7_i32 dim 0 : vector<128x128xf32>, i32 -> vector<128x128xf32>
    %c7_i32_51 = arith.constant 7 : i32
    %162 = vector.broadcast %c7_i32_51 : i32 to vector<128x1xi32>
    %163 = arith.cmpi sge, %24, %162 : vector<128x1xi32>
    %cst_52 = arith.constant 0.000000e+00 : f32
    %164 = vector.shape_cast %163 : vector<128x1xi1> to vector<128x1xi1>
    %165 = vector.broadcast %164 : vector<128x1xi1> to vector<128x128xi1>
    %166 = vector.broadcast %cst_52 : f32 to vector<128x128xf32>
    %167 = arith.select %165, %161, %166 : vector<128x128xi1>, vector<128x128xf32>
    %168 = vector.extract_strided_slice %91 {offsets = [0, 7], sizes = [128, 1], strides = [1, 1]} : vector<128x8xf32> to vector<128x1xf32>
    %169 = vector.broadcast %168 : vector<128x1xf32> to vector<128x128xf32>
    %170 = arith.mulf %169, %167 : vector<128x128xf32>
    %171 = arith.addf %160, %170 : vector<128x128xf32>
    %c0_53 = arith.constant 0 : index
    %c0_54 = arith.constant 0 : index
    %172 = vector.load %arg9[%c0_53, %c0_54] : memref<128x1xf32, #tpu.memory_space<vmem>>, vector<128x1xf32>
    %173 = vector.broadcast %172 : vector<128x1xf32> to vector<128x128xf32>
    %174 = arith.addf %171, %173 : vector<128x128xf32>
    %175 = arith.mulf %174, %66 : vector<128x128xf32>
    %176 = arith.truncf %175 : vector<128x128xf32> to vector<128x128xbf16>
    %cst_55 = arith.constant dense<0.000000e+00> : vector<128x32xf32>
    %177 = tpu.matmul %176, %6, %cst_55 {dimension_numbers = #tpu.dot_dimension_numbers<[1], [0], [0], [1], [0, 0, 1, 1], [], []>} : vector<128x128xbf16>, vector<128x32xbf16>, vector<128x32xf32> -> vector<128x32xf32>
    %178 = vector.broadcast %7 : vector<1x32xf32> to vector<128x32xf32>
    %179 = arith.addf %177, %178 : vector<128x32xf32>
    %180 = arith.addf %25, %179 : vector<128x32xf32>
    %c0_56 = arith.constant 0 : index
    %c0_57 = arith.constant 0 : index
    %181 = vector.load %arg12[%c0_56, %c0_57] : memref<128x32xf32, #tpu.memory_space<vmem>>, vector<128x32xf32>
    tpu.vector_store %arg12[%c0_56, %c0_57], %180 {strides = array<i32>} : memref<128x32xf32, #tpu.memory_space<vmem>>, vector<128x32xf32>,
    return
  }
  func.func @transform_0(%arg0: i32) -> (i32, i32) {
    %c0_i32 = arith.constant 0 : i32
    %c0_i32_0 = arith.constant 0 : i32
    return %arg0, %c0_i32 : i32, i32
  }
  func.func @transform_1(%arg0: i32) -> (i32, i32) {
    %c0_i32 = arith.constant 0 : i32
    %c0_i32_0 = arith.constant 0 : i32
    %c0_i32_1 = arith.constant 0 : i32
    return %c0_i32, %c0_i32_0 : i32, i32
  }
  func.func @transform_2(%arg0: i32) -> (i32, i32) {
    %c0_i32 = arith.constant 0 : i32
    %c0_i32_0 = arith.constant 0 : i32
    %c0_i32_1 = arith.constant 0 : i32
    return %c0_i32, %c0_i32_0 : i32, i32
  }
  func.func @transform_3(%arg0: i32) -> (i32, i32) {
    %c0_i32 = arith.constant 0 : i32
    %c0_i32_0 = arith.constant 0 : i32
    %c0_i32_1 = arith.constant 0 : i32
    return %c0_i32, %c0_i32_0 : i32, i32
  }
  func.func @transform_4(%arg0: i32) -> (i32, i32) {
    %c0_i32 = arith.constant 0 : i32
    %c0_i32_0 = arith.constant 0 : i32
    %c0_i32_1 = arith.constant 0 : i32
    return %c0_i32, %c0_i32_0 : i32, i32
  }
  func.func @transform_5(%arg0: i32) -> (i32, i32) {
    %c0_i32 = arith.constant 0 : i32
    %c0_i32_0 = arith.constant 0 : i32
    %c0_i32_1 = arith.constant 0 : i32
    return %c0_i32, %c0_i32_0 : i32, i32
  }
  func.func @transform_6(%arg0: i32) -> (i32, i32) {
    %c0_i32 = arith.constant 0 : i32
    %c0_i32_0 = arith.constant 0 : i32
    %c0_i32_1 = arith.constant 0 : i32
    return %c0_i32, %c0_i32_0 : i32, i32
  }
  func.func @transform_7(%arg0: i32) -> (i32, i32) {
    %c0_i32 = arith.constant 0 : i32
    %c0_i32_0 = arith.constant 0 : i32
    %c0_i32_1 = arith.constant 0 : i32
    return %c0_i32, %c0_i32_0 : i32, i32
  }
  func.func @transform_8(%arg0: i32) -> (i32, i32) {
    %c0_i32 = arith.constant 0 : i32
    %c0_i32_0 = arith.constant 0 : i32
    %c0_i32_1 = arith.constant 0 : i32
    return %c0_i32, %c0_i32_0 : i32, i32
  }
  func.func @transform_9(%arg0: i32) -> (i32, i32) {
    %c0_i32 = arith.constant 0 : i32
    %c0_i32_0 = arith.constant 0 : i32
    %c0_i32_1 = arith.constant 0 : i32
    return %c0_i32, %c0_i32_0 : i32, i32
  }
  func.func @transform_10(%arg0: i32) -> (i32, i32) {
    %c0_i32 = arith.constant 0 : i32
    %c0_i32_0 = arith.constant 0 : i32
    %c0_i32_1 = arith.constant 0 : i32
    return %c0_i32, %c0_i32_0 : i32, i32
  }
  func.func @transform_11(%arg0: i32) -> (i32, i32) {
    %c0_i32 = arith.constant 0 : i32
    %c0_i32_0 = arith.constant 0 : i32
    return %arg0, %c0_i32 : i32, i32
  }
}

</mosaic_0001>

<bundles_post_ra>
// kernel: tpu_custom_call.1
= control target key start
LH: loop header
LB: loop body
LE: loop exit
PB: predicated region body
PF: predicated region fallthrough
CT: control target
= control target key end

     0   :  { %vm6057_vm0 = vcmask 261120   ;;  %v6012_v3 = vmov 0   ;;  %v3230_v4 = vmov 1   ;;  %s6000_s0 = inlined_call_operand.vmem [shape: f32[128,32], index: 0, kind: input, shape index: {}]   ;;  %s6001_s3 = inlined_call_operand.vmem [shape: bf16[32,128], index: 3, kind: input, shape index: {}]   ;;  %s6002_s7 = inlined_call_operand.vmem [shape: f32[128,8], index: 7, kind: input, shape index: {}]   ;;  %s6003_s1 = inlined_call_operand.vmem [shape: f32[1,32], index: 1, kind: input, shape index: {}]   ;;  %s6004_s2 = inlined_call_operand.vmem [shape: f32[1,32], index: 2, kind: input, shape index: {}]   ;;  %s6005_s8 = inlined_call_operand.vmem [shape: f32[128,1], index: 8, kind: input, shape index: {}]   ;;  %s6006_s4 = inlined_call_operand.vmem [shape: f32[1,128], index: 4, kind: input, shape index: {}]   ;;  %s6007_s9 = inlined_call_operand.vmem [shape: bf16[128,32], index: 9, kind: input, shape index: {}]   ;;  %s6008_s5 = inlined_call_operand.vmem [shape: f32[1,128], index: 5, kind: input, shape index: {}]   ;;  %s6009_s6 = inlined_call_operand.vmem [shape: f32[1,128], index: 6, kind: input, shape index: {}]   ;;  %s6010_s10 = inlined_call_operand.vmem [shape: f32[1,32], index: 10, kind: input, shape index: {}]   ;;  %s6011_s11 = inlined_call_operand.vmem [shape: f32[128,32], index: 11, kind: output, shape index: {}]  }
   0x1   :  { %v3300_v0 = vld [vmem:[%s6000_s0 + $0x10] sm:$0xff]  ;;  %v3305_v1 = vld [vmem:[%s6000_s0] sm:$0xff]  ;;  %v3310_v2 = vld [vmem:[%s6000_s0 + $0x18] sm:$0xff]  ;;  %3064 = vset.pattern.permute.xlu1 %v6012_v3  ;;  %3066 = vset.pattern.permute.xlu0 %v3230_v4 }
   0x2   :  { %v297_v5 = vsel %vm6057_vm0, %v3300_v0, 0.0  ;;  %v291_v6 = vsel %vm6057_vm0, %v3305_v1, 0.0  ;;  %v3321_v7 = vld [vmem:[%s6000_s0 + $0x8] sm:$0xff]  ;;  %v300_v8 = vsel %vm6057_vm0, %v3310_v2, 0.0  ;;  %v3335_v11 = vld [vmem:[%s6000_s0 + $0x20] sm:$0xff]  ;;  %v3344_v14 = vld [vmem:[%s6000_s0 + $0x38] sm:$0xff]  ;;  %v356_v35 = vmul.f32 %v3305_v1, %v3305_v1 }
   0x3   :  { %298 = vadd.xlane.f32.xlu1 %v297_v5  ;;  %292 = vadd.xlane.f32.xlu0 %v291_v6  ;;  %v294_v9 = vsel %vm6057_vm0, %v3321_v7, 0.0  ;;  %v3330_v10 = vld [vmem:[%s6000_s0 + $0x28] sm:$0xff]  ;;  %v303_v13 = vsel %vm6057_vm0, %v3335_v11, 0.0  ;;  %v3349_v15 = vld [vmem:[%s6000_s0 + $0x30] sm:$0xff]  ;;  %v312_v16 = vsel %vm6057_vm0, %v3344_v14, 0.0  ;;  %v3363_v19 = vld [vmem:[%s6000_s0 + $0x40] sm:$0xff]  ;;  %v357_v34 = vmul.f32 %v3321_v7, %v3321_v7 }
   0x4   :  { %v306_v12 = vsel %vm6057_vm0, %v3330_v10, 0.0  ;;  %v309_v17 = vsel %vm6057_vm0, %v3349_v15, 0.0  ;;  %v3358_v18 = vld [vmem:[%s6000_s0 + $0x48] sm:$0xff]  ;;  %v315_v21 = vsel %vm6057_vm0, %v3363_v19, 0.0  ;;  %v3372_v22 = vld [vmem:[%s6000_s0 + $0x58] sm:$0xff]  ;;  %v3377_v23 = vld [vmem:[%s6000_s0 + $0x50] sm:$0xff]  ;;  %v359_v38 = vmul.f32 %v3310_v2, %v3310_v2 }
   0x5   :  { %v318_v20 = vsel %vm6057_vm0, %v3358_v18, 0.0  ;;  %v324_v24 = vsel %vm6057_vm0, %v3372_v22, 0.0  ;;  %v321_v25 = vsel %vm6057_vm0, %v3377_v23, 0.0  ;;  %v3386_v26 = vld [vmem:[%s6000_s0 + $0x68] sm:$0xff]  ;;  %v3391_v27 = vld [vmem:[%s6000_s0 + $0x60] sm:$0xff]  ;;  %v3400_v30 = vld [vmem:[%s6000_s0 + $0x78] sm:$0xff]  ;;  %v358_v39 = vmul.f32 %v3300_v0, %v3300_v0 }
   0x6   :  { %v330_v28 = vsel %vm6057_vm0, %v3386_v26, 0.0  ;;  %v327_v29 = vsel %vm6057_vm0, %v3391_v27, 0.0  ;;  %v3405_v31 = vld [vmem:[%s6000_s0 + $0x70] sm:$0xff]  ;;  %v336_v32 = vsel %vm6057_vm0, %v3400_v30, 0.0  ;;  %v375_v36 = vsel %vm6057_vm0, %v357_v34, 0.0 }
   0x7   :  { %301 = vadd.xlane.f32.xlu1 %v300_v8  ;;  %295 = vadd.xlane.f32.xlu0 %v294_v9  ;;  %v333_v33 = vsel %vm6057_vm0, %v3405_v31, 0.0  ;;  %v372_v37 = vsel %vm6057_vm0, %v356_v35, 0.0  ;;  %v381_v40 = vsel %vm6057_vm0, %v359_v38, 0.0  ;;  %v378_v41 = vsel %vm6057_vm0, %v358_v39, 0.0  ;;  %v3095_v8 = vld [vmem:[%s6001_s3 + $0x8] sm:$0xff]   ;;  %v3096_v9 = vld [vmem:[%s6001_s3] sm:$0xff]  }
   0x8   :  { %v361_v42 = vmul.f32 %v3330_v10, %v3330_v10  ;;  %v360_v43 = vmul.f32 %v3335_v11, %v3335_v11  ;;  %v363_v46 = vmul.f32 %v3344_v14, %v3344_v14  ;;  %v362_v47 = vmul.f32 %v3349_v15, %v3349_v15  ;;  %2988 = vmatprep.subr.bf16.mxu0 %v3095_v8  ;;  %v3553_v35 = vld [vmem:[%s6002_s7 + $0x48] sm:$0xff]  ;;  %v3574_v39 = vld [vmem:[%s6002_s7 + $0x78] sm:$0xff] }
   0x9   :  { %v365_v50 = vmul.f32 %v3358_v18, %v3358_v18  ;;  %v364_v51 = vmul.f32 %v3363_v19, %v3363_v19  ;;  %v367_v54 = vmul.f32 %v3372_v22, %v3372_v22  ;;  %v366_v55 = vmul.f32 %v3377_v23, %v3377_v23  ;;  %2989 = vmatpush3.bf16.msra.mxu0 %v3095_v8 }
   0xa   :  { %v387_v44 = vsel %vm6057_vm0, %v361_v42, 0.0  ;;  %v384_v45 = vsel %vm6057_vm0, %v360_v43, 0.0  ;;  %v393_v48 = vsel %vm6057_vm0, %v363_v46, 0.0  ;;  %v390_v49 = vsel %vm6057_vm0, %v362_v47, 0.0  ;;  %2990 = vmatprep.subr.bf16.mxu0 %v3096_v9  ;;  %6135 = vst [vmem:[#allocation7_spill] sm:$0xff] %v3574_v39 }
   0xb   :  { %307 = vadd.xlane.f32.xlu1 %v306_v12  ;;  %304 = vadd.xlane.f32.xlu0 %v303_v13  ;;  %v399_v52 = vsel %vm6057_vm0, %v365_v50, 0.0  ;;  %v396_v53 = vsel %vm6057_vm0, %v364_v51, 0.0  ;;  %v405_v56 = vsel %vm6057_vm0, %v367_v54, 0.0  ;;  %v402_v57 = vsel %vm6057_vm0, %v366_v55, 0.0  ;;  %v3468_v12 = vld [vmem:[%s6002_s7 + $0x8] sm:$0xff]  ;;  %v3474_v13 = vld [vmem:[%s6002_s7 + $0x10] sm:$0xff] }
   0xc   :  { %v369_v58 = vmul.f32 %v3386_v26, %v3386_v26  ;;  %v368_v59 = vmul.f32 %v3391_v27, %v3391_v27  ;;  %v371_v62 = vmul.f32 %v3400_v30, %v3400_v30  ;;  %v370_v63 = vmul.f32 %v3405_v31, %v3405_v31  ;;  %6130 = vst [vmem:[#allocation2_spill] sm:$0xff] %v3468_v12 }
   0xd   :  { %2991 = vmatpush3.bf16.msra.mxu0 %v3096_v9  ;;  %v3231_v34 = vmov 2   ;;  %v6016_v42 = vmov 3   ;;  %v6014_v9 = vmov 4  }
   0xe   :  { %v411_v60 = vsel %vm6057_vm0, %v369_v58, 0.0  ;;  %v408_v61 = vsel %vm6057_vm0, %v368_v59, 0.0  ;;  %v417_v5 = vsel %vm6057_vm0, %v371_v62, 0.0  ;;  %v414_v6 = vsel %vm6057_vm0, %v370_v63, 0.0 }
   0xf   :  { %313 = vadd.xlane.f32.xlu1 %v312_v16  ;;  %310 = vadd.xlane.f32.xlu0 %v309_v17  ;;  %v3480_v16 = vld [vmem:[%s6002_s7 + $0x18] sm:$0xff]  ;;  %v3487_v17 = vld [vmem:[%s6002_s7 + $0x20] sm:$0xff] }
  0x10   :  { %6131 = vst [vmem:[#allocation3_spill] sm:$0xff] %v3487_v17 }
  0x13   :  { %319 = vadd.xlane.f32.xlu1 %v318_v20  ;;  %316 = vadd.xlane.f32.xlu0 %v315_v21  ;;  %v3494_v20 = vld [vmem:[%s6002_s7 + $0x30] sm:$0xff]  ;;  %v3499_v21 = vld [vmem:[%s6002_s7 + $0x28] sm:$0xff] }
  0x14   :  { %6132 = vst [vmem:[#allocation4_spill] sm:$0xff] %v3494_v20 }
  0x17   :  { %325 = vadd.xlane.f32.xlu1 %v324_v24  ;;  %322 = vadd.xlane.f32.xlu0 %v321_v25  ;;  %v3506_v24 = vld [vmem:[%s6002_s7 + $0x40] sm:$0xff]  ;;  %v3513_v25 = vld [vmem:[%s6002_s7 + $0x50] sm:$0xff] }
  0x18   :  { %6133 = vst [vmem:[#allocation5_spill] sm:$0xff] %v3506_v24 }
  0x1b   :  { %331 = vadd.xlane.f32.xlu1 %v330_v28  ;;  %328 = vadd.xlane.f32.xlu0 %v327_v29  ;;  %v3518_v28 = vld [vmem:[%s6002_s7 + $0x38] sm:$0xff]  ;;  %v3525_v29 = vld [vmem:[%s6002_s7 + $0x60] sm:$0xff] }
  0x1c   :  { %6134 = vst [vmem:[#allocation6_spill] sm:$0xff] %v3525_v29 }
  0x1f   :  { %337 = vadd.xlane.f32.xlu1 %v336_v32  ;;  %334 = vadd.xlane.f32.xlu0 %v333_v33  ;;  %v3532_v32 = vld [vmem:[%s6002_s7 + $0x70] sm:$0xff]  ;;  %v3539_v33 = vld [vmem:[%s6002_s7] sm:$0xff] }
  0x23   :  { %376 = vadd.xlane.f32.xlu1 %v375_v36  ;;  %373 = vadd.xlane.f32.xlu0 %v372_v37  ;;  %v3560_v36 = vld [vmem:[%s6002_s7 + $0x58] sm:$0xff] }
  0x27   :  { %382 = vadd.xlane.f32.xlu1 %v381_v40  ;;  %379 = vadd.xlane.f32.xlu0 %v378_v41 }
  0x2b   :  { %388 = vadd.xlane.f32.xlu1 %v387_v44  ;;  %385 = vadd.xlane.f32.xlu0 %v384_v45 }
  0x2f   :  { %394 = vadd.xlane.f32.xlu1 %v393_v48  ;;  %391 = vadd.xlane.f32.xlu0 %v390_v49 }
  0x33   :  { %400 = vadd.xlane.f32.xlu1 %v399_v52  ;;  %397 = vadd.xlane.f32.xlu0 %v396_v53 }
  0x37   :  { %406 = vadd.xlane.f32.xlu1 %v405_v56  ;;  %403 = vadd.xlane.f32.xlu0 %v402_v57 }
  0x3b   :  { %412 = vadd.xlane.f32.xlu1 %v411_v60  ;;  %409 = vadd.xlane.f32.xlu0 %v408_v61 }
  0x3f   :  { %418 = vadd.xlane.f32.xlu1 %v417_v5  ;;  %415 = vadd.xlane.f32.xlu0 %v414_v6 }
  0x50   :  { %1175 = vperm.xlu1 %3064, %v3468_v12  }
  0x54   :  { %1180 = vperm.xlu1 %3064, %v3474_v13  }
  0x55   :  { %1366 = vperm.xlu0 %3066, %v3468_v12  }
  0x58   :  { %1185 = vperm.xlu1 %3064, %v3480_v16  }
  0x59   :  { %1378 = vperm.xlu0 %3066, %v3487_v17  }
  0x5c   :  { %1190 = vperm.xlu1 %3064, %v3487_v17  }
  0x5d   :  { %1386 = vperm.xlu0 %3066, %v3494_v20  }
  0x60   :  { %1195 = vperm.xlu1 %3064, %v3499_v21  }
  0x61   :  { %1394 = vperm.xlu0 %3066, %v3506_v24  }
  0x64   :  { %1200 = vperm.xlu1 %3064, %v3494_v20  }
  0x65   :  { %1402 = vperm.xlu0 %3066, %v3513_v25  }
  0x68   :  { %1205 = vperm.xlu1 %3064, %v3518_v28  }
  0x69   :  { %1410 = vperm.xlu0 %3066, %v3525_v29  }
  0x6c   :  { %1210 = vperm.xlu1 %3064, %v3506_v24  }
  0x6d   :  { %1418 = vperm.xlu0 %3066, %v3532_v32  }
  0x70   :  { %1220 = vperm.xlu1 %3064, %v3513_v25  }
  0x71   :  { %3067 = vset.pattern.permute.xlu0 %v3231_v34 }
  0x72   :  { %1555 = vperm.xlu0 %3067, %v3539_v33  }
  0x74   :  { %1230 = vperm.xlu1 %3064, %v3525_v29  }
  0x76   :  { %1567 = vperm.xlu0 %3067, %v3480_v16  }
  0x78   :  { %1240 = vperm.xlu1 %3064, %v3532_v32  }
  0x7a   :  { %1575 = vperm.xlu0 %3067, %v3499_v21  }
  0x7c   :  { %3065 = vset.pattern.permute.xlu1 %v3230_v4  ;;  %v3567_v4 = vld [vmem:[%s6002_s7 + $0x68] sm:$0xff] }
  0x7d   :  { %1362 = vperm.xlu1 %3065, %v3539_v33  }
  0x7e   :  { %1583 = vperm.xlu0 %3067, %v3518_v28  }
  0x81   :  { %1370 = vperm.xlu1 %3065, %v3474_v13  }
  0x82   :  { %1591 = vperm.xlu0 %3067, %v3553_v35  }
  0x85   :  { %1374 = vperm.xlu1 %3065, %v3480_v16  }
  0x86   :  { %1599 = vperm.xlu0 %3067, %v3560_v36  }
  0x89   :  { %1382 = vperm.xlu1 %3065, %v3499_v21  }
  0x8a   :  { %1607 = vperm.xlu0 %3067, %v3567_v4  }
  0x8c   :  { %v299_v37 = vpop.xlane.xlu1 %298  ;;  %v293_v38 = vpop.xlane.xlu0 %292 }
  0x8d   :  { %1390 = vperm.xlu1 %3065, %v3518_v28   ;;  %v3606_v55 = vmul.f32 0.03125, %v293_v38  ;;  %v3612_v57 = vmul.f32 0.03125, %v299_v37 }
  0x8e   :  { %1615 = vperm.xlu0 %3067, %v3574_v39  }
  0x8f   :  { %v436_v61 = vmul.f32 %v3606_v55, %v3606_v55 }
  0x90   :  { %v302_v40 = vpop.xlane.xlu1 %301  ;;  %v296_v41 = vpop.xlane.xlu0 %295 }
  0x91   :  { %1398 = vperm.xlu1 %3065, %v3553_v35   ;;  %v3608_v56 = vmul.f32 0.03125, %v296_v41  ;;  %v3614_v58 = vmul.f32 0.03125, %v302_v40 }
  0x92   :  { %3070 = vset.pattern.permute.xlu0 %v6016_v42 }
  0x93   :  { %1752 = vperm.xlu0 %3070, %v3468_v12   ;;  %v437_v62 = vmul.f32 %v3608_v56, %v3608_v56  ;;  %v439_v37 = vmul.f32 %v3614_v58, %v3614_v58 }
  0x94   :  { %v308_v43 = vpop.xlane.xlu1 %307  ;;  %v305_v44 = vpop.xlane.xlu0 %304 }
  0x95   :  { %1406 = vperm.xlu1 %3065, %v3560_v36   ;;  %v3626_v38 = vmul.f32 0.03125, %v308_v43 }
  0x97   :  { %1764 = vperm.xlu0 %3070, %v3487_v17  }
  0x98   :  { %v314_v45 = vpop.xlane.xlu1 %313  ;;  %v311_v46 = vpop.xlane.xlu0 %310 }
  0x99   :  { %1414 = vperm.xlu1 %3065, %v3567_v4  }
  0x9b   :  { %1772 = vperm.xlu0 %3070, %v3494_v20  }
  0x9c   :  { %v3584_v47 = vpop.xlane.xlu1 %319  ;;  %v3586_v48 = vpop.xlane.xlu0 %316 }
  0x9d   :  { %1422 = vperm.xlu1 %3065, %v3574_v39  }
  0x9f   :  { %1780 = vperm.xlu0 %3070, %v3506_v24  }
  0xa0   :  { %v3590_v49 = vpop.xlane.xlu1 %325  ;;  %v3592_v50 = vpop.xlane.xlu0 %322 }
  0xa1   :  { %3068 = vset.pattern.permute.xlu1 %v3231_v34  ;;  %v438_v34 = vmul.f32 %v3612_v57, %v3612_v57 }
  0xa2   :  { %1559 = vperm.xlu1 %3068, %v3468_v12  }
  0xa3   :  { %1788 = vperm.xlu0 %3070, %v3513_v25  }
  0xa4   :  { %v3596_v51 = vpop.xlane.xlu1 %331  ;;  %v3598_v52 = vpop.xlane.xlu0 %328 }
  0xa6   :  { %1563 = vperm.xlu1 %3068, %v3474_v13  }
  0xa7   :  { %1796 = vperm.xlu0 %3070, %v3525_v29  }
  0xa8   :  { %v3602_v53 = vpop.xlane.xlu1 %337  ;;  %v3604_v54 = vpop.xlane.xlu0 %334 }
  0xaa   :  { %1571 = vperm.xlu1 %3068, %v3487_v17  }
  0xab   :  { %1804 = vperm.xlu0 %3070, %v3532_v32  }
  0xac   :  { %v377_v59 = vpop.xlane.xlu1 %376  ;;  %v374_v60 = vpop.xlane.xlu0 %373 }
  0xad   :  { %v421_v63 = vmul.f32 0.03125, %v377_v59  ;;  %v420_v5 = vmul.f32 0.03125, %v374_v60 }
  0xae   :  { %1579 = vperm.xlu1 %3068, %v3494_v20  }
  0xaf   :  { %v453_v6 = vsub.f32 %v421_v63, %v437_v62  ;;  %v452_v8 = vsub.f32 %v420_v5, %v436_v61  ;;  %3071 = vset.pattern.permute.xlu0 %v6014_v9  ;;  %v3633_v5 = vmul.f32 0.03125, %v305_v44  ;;  %v3635_v9 = vmul.f32 0.03125, %v314_v45 }
  0xb0   :  { %v383_v40 = vpop.xlane.xlu1 %382  ;;  %v380_v41 = vpop.xlane.xlu0 %379  ;;  %1941 = vperm.xlu0 %3071, %v3539_v33  }
  0xb1   :  { %v469_v59 = vmax.f32 %v453_v6, 0.0  ;;  %v468_v60 = vmax.f32 %v452_v8, 0.0  ;;  %v423_v3 = vmul.f32 0.03125, %v383_v40  ;;  %v422_v62 = vmul.f32 0.03125, %v380_v41 }
  0xb2   :  { %1587 = vperm.xlu1 %3068, %v3506_v24   ;;  %v441_v40 = vmul.f32 %v3626_v38, %v3626_v38  ;;  %v3644_v41 = vmul.f32 0.03125, %v311_v46  ;;  %v443_v46 = vmul.f32 %v3635_v9, %v3635_v9 }
  0xb3   :  { %v501_v43 = vadd.f32 1e-05, %v469_v59  ;;  %v500_v42 = vadd.f32 1e-05, %v468_v60  ;;  %v455_v20 = vsub.f32 %v423_v3, %v439_v37  ;;  %v454_v12 = vsub.f32 %v422_v62, %v438_v34 }
  0xb4   :  { %v389_v44 = vpop.xlane.xlu1 %388  ;;  %v386_v45 = vpop.xlane.xlu0 %385  ;;  %1953 = vperm.xlu0 %3071, %v3480_v16   ;;  %v440_v37 = vmul.f32 %v3633_v5, %v3633_v5 }
  0xb5   :  { %3105 = vrsqrt.f32 %v501_v43  ;;  %v471_v59 = vmax.f32 %v455_v20, 0.0  ;;  %v470_v60 = vmax.f32 %v454_v12, 0.0  ;;  %v425_v3 = vmul.f32 0.03125, %v389_v44 }
  0xb6   :  { %3107 = vrsqrt.f32 %v500_v42  ;;  %v424_v62 = vmul.f32 0.03125, %v386_v45  ;;  %1595 = vperm.xlu1 %3068, %v3513_v25   ;;  %v442_v12 = vmul.f32 %v3644_v41, %v3644_v41  ;;  %v3657_v20 = vmul.f32 0.03125, %v3584_v47 }
  0xb7   :  { %v503_v61 = vadd.f32 1e-05, %v471_v59  ;;  %v502_v6 = vadd.f32 1e-05, %v470_v60  ;;  %v457_v63 = vsub.f32 %v425_v3, %v441_v40  ;;  %v3660_v43 = vmul.f32 0.03125, %v3586_v48 }
  0xb8   :  { %v456_v44 = vsub.f32 %v424_v62, %v440_v37  ;;  %v395_v42 = vpop.xlane.xlu1 %394  ;;  %v392_v45 = vpop.xlane.xlu0 %391  ;;  %1961 = vperm.xlu0 %3071, %v3499_v21   ;;  %v3669_v48 = vmul.f32 0.03125, %v3590_v49 }
  0xb9   :  { %3109 = vrsqrt.f32 %v503_v61  ;;  %v473_v34 = vmax.f32 %v457_v63, 0.0  ;;  %v427_v8 = vmul.f32 0.03125, %v395_v42  ;;  %v426_v59 = vmul.f32 0.03125, %v392_v45 }
  0xba   :  { %3111 = vrsqrt.f32 %v502_v6  ;;  %v472_v47 = vmax.f32 %v456_v44, 0.0  ;;  %1603 = vperm.xlu1 %3068, %v3525_v29   ;;  %v445_v61 = vmul.f32 %v3657_v20, %v3657_v20  ;;  %v444_v63 = vmul.f32 %v3660_v43, %v3660_v43 }
  0xbb   :  { %v505_v3 = vadd.f32 1e-05, %v473_v34  ;;  %v459_v37 = vsub.f32 %v427_v8, %v443_v46  ;;  %v458_v62 = vsub.f32 %v426_v59, %v442_v12  ;;  %v3676_v42 = vmul.f32 0.03125, %v3592_v50 }
  0xbc   :  { %v504_v45 = vadd.f32 1e-05, %v472_v47  ;;  %v401_v6 = vpop.xlane.xlu1 %400  ;;  %v398_v44 = vpop.xlane.xlu0 %397  ;;  %1969 = vperm.xlu0 %3071, %v3518_v28   ;;  %v3680_v8 = vmul.f32 0.03125, %v3596_v51  ;;  %v3683_v46 = vmul.f32 0.03125, %v3598_v52  ;;  %v447_v50 = vmul.f32 %v3669_v48, %v3669_v48 }
  0xbd   :  { %3113 = vrsqrt.f32 %v505_v3  ;;  %v475_v49 = vmax.f32 %v459_v37, 0.0  ;;  %v474_v60 = vmax.f32 %v458_v62, 0.0  ;;  %v429_v34 = vmul.f32 0.03125, %v401_v6 }
  0xbe   :  { %3115 = vrsqrt.f32 %v504_v45  ;;  %v428_v12 = vmul.f32 0.03125, %v398_v44  ;;  %1611 = vperm.xlu1 %3068, %v3532_v32   ;;  %v446_v3 = vmul.f32 %v3676_v42, %v3676_v42  ;;  %v3691_v37 = vmul.f32 0.03125, %v3602_v53 }
  0xbf   :  { %v507_v59 = vadd.f32 1e-05, %v475_v49  ;;  %v506_v47 = vadd.f32 1e-05, %v474_v60  ;;  %v461_v40 = vsub.f32 %v429_v34, %v445_v61  ;;  %v3694_v51 = vmul.f32 0.03125, %v3604_v54 }
  0xc0   :  { %v460_v52 = vsub.f32 %v428_v12, %v444_v63  ;;  %v407_v62 = vpop.xlane.xlu1 %406  ;;  %v404_v45 = vpop.xlane.xlu0 %403  ;;  %1973 = vperm.xlu0 %3071, %v3506_v24   ;;  %v449_v61 = vmul.f32 %v3680_v8, %v3680_v8  ;;  %v448_v53 = vmul.f32 %v3683_v46, %v3683_v46  ;;  %v6136_v54 = vmov 3  }
  0xc1   :  { %3117 = vrsqrt.f32 %v507_v59  ;;  %v477_v6 = vmax.f32 %v461_v40, 0.0  ;;  %v431_v44 = vmul.f32 0.03125, %v407_v62  ;;  %v430_v49 = vmul.f32 0.03125, %v404_v45  ;;  %v3705_v40 = vld [vmem:[%s6003_s1] ss:$0 sm:$0xff] }
  0xc2   :  { %v3106_v60 = vpop.eup %3105  ;;  %3119 = vrsqrt.f32 %v506_v47  ;;  %v476_v34 = vmax.f32 %v460_v52, 0.0  ;;  %3069 = vset.pattern.permute.xlu1 %v6136_v54  ;;  %v6137_v59 = vsub.f32 %v3321_v7, %v3608_v56  ;;  %v451_v47 = vmul.f32 %v3691_v37, %v3691_v37 }
  0xc3   :  { %v3108_v63 = vpop.eup %3107  ;;  %v509_v12 = vadd.f32 1e-05, %v477_v6  ;;  %v463_v29 = vsub.f32 %v431_v44, %v447_v50  ;;  %v462_v17 = vsub.f32 %v430_v49, %v446_v3  ;;  %1748 = vperm.xlu1 %3069, %v3539_v33   ;;  %v450_v52 = vmul.f32 %v3694_v51, %v3694_v51 }
  0xc4   :  { %v533_v62 = vmul.f32 %v3106_v60, %v6137_v59  ;;  %v508_v45 = vadd.f32 1e-05, %v476_v34  ;;  %v413_v50 = vpop.xlane.xlu1 %412  ;;  %v410_v3 = vpop.xlane.xlu0 %409  ;;  %v6138_v6 = vsub.f32 %v3305_v1, %v3606_v55  ;;  %1985 = vperm.xlu0 %3071, %v3560_v36   ;;  %v3722_v60 = vld [vmem:[%s6004_s2] ss:$0 sm:$0xff] }
  0xc5   :  { %3121 = vrsqrt.f32 %v509_v12  ;;  %v479_v7 = vmax.f32 %v463_v29, 0.0  ;;  %v478_v56 = vmax.f32 %v462_v17, 0.0  ;;  %v433_v49 = vmul.f32 0.03125, %v413_v50 }
  0xc6   :  { %v532_v44 = vmul.f32 %v3108_v63, %v6138_v6  ;;  %v3110_v54 = vpop.eup %3109  ;;  %3123 = vrsqrt.f32 %v508_v45  ;;  %v432_v34 = vmul.f32 0.03125, %v410_v3  ;;  %v555_v24 = vmul.f32 %v3705_v40, %v533_v62 }
  0xc7   :  { %v3112_v1 = vpop.eup %3111  ;;  %v511_v55 = vadd.f32 1e-05, %v479_v7  ;;  %v510_v63 = vadd.f32 1e-05, %v478_v56  ;;  %v465_v6 = vsub.f32 %v433_v49, %v449_v61  ;;  %v6139_v17 = vsub.f32 %v3310_v2, %v3614_v58  ;;  %1756 = vperm.xlu1 %3069, %v3474_v13  }
  0xc8   :  { %v554_v59 = vmul.f32 %v3705_v40, %v532_v44  ;;  %v464_v12 = vsub.f32 %v432_v34, %v448_v53  ;;  %v419_v50 = vpop.xlane.xlu1 %418  ;;  %v416_v39 = vpop.xlane.xlu0 %415  ;;  %v577_v3 = vadd.f32 %v3722_v60, %v555_v24  ;;  %v6140_v62 = vsub.f32 %v3300_v0, %v3612_v57  ;;  %1993 = vperm.xlu0 %3071, %v3567_v4  }
  0xc9   :  { %v535_v29 = vmul.f32 %v3110_v54, %v6139_v17  ;;  %3125 = vrsqrt.f32 %v511_v55  ;;  %v481_v61 = vmax.f32 %v465_v6, 0.0  ;;  %v435_v7 = vmul.f32 0.03125, %v419_v50 }
  0xca   :  { %v576_v45 = vadd.f32 %v3722_v60, %v554_v59  ;;  %v534_v44 = vmul.f32 %v3112_v1, %v6140_v62  ;;  %v434_v2 = vmul.f32 0.03125, %v416_v39  ;;  %v3114_v58 = vpop.eup %3113  ;;  %3127 = vrsqrt.f32 %v510_v63 }
  0xcb   :  { %v480_v56 = vmax.f32 %v464_v12, 0.0  ;;  %v3116_v54 = vpop.eup %3115  ;;  %v513_v34 = vadd.f32 1e-05, %v481_v61  ;;  %v467_v59 = vsub.f32 %v435_v7, %v451_v47  ;;  %v557_v17 = vmul.f32 %v3705_v40, %v535_v29  ;;  %1760 = vperm.xlu1 %3069, %v3480_v16  }
  0xcc   :  { %v592_v53 = vpack.c.bf16 %v577_v3, %v576_v45  ;;  %v556_v49 = vmul.f32 %v3705_v40, %v534_v44  ;;  %v466_v24 = vsub.f32 %v434_v2, %v450_v52  ;;  %v3741_v39 = vpop.permute.xlu1 %1175  ;;  %v6142_v1 = vsub.f32 %v3335_v11, %v3633_v5 }
  0xcd   :  { %v512_v0 = vadd.f32 1e-05, %v480_v56  ;;  %6141 = vst [vmem:[#allocation8_spill] sm:$0xff] %v3741_v39  ;;  %v6143_v63 = vsub.f32 %v3330_v10, %v3626_v38  ;;  %v3234_v52 = vmov 5   ;;  %3129 = vrsqrt.f32 %v513_v34 }
  0xce   :  { %2992 = vmatprep.mubr.msk.bf16.mxu0 %vm6057_vm0, %v592_v53  ;;  %v578_v57 = vadd.f32 %v3722_v60, %v556_v49  ;;  %v536_v55 = vmul.f32 %v3116_v54, %v6142_v1  ;;  %3084 = vset.pattern.permute.xlu0 %v3234_v52  ;;  %v483_v6 = vmax.f32 %v467_v59, 0.0  ;;  %v482_v29 = vmax.f32 %v466_v24, 0.0  ;;  %v3118_v50 = vpop.eup %3117 }
  0xcf   :  { %v537_v47 = vmul.f32 %v3114_v58, %v6143_v63  ;;  %v579_v12 = vadd.f32 %v3722_v60, %v557_v17  ;;  %2154 = vperm.xlu0 %3084, %v3499_v21   ;;  %v490_v45 = vsub.f32 %v3349_v15, %v3644_v41  ;;  %3131 = vrsqrt.f32 %v512_v0  ;;  %v3120_v38 = vpop.eup %3119  ;;  %1768 = vperm.xlu1 %3069, %v3499_v21  }
  0xd0   :  { %v558_v11 = vmul.f32 %v3705_v40, %v536_v55  ;;  %v515_v5 = vadd.f32 1e-05, %v483_v6  ;;  %v514_v3 = vadd.f32 1e-05, %v482_v29  ;;  %v6144_v44 = vsub.f32 %v3344_v14, %v3635_v9  ;;  %v3762_v15 = vpop.permute.xlu1 %1180 }
  0xd1   :  { %v559_v10 = vmul.f32 %v3705_v40, %v537_v47  ;;  %v593_v62 = vpack.c.bf16 %v579_v12, %v578_v57  ;;  %v538_v41 = vmul.f32 %v3120_v38, %v490_v45  ;;  %v493_v58 = vsub.f32 %v3358_v18, %v3657_v20 }
  0xd2   :  { %v539_v61 = vmul.f32 %v3118_v50, %v6144_v44  ;;  %v580_v7 = vadd.f32 %v3722_v60, %v558_v11  ;;  %3133 = vrsqrt.f32 %v515_v5  ;;  %v3122_v14 = vpop.eup %3121  ;;  %v492_v9 = vsub.f32 %v3363_v19, %v3660_v43 }
  0xd3   :  { %v581_v2 = vadd.f32 %v3722_v60, %v559_v10  ;;  %2993 = vmatmul.mubr.msk.bf16.vlgmr.msra.gmra.mxu0 %vm6057_vm0, %v593_v62  ;;  %2170 = vperm.xlu0 %3084, %v3553_v35   ;;  %3135 = vrsqrt.f32 %v514_v3  ;;  %v560_v49 = vmul.f32 %v3705_v40, %v538_v41  ;;  %v3124_v54 = vpop.eup %3123  ;;  %v541_v59 = vmul.f32 %v3122_v14, %v493_v58 }
  0xd4   :  { %v561_v56 = vmul.f32 %v3705_v40, %v539_v61  ;;  %1776 = vperm.xlu1 %3069, %v3518_v28   ;;  %v3776_v20 = vpop.permute.xlu1 %1185  ;;  %v540_v24 = vmul.f32 %v3124_v54, %v492_v9  ;;  %v495_v19 = vsub.f32 %v3372_v22, %v3669_v48  ;;  %v494_v0 = vsub.f32 %v3377_v23, %v3676_v42  ;;  %v6148_v9 = vld [vmem:[#allocation7_spill] sm:$0xff] }
  0xd5   :  { %v594_v53 = vpack.c.bf16 %v581_v2, %v580_v7  ;;  %v582_v18 = vadd.f32 %v3722_v60, %v560_v49  ;;  %v563_v43 = vmul.f32 %v3705_v40, %v541_v59  ;;  %v497_v29 = vsub.f32 %v3386_v26, %v3680_v8 }
  0xd6   :  { %v583_v34 = vadd.f32 %v3722_v60, %v561_v56  ;;  %v3126_v17 = vpop.eup %3125  ;;  %v562_v1 = vmul.f32 %v3705_v40, %v540_v24  ;;  %v496_v12 = vsub.f32 %v3391_v27, %v3683_v46  ;;  %v499_v3 = vsub.f32 %v3400_v30, %v3691_v37 }
  0xd7   :  { %2996 = vmatprep.mubr.msk.bf16.mxu0 %vm6057_vm0, %v594_v53  ;;  %2174 = vperm.xlu0 %3084, %v3513_v25   ;;  %v3128_v55 = vpop.eup %3127  ;;  %v585_v63 = vadd.f32 %v3722_v60, %v563_v43  ;;  %v543_v47 = vmul.f32 %v3126_v17, %v495_v19  ;;  %v498_v62 = vsub.f32 %v3405_v31, %v3694_v51  ;;  %v3235_v49 = vmov 6   ;;  %v6156_v19 = vld [vmem:[#allocation6_spill] sm:$0xff]  ;;  %v6158_v17 = vld [vmem:[#allocation4_spill] sm:$0xff] }
  0xd8   :  { %v595_v57 = vpack.c.bf16 %v583_v34, %v582_v18  ;;  %1784 = vperm.xlu1 %3069, %v3553_v35   ;;  %v584_v6 = vadd.f32 %v3722_v60, %v562_v1  ;;  %v3788_v22 = vpop.permute.xlu1 %1190  ;;  %v542_v48 = vmul.f32 %v3128_v55, %v494_v0  ;;  %v6150_v34 = vld [vmem:[#allocation3_spill] sm:$0xff]  ;;  %v6151_v59 = vmov 4  }
  0xd9   :  { %6145 = vst [vmem:[#allocation9_spill] sm:$0xff] %v3788_v22  ;;  %v565_v23 = vmul.f32 %v3705_v40, %v543_v47 }
  0xda   :  { %v3130_v42 = vpop.eup %3129  ;;  %v596_v50 = vpack.c.bf16 %v585_v63, %v584_v6  ;;  %v564_v45 = vmul.f32 %v3705_v40, %v542_v48  ;;  %v6029_v6 = vmov 7  }
  0xdb   :  { %2997 = vmatmul.mubr.msk.bf16.gmra.mxu0 %vm6057_vm0, %v595_v57  ;;  %2134 = vperm.xlu0 %3084, %v3539_v33   ;;  %v587_v10 = vadd.f32 %v3722_v60, %v565_v23  ;;  %v545_v38 = vmul.f32 %v3130_v42, %v497_v29 }
  0xdc   :  { %v3132_v11 = vpop.eup %3131  ;;  %1792 = vperm.xlu1 %3069, %v3560_v36   ;;  %3000 = vmatprep.mubr.msk.bf16.mxu0 %vm6057_vm0, %v596_v50  ;;  %v586_v26 = vadd.f32 %v3722_v60, %v564_v45  ;;  %v3802_v8 = vpop.permute.xlu1 %1195  ;;  %v6168_v45 = vmov 0  }
  0xdd   :  { %6146 = vst [vmem:[#allocation10_spill] sm:$0xff] %v3802_v8  ;;  %v544_v5 = vmul.f32 %v3132_v11, %v496_v12  ;;  %v567_v27 = vmul.f32 %v3705_v40, %v545_v38  ;;  %v6166_v12 = vld [vmem:[#allocation5_spill] sm:$0xff] }
  0xde   :  { %v597_v44 = vpack.c.bf16 %v587_v10, %v586_v26  ;;  %v2620_v10 = vld [vmem:[%s6005_s8 + $0x28] sm:$0xff] }
  0xdf   :  { %2186 = vperm.xlu0 %3084, %v3567_v4   ;;  %v3134_v46 = vpop.eup %3133  ;;  %v566_v61 = vmul.f32 %v3705_v40, %v544_v5  ;;  %v589_v2 = vadd.f32 %v3722_v60, %v567_v27  ;;  %v2622_v5 = vld [vmem:[%s6005_s8 + $0x38] sm:$0xff] }
  0xe0   :  { %v3136_v7 = vpop.eup %3135  ;;  %v547_v41 = vmul.f32 %v3134_v46, %v499_v3  ;;  %1800 = vperm.xlu1 %3069, %v3567_v4   ;;  %v3814_v30 = vpop.permute.xlu1 %1200 }
  0xe1   :  { %v588_v58 = vadd.f32 %v3722_v60, %v566_v61  ;;  %6147 = vst [vmem:[#allocation11_spill] sm:$0xff] %v3814_v30  ;;  %v546_v37 = vmul.f32 %v3136_v7, %v498_v62  ;;  %v3926_v7 = vpop.permute.xlu0 %1366 }
  0xe2   :  { %v569_v56 = vmul.f32 %v3705_v40, %v547_v41  ;;  %6176 = vst [vmem:[#allocation26_spill] sm:$0xff] %v3926_v7 }
  0xe3   :  { %3001 = vmatmul.mubr.msk.bf16.gmra.mxu0 %vm6057_vm0, %v597_v44  ;;  %2190 = vperm.xlu0 %3084, %v3532_v32   ;;  %v598_v31 = vpack.c.bf16 %v589_v2, %v588_v58  ;;  %v568_v51 = vmul.f32 %v3705_v40, %v546_v37  ;;  %v6153_v40 = vld [vmem:[#allocation2_spill] sm:$0xff] }
  0xe4   :  { %v591_v14 = vadd.f32 %v3722_v60, %v569_v56  ;;  %1808 = vperm.xlu1 %3069, %v6148_v9   ;;  %v3824_v53 = vpop.permute.xlu1 %1205 }
  0xe5   :  { %3004 = vmatprep.mubr.msk.bf16.mxu0 %vm6057_vm0, %v598_v31  ;;  %v590_v4 = vadd.f32 %v3722_v60, %v568_v51  ;;  %6149 = vst [vmem:[#allocation7_spill] sm:$0xff] %v3824_v53 }
  0xe7   :  { %3088 = vset.pattern.permute.xlu0 %v3235_v49  ;;  %v599_v54 = vpack.c.bf16 %v591_v14, %v590_v4  ;;  %v2625_v4 = vld [vmem:[%s6005_s8 + $0x50] sm:$0xff] }
  0xe8   :  { %2343 = vperm.xlu0 %3088, %v6150_v34   ;;  %3072 = vset.pattern.permute.xlu1 %v6151_v59  ;;  %v3829_v18 = vpop.permute.xlu1 %1210 }
  0xe9   :  { %6152 = vst [vmem:[#allocation3_spill] sm:$0xff] %v3829_v18  ;;  %1945 = vperm.xlu1 %3072, %v6153_v40  }
  0xeb   :  { %3005 = vmatmul.mubr.msk.bf16.gmra.mxu0 %vm6057_vm0, %v599_v54 }
  0xec   :  { %2355 = vperm.xlu0 %3088, %v3518_v28   ;;  %v3834_v24 = vpop.permute.xlu1 %1220 }
  0xed   :  { %6154 = vst [vmem:[#allocation2_spill] sm:$0xff] %v3834_v24  ;;  %1949 = vperm.xlu1 %3072, %v3474_v13  }
  0xf0   :  { %2363 = vperm.xlu0 %3088, %v3553_v35   ;;  %v3838_v60 = vpop.permute.xlu1 %1230 }
  0xf1   :  { %6155 = vst [vmem:[#allocation12_spill] sm:$0xff] %v3838_v60  ;;  %1957 = vperm.xlu1 %3072, %v6150_v34  }
  0xf4   :  { %2375 = vperm.xlu0 %3088, %v6156_v19   ;;  %v3842_v43 = vpop.permute.xlu1 %1240 }
  0xf5   :  { %6157 = vst [vmem:[#allocation6_spill] sm:$0xff] %v3842_v43  ;;  %1965 = vperm.xlu1 %3072, %v6158_v17  }
  0xf8   :  { %v3846_v0 = vpop.permute.xlu1 %1362 }
  0xf9   :  { %3073 = vset.pattern.permute.xlu1 %v3234_v52  ;;  %6159 = vst [vmem:[#allocation4_spill] sm:$0xff] %v3846_v0 }
  0xfa   :  { %2150 = vperm.xlu1 %3073, %v6150_v34  }
  0xfc   :  { %v3849_v57 = vpop.permute.xlu1 %1370 }
  0xfe   :  { %2158 = vperm.xlu1 %3073, %v6158_v17  }
 0x100   :  { %v3852_v1 = vpop.permute.xlu1 %1374 }
 0x102   :  { %2162 = vperm.xlu1 %3073, %v3518_v28  }
 0x104   :  { %v3855_v55 = vpop.permute.xlu1 %1382 }
 0x106   :  { %3074 = vset.pattern.permute.xlu1 %v3235_v49 }
 0x107   :  { %2347 = vperm.xlu1 %3074, %v3499_v21  }
 0x108   :  { %v3859_v63 = vpop.permute.xlu1 %1390 }
 0x109   :  { %6160 = vst [vmem:[#allocation13_spill] sm:$0xff] %v3859_v63 }
 0x10b   :  { %2351 = vperm.xlu1 %3074, %v6158_v17  }
 0x10c   :  { %v3862_v47 = vpop.permute.xlu1 %1398 }
 0x10d   :  { %6161 = vst [vmem:[#allocation14_spill] sm:$0xff] %v3862_v47 }
 0x10f   :  { %3075 = vset.pattern.permute.xlu1 %v6029_v6 }
 0x110   :  { %2536 = vperm.xlu1 %3075, %v6150_v34   ;;  %v3866_v48 = vpop.permute.xlu1 %1406 }
 0x111   :  { %6162 = vst [vmem:[#allocation15_spill] sm:$0xff] %v3866_v48 }
 0x114   :  { %2544 = vperm.xlu1 %3075, %v6158_v17   ;;  %v3869_v29 = vpop.permute.xlu1 %1414 }
 0x115   :  { %6163 = vst [vmem:[#allocation16_spill] sm:$0xff] %v3869_v29 }
 0x118   :  { %2548 = vperm.xlu1 %3075, %v3518_v28   ;;  %v3872_v21 = vpop.permute.xlu1 %1422  ;;  %v2619_v28 = vld [vmem:[%s6005_s8 + $0x20] sm:$0xff] }
 0x119   :  { %6164 = vst [vmem:[#allocation17_spill] sm:$0xff] %v3872_v21 }
 0x11c   :  { %3076 = vset.pattern.permute.xlu1 %v6151_v59 }
 0x11d   :  { %1977 = vperm.xlu1 %3076, %v3553_v35   ;;  %v3876_v23 = vpop.permute.xlu1 %1559 }
 0x11e   :  { %6165 = vst [vmem:[#allocation18_spill] sm:$0xff] %v3876_v23 }
 0x121   :  { %1981 = vperm.xlu1 %3076, %v3513_v25   ;;  %v3879_v42 = vpop.permute.xlu1 %1563 }
 0x125   :  { %3077 = vset.pattern.permute.xlu1 %v3234_v52  ;;  %v3883_v50 = vpop.permute.xlu1 %1571 }
 0x126   :  { %2166 = vperm.xlu1 %3077, %v6166_v12   ;;  %6167 = vst [vmem:[#allocation5_spill] sm:$0xff] %v3883_v50 }
 0x129   :  { %v3889_v11 = vpop.permute.xlu1 %1579 }
 0x12a   :  { %3078 = vset.pattern.permute.xlu1 %v6168_v45  ;;  %6169 = vst [vmem:[#allocation19_spill] sm:$0xff] %v3889_v11 }
 0x12b   :  { %2653 = vperm.xlu1 %3078, %v2619_v28  }
 0x12d   :  { %v3894_v38 = vpop.permute.xlu1 %1587 }
 0x12e   :  { %6170 = vst [vmem:[#allocation20_spill] sm:$0xff] %v3894_v38  ;;  %v2630_v38 = vld [vmem:[%s6005_s8 + $0x78] sm:$0xff] }
 0x12f   :  { %2658 = vperm.xlu1 %3078, %v2620_v10  }
 0x131   :  { %v3896_v26 = vpop.permute.xlu1 %1595 }
 0x132   :  { %6171 = vst [vmem:[#allocation21_spill] sm:$0xff] %v3896_v26 }
 0x133   :  { %3079 = vset.pattern.permute.xlu1 %v3234_v52 }
 0x134   :  { %2178 = vperm.xlu1 %3079, %v3560_v36  }
 0x135   :  { %v3904_v3 = vpop.permute.xlu1 %1603 }
 0x136   :  { %6172 = vst [vmem:[#allocation22_spill] sm:$0xff] %v3904_v3 }
 0x138   :  { %3080 = vset.pattern.permute.xlu1 %v6168_v45 }
 0x139   :  { %2668 = vperm.xlu1 %3080, %v2622_v5   ;;  %v3907_v27 = vpop.permute.xlu1 %1611 }
 0x13a   :  { %6173 = vst [vmem:[#allocation23_spill] sm:$0xff] %v3907_v27 }
 0x13d   :  { %3081 = vset.pattern.permute.xlu1 %v3235_v49 }
 0x13e   :  { %2359 = vperm.xlu1 %3081, %v6166_v12   ;;  %v3911_v46 = vpop.permute.xlu1 %1748 }
 0x13f   :  { %6174 = vst [vmem:[#allocation24_spill] sm:$0xff] %v3911_v46 }
 0x142   :  { %2367 = vperm.xlu1 %3081, %v3513_v25   ;;  %v3914_v62 = vpop.permute.xlu1 %1756 }
 0x146   :  { %2371 = vperm.xlu1 %3081, %v3560_v36   ;;  %v3919_v44 = vpop.permute.xlu1 %1760 }
 0x14a   :  { %3082 = vset.pattern.permute.xlu1 %v6029_v6  ;;  %v3923_v61 = vpop.permute.xlu1 %1768 }
 0x14b   :  { %2556 = vperm.xlu1 %3082, %v3553_v35   ;;  %6175 = vst [vmem:[#allocation25_spill] sm:$0xff] %v3923_v61  ;;  %v3932_v35 = vpop.permute.xlu0 %1378 }
 0x14c   :  { %6178 = vst [vmem:[#allocation28_spill] sm:$0xff] %v3932_v35 }
 0x14f   :  { %2560 = vperm.xlu1 %3082, %v3513_v25   ;;  %v3928_v36 = vpop.permute.xlu1 %1776  ;;  %v3938_v2 = vpop.permute.xlu0 %1386 }
 0x150   :  { %6177 = vst [vmem:[#allocation27_spill] sm:$0xff] %v3928_v36  ;;  %6180 = vst [vmem:[#allocation30_spill] sm:$0xff] %v3938_v2 }
 0x153   :  { %3083 = vset.pattern.permute.xlu1 %v6151_v59  ;;  %v3935_v25 = vpop.permute.xlu1 %1784  ;;  %v3946_v58 = vpop.permute.xlu0 %1394 }
 0x154   :  { %1989 = vperm.xlu1 %3083, %v6156_v19   ;;  %6179 = vst [vmem:[#allocation29_spill] sm:$0xff] %v3935_v25  ;;  %6182 = vst [vmem:[#allocation32_spill] sm:$0xff] %v3946_v58 }
 0x157   :  { %v3943_v41 = vpop.permute.xlu1 %1792  ;;  %v3952_v56 = vpop.permute.xlu0 %1402 }
 0x158   :  { %1997 = vperm.xlu1 %3083, %v3532_v32   ;;  %v2623_v32 = vld [vmem:[%s6005_s8 + $0x40] sm:$0xff]  ;;  %6181 = vst [vmem:[#allocation31_spill] sm:$0xff] %v3943_v41  ;;  %6184 = vst [vmem:[#allocation34_spill] sm:$0xff] %v3952_v56 }
 0x15b   :  { %v3948_v37 = vpop.permute.xlu1 %1800  ;;  %v3960_v14 = vpop.permute.xlu0 %1410 }
 0x15c   :  { %2001 = vperm.xlu1 %3083, %v6148_v9   ;;  %6183 = vst [vmem:[#allocation33_spill] sm:$0xff] %v3948_v37  ;;  %6187 = vst [vmem:[#allocation37_spill] sm:$0xff] %v3960_v14 }
 0x15f   :  { %v3955_v31 = vpop.permute.xlu1 %1808 }
 0x160   :  { %3085 = vset.pattern.permute.xlu1 %v3234_v52  ;;  %6185 = vst [vmem:[#allocation35_spill] sm:$0xff] %v3955_v31 }
 0x161   :  { %2138 = vperm.xlu1 %3085, %v6153_v40  }
 0x164   :  { %v3958_v51 = vpop.permute.xlu1 %1945 }
 0x165   :  { %2182 = vperm.xlu1 %3085, %v6156_v19   ;;  %6186 = vst [vmem:[#allocation36_spill] sm:$0xff] %v3958_v51  ;;  %v3986_v19 = vld [vmem:[%s6006_s4] ss:$0 sm:$0xff] }
 0x169   :  { %3086 = vset.pattern.permute.xlu1 %v6168_v45 }
 0x16a   :  { %2673 = vperm.xlu1 %3086, %v2623_v32  }
 0x16e   :  { %3087 = vset.pattern.permute.xlu1 %v3234_v52  ;;  %v3968_v52 = vpop.permute.xlu0 %1418 }
 0x16f   :  { %2142 = vperm.xlu1 %3087, %v3474_v13   ;;  %v3966_v13 = vpop.permute.xlu1 %1949  ;;  %6188 = vst [vmem:[#allocation38_spill] sm:$0xff] %v3968_v52 }
 0x173   :  { %2146 = vperm.xlu1 %3087, %v3480_v16   ;;  %v3972_v16 = vpop.permute.xlu1 %1957 }
 0x174   :  { %6189 = vst [vmem:[#allocation39_spill] sm:$0xff] %v3972_v16 }
 0x177   :  { %2194 = vperm.xlu1 %3087, %v6148_v9   ;;  %v3974_v9 = vpop.permute.xlu0 %1555  ;;  %v3977_v54 = vpop.permute.xlu1 %1965 }
 0x178   :  { %6190 = vst [vmem:[#allocation40_spill] sm:$0xff] %v3974_v9  ;;  %6191 = vst [vmem:[#allocation41_spill] sm:$0xff] %v3977_v54 }
 0x17b   :  { %3089 = vset.pattern.permute.xlu1 %v6168_v45  ;;  %v3979_v34 = vpop.permute.xlu0 %1567  ;;  %v3981_v59 = vpop.permute.xlu1 %2150 }
 0x17c   :  { %2683 = vperm.xlu1 %3089, %v2625_v4   ;;  %6192 = vst [vmem:[#allocation42_spill] sm:$0xff] %v3981_v59 }
 0x17f   :  { %v3993_v28 = vpop.permute.xlu1 %2158 }
 0x180   :  { %3090 = vset.pattern.permute.xlu1 %v3235_v49  ;;  %v3988_v49 = vpop.permute.xlu0 %1575  ;;  %6194 = vst [vmem:[#allocation44_spill] sm:$0xff] %v3993_v28 }
 0x181   :  { %2327 = vperm.xlu1 %3090, %v3539_v33   ;;  %6193 = vst [vmem:[#allocation43_spill] sm:$0xff] %v3988_v49 }
 0x184   :  { %v4000_v32 = vpop.permute.xlu0 %1583 }
 0x185   :  { %2331 = vperm.xlu1 %3090, %v6153_v40   ;;  %6195 = vst [vmem:[#allocation45_spill] sm:$0xff] %v4000_v32  ;;  %v4014_v32 = vpop.permute.xlu1 %2162 }
 0x186   :  { %6196 = vst [vmem:[#allocation46_spill] sm:$0xff] %v4014_v32 }
 0x188   :  { %v4023_v31 = vpop.permute.xlu0 %1591 }
 0x189   :  { %6197 = vst [vmem:[#allocation47_spill] sm:$0xff] %v4023_v31  ;;  %v4032_v37 = vpop.permute.xlu1 %2347 }
 0x18a   :  { %6198 = vst [vmem:[#allocation48_spill] sm:$0xff] %v4032_v37 }
 0x193   :  { %v2994_v33 = vpop.f32.mrf.mxu0 }
 0x194   :  { %v3991_v17 = vadd.f32 %v2994_v33, %v3986_v19 }
 0x195   :  { %v676_v12 = vpop.f32.mrf.mxu0 }
 0x196   :  { %v741_v40 = vmul.f32 %v3991_v17, %v3991_v17  ;;  %v3998_v10 = vadd.f32 %v3986_v19, %v676_v12 }
 0x197   :  { %v2995_v5 = vpop.f32.mrf.mxu0 }
 0x198   :  { %v757_v4 = vmul.f32 %v741_v40, %v3991_v17  ;;  %v739_v6 = vmul.f32 %v3998_v10, %v3998_v10  ;;  %v4006_v33 = vadd.f32 %v2995_v5, %v3986_v19 }
 0x199   :  { %v679_v36 = vpop.f32.mrf.mxu0 }
 0x19a   :  { %v773_v63 = vmul.f32 0.044715, %v757_v4  ;;  %v755_v53 = vmul.f32 %v739_v6, %v3998_v10  ;;  %v742_v28 = vmul.f32 %v4006_v33, %v4006_v33  ;;  %v4012_v12 = vadd.f32 %v3986_v19, %v679_v36 }
 0x19b   :  { %v2998_v54 = vpop.f32.mrf.mxu0 }
 0x19c   :  { %v789_v40 = vadd.f32 %v773_v63, %v3991_v17  ;;  %v771_v11 = vmul.f32 0.044715, %v755_v53  ;;  %v758_v2 = vmul.f32 %v742_v28, %v4006_v33  ;;  %v740_v5 = vmul.f32 %v4012_v12, %v4012_v12 }
 0x19d   :  { %v4021_v4 = vadd.f32 %v2998_v54, %v3986_v19  ;;  %v692_v6 = vpop.f32.mrf.mxu0 }
 0x19e   :  { %v805_v30 = vmul.f32 0.7978846, %v789_v40  ;;  %v787_v36 = vadd.f32 %v771_v11, %v3998_v10  ;;  %v774_v21 = vmul.f32 0.044715, %v758_v2  ;;  %v756_v32 = vmul.f32 %v740_v5, %v4012_v12 }
 0x19f   :  { %v745_v53 = vmul.f32 %v4021_v4, %v4021_v4  ;;  %v4030_v63 = vadd.f32 %v3986_v19, %v692_v6  ;;  %v2999_v28 = vpop.f32.mrf.mxu0 }
 0x1a0   :  { %3137 = vtanh.f32 %v805_v30  ;;  %v803_v54 = vmul.f32 0.7978846, %v787_v36  ;;  %v790_v29 = vadd.f32 %v774_v21, %v4006_v33  ;;  %v772_v41 = vmul.f32 0.044715, %v756_v32 }
 0x1a1   :  { %v761_v40 = vmul.f32 %v745_v53, %v4021_v4  ;;  %v743_v11 = vmul.f32 %v4030_v63, %v4030_v63  ;;  %v4039_v2 = vadd.f32 %v2999_v28, %v3986_v19  ;;  %v695_v5 = vpop.f32.mrf.mxu0  ;;  %v4048_v53 = vpop.permute.xlu0 %1599 }
 0x1a2   :  { %v806_v26 = vmul.f32 0.7978846, %v790_v29  ;;  %v788_v6 = vadd.f32 %v772_v41, %v4012_v12  ;;  %v4043_v48 = vadd.f32 %v3986_v19, %v695_v5  ;;  %3139 = vtanh.f32 %v803_v54  ;;  %6199 = vst [vmem:[#allocation49_spill] sm:$0xff] %v4048_v53 }
 0x1a3   :  { %v777_v30 = vmul.f32 0.044715, %v761_v40  ;;  %v759_v21 = vmul.f32 %v743_v11, %v4030_v63  ;;  %v746_v32 = vmul.f32 %v4039_v2, %v4039_v2  ;;  %v3002_v36 = vpop.f32.mrf.mxu0  ;;  %v4057_v11 = vpop.permute.xlu1 %2351 }
 0x1a4   :  { %3141 = vtanh.f32 %v806_v26  ;;  %v804_v28 = vmul.f32 0.7978846, %v788_v6  ;;  %v744_v29 = vmul.f32 %v4043_v48, %v4043_v48  ;;  %v4055_v54 = vadd.f32 %v3002_v36, %v3986_v19  ;;  %6200 = vst [vmem:[#allocation50_spill] sm:$0xff] %v4057_v11 }
 0x1a5   :  { %v793_v41 = vadd.f32 %v777_v30, %v4021_v4  ;;  %v775_v56 = vmul.f32 0.044715, %v759_v21  ;;  %v762_v5 = vmul.f32 %v746_v32, %v4039_v2  ;;  %v708_v40 = vpop.f32.mrf.mxu0  ;;  %v4070_v31 = vpop.permute.xlu0 %1607 }
 0x1a6   :  { %3143 = vtanh.f32 %v804_v28  ;;  %v760_v25 = vmul.f32 %v744_v29, %v4043_v48  ;;  %v4061_v26 = vadd.f32 %v3986_v19, %v708_v40  ;;  %v749_v11 = vmul.f32 %v4055_v54, %v4055_v54  ;;  %6201 = vst [vmem:[#allocation51_spill] sm:$0xff] %v4070_v31 }
 0x1a7   :  { %v778_v53 = vmul.f32 0.044715, %v762_v5  ;;  %v3003_v6 = vpop.f32.mrf.mxu0  ;;  %v809_v21 = vmul.f32 0.7978846, %v793_v41  ;;  %v791_v32 = vadd.f32 %v775_v56, %v4030_v63  ;;  %v4074_v5 = vpop.permute.xlu1 %2536 }
 0x1a8   :  { %v776_v24 = vmul.f32 0.044715, %v760_v25  ;;  %v4064_v30 = vadd.f32 %v3003_v6, %v3986_v19  ;;  %v747_v29 = vmul.f32 %v4061_v26, %v4061_v26  ;;  %6202 = vst [vmem:[#allocation52_spill] sm:$0xff] %v4074_v5  ;;  %v765_v31 = vmul.f32 %v749_v11, %v4055_v54 }
 0x1a9   :  { %v794_v36 = vadd.f32 %v778_v53, %v4039_v2  ;;  %v711_v28 = vpop.f32.mrf.mxu0  ;;  %3145 = vtanh.f32 %v809_v21  ;;  %v807_v47 = vmul.f32 0.7978846, %v791_v32  ;;  %v4084_v46 = vpop.permute.xlu0 %1615 }
 0x1aa   :  { %v792_v40 = vadd.f32 %v776_v24, %v4043_v48  ;;  %v750_v41 = vmul.f32 %v4064_v30, %v4064_v30  ;;  %v4080_v56 = vadd.f32 %v3986_v19, %v711_v28  ;;  %v763_v3 = vmul.f32 %v747_v29, %v4061_v26  ;;  %6203 = vst [vmem:[#allocation53_spill] sm:$0xff] %v4084_v46 }
 0x1ab   :  { %v810_v25 = vmul.f32 0.7978846, %v794_v36  ;;  %v3006_v53 = vpop.f32.mrf.mxu0  ;;  %v781_v21 = vmul.f32 0.044715, %v765_v31  ;;  %v4089_v51 = vpop.permute.xlu1 %2544 }
 0x1ac   :  { %v808_v24 = vmul.f32 0.7978846, %v792_v40  ;;  %v766_v36 = vmul.f32 %v750_v41, %v4064_v30  ;;  %v748_v28 = vmul.f32 %v4080_v56, %v4080_v56  ;;  %6204 = vst [vmem:[#allocation54_spill] sm:$0xff] %v4089_v51  ;;  %v779_v29 = vmul.f32 0.044715, %v763_v3 }
 0x1ad   :  { %v3138_v6 = vpop.eup %3137  ;;  %3147 = vtanh.f32 %v810_v25  ;;  %v724_v9 = vpop.f32.mrf.mxu0  ;;  %v797_v31 = vadd.f32 %v781_v21, %v4055_v54 }
 0x1ae   :  { %v837_v14 = vadd.f32 1.0, %v3138_v6  ;;  %3149 = vtanh.f32 %v807_v47  ;;  %v4092_v6 = vadd.f32 %v3006_v53, %v3986_v19  ;;  %v4097_v40 = vpop.permute.xlu0 %1752  ;;  %v782_v41 = vmul.f32 0.044715, %v766_v36 }
 0x1af   :  { %v3140_v60 = vpop.eup %3139  ;;  %6206 = vst [vmem:[#allocation56_spill] sm:$0xff] %v4097_v40  ;;  %3151 = vtanh.f32 %v808_v24  ;;  %v764_v46 = vmul.f32 %v748_v28, %v4080_v56  ;;  %v3007_v23 = vpop.f32.mrf.mxu0  ;;  %v795_v53 = vadd.f32 %v779_v29, %v4061_v26  ;;  %v4115_v29 = vadd.f32 %v3986_v19, %v724_v9 }
 0x1b0   :  { %v853_v32 = vmul.f32 0.5, %v837_v14  ;;  %v835_v14 = vadd.f32 1.0, %v3140_v60  ;;  %v4108_v36 = vpop.permute.xlu1 %2548 }
 0x1b1   :  { %v3142_v0 = vpop.eup %3141  ;;  %6207 = vst [vmem:[#allocation57_spill] sm:$0xff] %v4108_v36  ;;  %v780_v28 = vmul.f32 0.044715, %v764_v46  ;;  %v727_v21 = vpop.f32.mrf.mxu0 }
 0x1b2   :  { %v4095_v25 = vmul.f32 %v853_v32, %v3991_v17  ;;  %v838_v47 = vadd.f32 1.0, %v3142_v0  ;;  %v753_v17 = vmul.f32 %v4092_v6, %v4092_v6  ;;  %v4106_v32 = vadd.f32 %v3007_v23, %v3986_v19  ;;  %v4120_v7 = vpop.permute.xlu0 %1764 }
 0x1b3   :  { %v3144_v11 = vpop.eup %3143  ;;  %v851_v24 = vmul.f32 0.5, %v835_v14  ;;  %v798_v0 = vadd.f32 %v782_v41, %v4064_v30  ;;  %6210 = vst [vmem:[#allocation60_spill] sm:$0xff] %v4120_v7  ;;  %v811_v14 = vmul.f32 0.7978846, %v795_v53  ;;  %v796_v41 = vadd.f32 %v780_v28, %v4080_v56 }
 0x1b4   :  { %6205 = vst [vmem:[#allocation55_spill] sm:$0xff] %v4095_v25  ;;  %887 = vadd.xlane.f32.xlu0 %v4095_v25  ;;  %v854_v3 = vmul.f32 0.5, %v838_v47  ;;  %v836_v51 = vadd.f32 1.0, %v3144_v11  ;;  %v813_v11 = vmul.f32 0.7978846, %v797_v31  ;;  %v769_v46 = vmul.f32 %v753_v17, %v4092_v6  ;;  %v4130_v9 = vpop.permute.xlu1 %1977 }
 0x1b5   :  { %v4118_v47 = vmul.f32 %v851_v24, %v3998_v10  ;;  %6211 = vst [vmem:[#allocation61_spill] sm:$0xff] %v4130_v9  ;;  %v814_v10 = vmul.f32 0.7978846, %v798_v0  ;;  %v751_v53 = vmul.f32 %v4115_v29, %v4115_v29  ;;  %v934_v17 = vmul.f32 %v4095_v25, %v4095_v25 }
 0x1b6   :  { %v4112_v40 = vmul.f32 %v854_v3, %v4006_v33  ;;  %v852_v60 = vmul.f32 0.5, %v836_v51  ;;  %v3146_v23 = vpop.eup %3145  ;;  %v754_v33 = vmul.f32 %v4106_v32, %v4106_v32  ;;  %v4127_v51 = vadd.f32 %v3986_v19, %v727_v21  ;;  %v4144_v28 = vpop.permute.xlu0 %1772 }
 0x1b7   :  { %6209 = vst [vmem:[#allocation59_spill] sm:$0xff] %v4118_v47  ;;  %3153 = vtanh.f32 %v813_v11  ;;  %v841_v19 = vadd.f32 1.0, %v3146_v23  ;;  %v785_v21 = vmul.f32 0.044715, %v769_v46  ;;  %6213 = vst [vmem:[#allocation63_spill] sm:$0xff] %v4144_v28  ;;  %v767_v9 = vmul.f32 %v751_v53, %v4115_v29 }
 0x1b8   :  { %6208 = vst [vmem:[#allocation58_spill] sm:$0xff] %v4112_v40  ;;  %889 = vadd.xlane.f32.xlu1 %v4112_v40  ;;  %883 = vadd.xlane.f32.xlu0 %v4118_v47  ;;  %v4134_v31 = vmul.f32 %v852_v60, %v4012_v12  ;;  %3155 = vtanh.f32 %v811_v14  ;;  %v770_v0 = vmul.f32 %v754_v33, %v4106_v32  ;;  %v812_v60 = vmul.f32 0.7978846, %v796_v41  ;;  %v4151_v33 = vpop.permute.xlu1 %1981 }
 0x1b9   :  { %v752_v12 = vmul.f32 %v4127_v51, %v4127_v51  ;;  %3157 = vtanh.f32 %v814_v10  ;;  %v935_v11 = vmul.f32 %v4112_v40, %v4112_v40  ;;  %v932_v14 = vmul.f32 %v4118_v47, %v4118_v47  ;;  %6214 = vst [vmem:[#allocation64_spill] sm:$0xff] %v4151_v33 }
 0x1ba   :  { %6212 = vst [vmem:[#allocation62_spill] sm:$0xff] %v4134_v31  ;;  %v3148_v3 = vpop.eup %3147  ;;  %v857_v46 = vmul.f32 0.5, %v841_v19  ;;  %3159 = vtanh.f32 %v812_v60  ;;  %v933_v10 = vmul.f32 %v4134_v31, %v4134_v31  ;;  %v801_v53 = vadd.f32 %v785_v21, %v4092_v6  ;;  %v4160_v33 = vpop.permute.xlu0 %1780 }
 0x1bb   :  { %v3150_v24 = vpop.eup %3149  ;;  %v842_v36 = vadd.f32 1.0, %v3148_v3  ;;  %v768_v28 = vmul.f32 %v752_v12, %v4127_v51  ;;  %v783_v39 = vmul.f32 0.044715, %v767_v9  ;;  %6216 = vst [vmem:[#allocation66_spill] sm:$0xff] %v4160_v33  ;;  %v2618_v33 = vld [vmem:[%s6005_s8 + $0x18] sm:$0xff] }
 0x1bc   :  { %885 = vadd.xlane.f32.xlu1 %v4134_v31  ;;  %952 = vadd.xlane.f32.xlu0 %v934_v17  ;;  %v3152_v23 = vpop.eup %3151  ;;  %v839_v5 = vadd.f32 1.0, %v3150_v24  ;;  %v786_v17 = vmul.f32 0.044715, %v770_v0  ;;  %v4158_v59 = vmul.f32 %v857_v46, %v4021_v4  ;;  %v4163_v24 = vpop.permute.xlu1 %2166  ;;  %v817_v21 = vmul.f32 0.7978846, %v801_v53 }
 0x1bd   :  { %v858_v41 = vmul.f32 0.5, %v842_v36  ;;  %v840_v3 = vadd.f32 1.0, %v3152_v23  ;;  %6217 = vst [vmem:[#allocation67_spill] sm:$0xff] %v4163_v24  ;;  %v784_v12 = vmul.f32 0.044715, %v768_v28  ;;  %v799_v9 = vadd.f32 %v783_v39, %v4115_v29 }
 0x1be   :  { %6215 = vst [vmem:[#allocation65_spill] sm:$0xff] %v4158_v59  ;;  %v855_v19 = vmul.f32 0.5, %v839_v5  ;;  %v802_v0 = vadd.f32 %v786_v17, %v4106_v32  ;;  %v4175_v23 = vpop.permute.xlu0 %1788  ;;  %3161 = vtanh.f32 %v817_v21 }
 0x1bf   :  { %v4167_v36 = vmul.f32 %v858_v41, %v4039_v2  ;;  %v856_v60 = vmul.f32 0.5, %v840_v3  ;;  %6219 = vst [vmem:[#allocation69_spill] sm:$0xff] %v4175_v23  ;;  %v800_v28 = vadd.f32 %v784_v12, %v4127_v51  ;;  %v815_v39 = vmul.f32 0.7978846, %v799_v9 }
 0x1c0   :  { %954 = vadd.xlane.f32.xlu1 %v935_v11  ;;  %948 = vadd.xlane.f32.xlu0 %v932_v14  ;;  %v4171_v4 = vmul.f32 %v855_v19, %v4030_v63  ;;  %v818_v14 = vmul.f32 0.7978846, %v802_v0  ;;  %v938_v63 = vmul.f32 %v4158_v59, %v4158_v59  ;;  %v4183_v17 = vpop.permute.xlu1 %2653 }
 0x1c1   :  { %6218 = vst [vmem:[#allocation68_spill] sm:$0xff] %v4167_v36  ;;  %v4179_v2 = vmul.f32 %v856_v60, %v4043_v48  ;;  %6220 = vst [vmem:[#allocation70_spill] sm:$0xff] %v4183_v17  ;;  %v816_v41 = vmul.f32 0.7978846, %v800_v28  ;;  %v939_v3 = vmul.f32 %v4167_v36, %v4167_v36 }
 0x1c2   :  { %3163 = vtanh.f32 %v818_v14  ;;  %v936_v19 = vmul.f32 %v4171_v4, %v4171_v4  ;;  %v4190_v60 = vpop.permute.xlu0 %1796 }
 0x1c3   :  { %3165 = vtanh.f32 %v815_v39  ;;  %6221 = vst [vmem:[#allocation71_spill] sm:$0xff] %v4190_v60  ;;  %v937_v9 = vmul.f32 %v4179_v2, %v4179_v2  ;;  %v3208_v60 = vld [vmem:[%s6002_s7 + $0x40] sm:$0xff] }
 0x1c4   :  { %950 = vadd.xlane.f32.xlu1 %v933_v10  ;;  %895 = vadd.xlane.f32.xlu0 %v4158_v59  ;;  %v3154_v5 = vpop.eup %3153  ;;  %v4192_v21 = vpop.permute.xlu1 %2658  ;;  %3167 = vtanh.f32 %v816_v41 }
 0x1c5   :  { %v3156_v11 = vpop.eup %3155  ;;  %v845_v10 = vadd.f32 1.0, %v3154_v5  ;;  %6222 = vst [vmem:[#allocation72_spill] sm:$0xff] %v4192_v21 }
 0x1c6   :  { %v3158_v46 = vpop.eup %3157  ;;  %v843_v12 = vadd.f32 1.0, %v3156_v11  ;;  %v4200_v11 = vpop.permute.xlu0 %1804 }
 0x1c7   :  { %v846_v53 = vadd.f32 1.0, %v3158_v46  ;;  %v3160_v48 = vpop.eup %3159  ;;  %v861_v0 = vmul.f32 0.5, %v845_v10  ;;  %6224 = vst [vmem:[#allocation74_spill] sm:$0xff] %v4200_v11 }
 0x1c8   :  { %897 = vadd.xlane.f32.xlu1 %v4167_v36  ;;  %891 = vadd.xlane.f32.xlu0 %v4171_v4  ;;  %v844_v14 = vadd.f32 1.0, %v3160_v48  ;;  %v859_v46 = vmul.f32 0.5, %v843_v12  ;;  %v4208_v41 = vpop.permute.xlu1 %2178 }
 0x1c9   :  { %v862_v5 = vmul.f32 0.5, %v846_v53  ;;  %v4197_v28 = vmul.f32 %v861_v0, %v4055_v54  ;;  %6227 = vst [vmem:[#allocation77_spill] sm:$0xff] %v4208_v41  ;;  %v3204_v41 = vld [vmem:[%s6002_s7 + $0x78] sm:$0xff] }
 0x1ca   :  { %v4206_v10 = vmul.f32 %v859_v46, %v4061_v26  ;;  %v4217_v0 = vpop.permute.xlu0 %1941 }
 0x1cb   :  { %6223 = vst [vmem:[#allocation73_spill] sm:$0xff] %v4197_v28  ;;  %v4203_v39 = vmul.f32 %v862_v5, %v4064_v30  ;;  %v942_v48 = vmul.f32 %v4197_v28, %v4197_v28  ;;  %6228 = vst [vmem:[#allocation78_spill] sm:$0xff] %v4217_v0 }
 0x1cc   :  { %893 = vadd.xlane.f32.xlu1 %v4179_v2  ;;  %960 = vadd.xlane.f32.xlu0 %v938_v63  ;;  %v860_v63 = vmul.f32 0.5, %v844_v14  ;;  %6226 = vst [vmem:[#allocation76_spill] sm:$0xff] %v4206_v10  ;;  %v4220_v26 = vpop.permute.xlu1 %2668 }
 0x1cd   :  { %6225 = vst [vmem:[#allocation75_spill] sm:$0xff] %v4203_v39  ;;  %6229 = vst [vmem:[#allocation79_spill] sm:$0xff] %v4220_v26  ;;  %v943_v12 = vmul.f32 %v4203_v39, %v4203_v39 }
 0x1ce   :  { %v4213_v54 = vmul.f32 %v860_v63, %v4080_v56  ;;  %v940_v56 = vmul.f32 %v4206_v10, %v4206_v10  ;;  %v4226_v63 = vpop.permute.xlu0 %1953 }
 0x1d0   :  { %962 = vadd.xlane.f32.xlu1 %v939_v3  ;;  %956 = vadd.xlane.f32.xlu0 %v936_v19  ;;  %v3162_v3 = vpop.eup %3161  ;;  %v4230_v26 = vpop.permute.xlu1 %2359 }
 0x1d1   :  { %v3164_v53 = vpop.eup %3163  ;;  %v849_v30 = vadd.f32 1.0, %v3162_v3  ;;  %v941_v3 = vmul.f32 %v4213_v54, %v4213_v54  ;;  %6230 = vst [vmem:[#allocation80_spill] sm:$0xff] %v4230_v26  ;;  %v2628_v26 = vld [vmem:[%s6005_s8 + $0x68] sm:$0xff] }
 0x1d2   :  { %v3166_v19 = vpop.eup %3165 }
 0x1d3   :  { %v3168_v5 = vpop.eup %3167  ;;  %v865_v14 = vmul.f32 0.5, %v849_v30  ;;  %v847_v46 = vadd.f32 1.0, %v3166_v19 }
 0x1d4   :  { %958 = vadd.xlane.f32.xlu1 %v937_v9  ;;  %903 = vadd.xlane.f32.xlu0 %v4197_v28  ;;  %v850_v9 = vadd.f32 1.0, %v3164_v53  ;;  %v848_v23 = vadd.f32 1.0, %v3168_v5 }
 0x1d5   :  { %v4233_v0 = vmul.f32 %v865_v14, %v4092_v6  ;;  %v863_v53 = vmul.f32 0.5, %v847_v46 }
 0x1d6   :  { %v864_v19 = vmul.f32 0.5, %v848_v23 }
 0x1d7   :  { %6231 = vst [vmem:[#allocation81_spill] sm:$0xff] %v4233_v0  ;;  %v946_v5 = vmul.f32 %v4233_v0, %v4233_v0 }
 0x1d8   :  { %905 = vadd.xlane.f32.xlu1 %v4203_v39  ;;  %899 = vadd.xlane.f32.xlu0 %v4206_v10  ;;  %v4249_v6 = vmul.f32 %v864_v19, %v4127_v51 }
 0x1da   :  { %6236 = vst [vmem:[#allocation86_spill] sm:$0xff] %v4249_v6  ;;  %v945_v51 = vmul.f32 %v4249_v6, %v4249_v6 }
 0x1dc   :  { %901 = vadd.xlane.f32.xlu1 %v4213_v54  ;;  %968 = vadd.xlane.f32.xlu0 %v942_v48  ;;  %v866_v48 = vmul.f32 0.5, %v850_v9  ;;  %v4245_v9 = vpop.permute.xlu1 %2367 }
 0x1dd   :  { %6235 = vst [vmem:[#allocation85_spill] sm:$0xff] %v4245_v9 }
 0x1de   :  { %v4237_v30 = vmul.f32 %v866_v48, %v4106_v32 }
 0x1e0   :  { %970 = vadd.xlane.f32.xlu1 %v943_v12  ;;  %964 = vadd.xlane.f32.xlu0 %v940_v56  ;;  %6232 = vst [vmem:[#allocation82_spill] sm:$0xff] %v4237_v30  ;;  %v4240_v12 = vmul.f32 %v863_v53, %v4115_v29  ;;  %v4242_v56 = vpop.permute.xlu0 %1961  ;;  %v947_v29 = vmul.f32 %v4237_v30, %v4237_v30  ;;  %v4258_v23 = vpop.permute.xlu1 %2371 }
 0x1e1   :  { %6234 = vst [vmem:[#allocation84_spill] sm:$0xff] %v4242_v56  ;;  %6238 = vst [vmem:[#allocation88_spill] sm:$0xff] %v4258_v23 }
 0x1e2   :  { %6233 = vst [vmem:[#allocation83_spill] sm:$0xff] %v4240_v12  ;;  %v944_v14 = vmul.f32 %v4240_v12, %v4240_v12 }
 0x1e4   :  { %966 = vadd.xlane.f32.xlu1 %v941_v3  ;;  %911 = vadd.xlane.f32.xlu0 %v4233_v0  ;;  %v4254_v32 = vpop.permute.xlu0 %1969  ;;  %v4264_v46 = vpop.permute.xlu1 %2556 }
 0x1e5   :  { %6237 = vst [vmem:[#allocation87_spill] sm:$0xff] %v4254_v32  ;;  %6239 = vst [vmem:[#allocation89_spill] sm:$0xff] %v4264_v46  ;;  %v6250_v46 = vmov 7  }
 0x1e8   :  { %913 = vadd.xlane.f32.xlu1 %v4237_v30  ;;  %907 = vadd.xlane.f32.xlu0 %v4240_v12  ;;  %v4266_v3 = vpop.permute.xlu0 %1973  ;;  %v4268_v48 = vpop.permute.xlu1 %2560 }
 0x1e9   :  { %6240 = vst [vmem:[#allocation90_spill] sm:$0xff] %v4266_v3  ;;  %6241 = vst [vmem:[#allocation91_spill] sm:$0xff] %v4268_v48  ;;  %v3203_v48 = vld [vmem:[%s6002_s7 + $0x10] sm:$0xff] }
 0x1ec   :  { %909 = vadd.xlane.f32.xlu1 %v4249_v6  ;;  %976 = vadd.xlane.f32.xlu0 %v946_v5  ;;  %v4270_v53 = vpop.permute.xlu0 %1985  ;;  %v4272_v19 = vpop.permute.xlu1 %1989 }
 0x1ed   :  { %6242 = vst [vmem:[#allocation92_spill] sm:$0xff] %v4270_v53  ;;  %6243 = vst [vmem:[#allocation93_spill] sm:$0xff] %v4272_v19  ;;  %v3205_v53 = vld [vmem:[%s6002_s7 + $0x70] sm:$0xff] }
 0x1f0   :  { %978 = vadd.xlane.f32.xlu1 %v947_v29  ;;  %972 = vadd.xlane.f32.xlu0 %v944_v14  ;;  %v4274_v5 = vpop.permute.xlu0 %1993  ;;  %v4278_v29 = vpop.permute.xlu1 %1997  ;;  %v3201_v14 = vld [vmem:[%s6002_s7 + $0x68] sm:$0xff] }
 0x1f1   :  { %6244 = vst [vmem:[#allocation94_spill] sm:$0xff] %v4274_v5  ;;  %6246 = vst [vmem:[#allocation96_spill] sm:$0xff] %v4278_v29 }
 0x1f4   :  { %974 = vadd.xlane.f32.xlu1 %v945_v51  ;;  %v4276_v9 = vpop.permute.xlu0 %2154  ;;  %v3202_v51 = vld [vmem:[%s6002_s7 + $0x18] sm:$0xff]  ;;  %v4291_v23 = vpop.permute.xlu1 %2001 }
 0x1f5   :  { %6245 = vst [vmem:[#allocation95_spill] sm:$0xff] %v4276_v9  ;;  %6248 = vst [vmem:[#allocation98_spill] sm:$0xff] %v4291_v23  ;;  %v3206_v23 = vld [vmem:[%s6002_s7 + $0x28] sm:$0xff] }
 0x1f8   :  { %v4289_v5 = vpop.permute.xlu0 %2170  ;;  %v4299_v32 = vpop.permute.xlu1 %2138 }
 0x1f9   :  { %6247 = vst [vmem:[#allocation97_spill] sm:$0xff] %v4289_v5  ;;  %6249 = vst [vmem:[#allocation99_spill] sm:$0xff] %v4299_v32  ;;  %v3207_v5 = vld [vmem:[%s6002_s7] sm:$0xff] }
 0x1fc   :  { %v4302_v19 = vpop.permute.xlu0 %2174  ;;  %v4314_v32 = vpop.permute.xlu1 %2182 }
 0x1fd   :  { %6251 = vst [vmem:[#allocation100_spill] sm:$0xff] %v4302_v19  ;;  %6252 = vst [vmem:[#allocation101_spill] sm:$0xff] %v4314_v32  ;;  %v2616_v32 = vld [vmem:[%s6005_s8 + $0x8] sm:$0xff] }
 0x200   :  { %v4316_v19 = vpop.permute.xlu0 %2134  ;;  %v4324_v17 = vpop.permute.xlu1 %2673 }
 0x201   :  { %6253 = vst [vmem:[#allocation102_spill] sm:$0xff] %v4316_v19  ;;  %6254 = vst [vmem:[#allocation103_spill] sm:$0xff] %v4324_v17 }
 0x204   :  { %v4326_v21 = vpop.permute.xlu0 %2186  ;;  %v4331_v19 = vpop.permute.xlu1 %2142 }
 0x205   :  { %2379 = vperm.xlu1 %3090, %v3201_v14   ;;  %6255 = vst [vmem:[#allocation104_spill] sm:$0xff] %v4326_v21 }
 0x206   :  { %2339 = vperm.xlu0 %3088, %v3202_v51  }
 0x208   :  { %v4341_v21 = vpop.permute.xlu1 %2146 }
 0x209   :  { %2335 = vperm.xlu1 %3090, %v3203_v48  }
 0x20a   :  { %2387 = vperm.xlu0 %3088, %v3204_v41  }
 0x20d   :  { %2383 = vperm.xlu1 %3090, %v3205_v53  }
 0x20e   :  { %3091 = vset.pattern.permute.xlu0 %v6250_v46 }
 0x20f   :  { %2540 = vperm.xlu0 %3091, %v3206_v23   ;;  %v3209_v23 = vld [vmem:[%s6002_s7 + $0x60] sm:$0xff] }
 0x211   :  { %3092 = vset.pattern.permute.xlu1 %v6250_v46  ;;  %v3210_v46 = vld [vmem:[%s6002_s7 + $0x58] sm:$0xff] }
 0x212   :  { %2520 = vperm.xlu1 %3092, %v3207_v5  }
 0x213   :  { %2552 = vperm.xlu0 %3091, %v3208_v60   ;;  %v3211_v60 = vld [vmem:[%s6002_s7 + $0x8] sm:$0xff] }
 0x216   :  { %2568 = vperm.xlu1 %3092, %v3209_v23   ;;  %v4333_v23 = vpop.permute.xlu0 %2190 }
 0x217   :  { %2564 = vperm.xlu0 %3091, %v3210_v46   ;;  %6256 = vst [vmem:[#allocation105_spill] sm:$0xff] %v4333_v23 }
 0x21a   :  { %2572 = vperm.xlu1 %3092, %v3201_v14   ;;  %v4338_v17 = vpop.permute.xlu0 %2343 }
 0x21b   :  { %2524 = vperm.xlu0 %3091, %v3211_v60   ;;  %6257 = vst [vmem:[#allocation106_spill] sm:$0xff] %v4338_v17  ;;  %v4352_v60 = vpop.permute.xlu1 %2194 }
 0x21c   :  { %6259 = vst [vmem:[#allocation108_spill] sm:$0xff] %v4352_v60 }
 0x21e   :  { %2532 = vperm.xlu1 %3092, %v3202_v51   ;;  %v2617_v51 = vld [vmem:[%s6005_s8 + $0x10] sm:$0xff] }
 0x21f   :  { %2528 = vperm.xlu0 %3091, %v3203_v48   ;;  %v2627_v48 = vld [vmem:[%s6005_s8 + $0x60] sm:$0xff] }
 0x222   :  { %2580 = vperm.xlu1 %3092, %v3204_v41  }
 0x223   :  { %2576 = vperm.xlu0 %3091, %v3205_v53   ;;  %v4347_v53 = vpop.permute.xlu0 %2355 }
 0x224   :  { %6258 = vst [vmem:[#allocation107_spill] sm:$0xff] %v4347_v53 }
 0x226   :  { %3094 = vset.pattern.permute.xlu1 %v6168_v45 }
 0x227   :  { %2638 = vperm.xlu1 %3094, %v2616_v32   ;;  %3093 = vset.pattern.permute.xlu0 %v6168_v45  ;;  %v3212_v32 = vld [vmem:[%s6002_s7 + $0x48] sm:$0xff]  ;;  %v2629_v45 = vld [vmem:[%s6005_s8 + $0x70] sm:$0xff] }
 0x228   :  { %1170 = vperm.xlu0 %3093, %v3207_v5   ;;  %v4360_v5 = vpop.permute.xlu1 %2683 }
 0x229   :  { %6260 = vst [vmem:[#allocation109_spill] sm:$0xff] %v4360_v5  ;;  %v2626_v5 = vld [vmem:[%s6005_s8 + $0x58] sm:$0xff] }
 0x22b   :  { %2693 = vperm.xlu1 %3094, %v2627_v48   ;;  %v4362_v48 = vpop.permute.xlu0 %2363 }
 0x22c   :  { %1215 = vperm.xlu0 %3093, %v3212_v32   ;;  %6261 = vst [vmem:[#allocation110_spill] sm:$0xff] %v4362_v48  ;;  %v4364_v53 = vpop.permute.xlu1 %2327 }
 0x22d   :  { %6262 = vst [vmem:[#allocation111_spill] sm:$0xff] %v4364_v53 }
 0x22f   :  { %2643 = vperm.xlu1 %3094, %v2617_v51   ;;  %v4366_v60 = vpop.permute.xlu0 %2375  ;;  %v2621_v51 = vld [vmem:[%s6005_s8 + $0x30] sm:$0xff] }
 0x230   :  { %1225 = vperm.xlu0 %3093, %v3210_v46   ;;  %6263 = vst [vmem:[#allocation112_spill] sm:$0xff] %v4366_v60  ;;  %v4371_v17 = vpop.permute.xlu1 %2331  ;;  %v2624_v46 = vld [vmem:[%s6005_s8 + $0x48] sm:$0xff] }
 0x231   :  { %6264 = vst [vmem:[#allocation113_spill] sm:$0xff] %v4371_v17  ;;  %v65_v17 = vlaneseq }
 0x233   :  { %2703 = vperm.xlu1 %3094, %v2629_v45   ;;  %v4397_v24 = vshrl.u32 %v65_v17, 7  ;;  %v3098_v17 = vld [vmem:[%s6007_s9 + $0x30] sm:$0xff]  }
 0x234   :  { %1235 = vperm.xlu0 %3093, %v3201_v14  }
 0x235   :  { %vm1280_vm1 = vcmp.lt.s32.totalorder %v4397_v24, 1  ;;  %vm6074_vm3 = vcmp.lt.s32.totalorder %v4397_v24, 2  ;;  %vm1666_vm5 = vcmp.lt.s32.totalorder %v4397_v24, 3  ;;  %vm6094_vm7 = vcmp.lt.s32.totalorder %v4397_v24, 4 }
 0x236   :  { %vm6102_vm9 = vcmp.lt.s32.totalorder %v4397_v24, 6  ;;  %vm2052_vm10 = vcmp.lt.s32.totalorder %v4397_v24, 5 }
 0x238   :  { %1245 = vperm.xlu0 %3093, %v3204_v41  }
 0x23c   :  { %2663 = vperm.xlu0 %3093, %v2621_v51   ;;  %v2615_v51 = vld [vmem:[%s6005_s8] sm:$0xff] }
 0x23d   :  { %v888_v32 = vpop.xlane.xlu0 %887 }
 0x23e   :  { %v4379_v41 = vmul.f32 0.0078125, %v888_v32 }
 0x240   :  { %2678 = vperm.xlu0 %3093, %v2624_v46   ;;  %v998_v46 = vmul.f32 %v4379_v41, %v4379_v41 }
 0x241   :  { %v890_v45 = vpop.xlane.xlu1 %889  ;;  %v884_v14 = vpop.xlane.xlu0 %883 }
 0x242   :  { %v4381_v48 = vmul.f32 0.0078125, %v890_v45  ;;  %v4388_v16 = vmul.f32 0.0078125, %v884_v14 }
 0x244   :  { %2688 = vperm.xlu0 %3093, %v2626_v5   ;;  %v999_v5 = vmul.f32 %v4381_v48, %v4381_v48  ;;  %v996_v14 = vmul.f32 %v4388_v16, %v4388_v16 }
 0x245   :  { %v886_v53 = vpop.xlane.xlu1 %885  ;;  %v953_v60 = vpop.xlane.xlu0 %952 }
 0x246   :  { %v982_v7 = vmul.f32 0.0078125, %v953_v60  ;;  %v4392_v45 = vmul.f32 0.0078125, %v886_v53 }
 0x248   :  { %v1014_v50 = vsub.f32 %v982_v7, %v998_v46  ;;  %2633 = vperm.xlu0 %3093, %v2615_v51   ;;  %v3097_v46 = vld [vmem:[%s6007_s9 + $0x38] sm:$0xff]  }
 0x249   :  { %v955_v32 = vpop.xlane.xlu1 %954  ;;  %v949_v22 = vpop.xlane.xlu0 %948  ;;  %3040 = vmatprep.subr.bf16.mxu1 %v3097_v46  ;;  %3008 = vmatprep.subr.bf16.mxu0 %v3097_v46 }
 0x24a   :  { %v983_v35 = vmul.f32 0.0078125, %v955_v32  ;;  %v1030_v60 = vmax.f32 %v1014_v50, 0.0  ;;  %v980_v7 = vmul.f32 0.0078125, %v949_v22  ;;  %v997_v22 = vmul.f32 %v4392_v45, %v4392_v45  ;;  %3048 = vmatpush3.bf16.msra.mxu1 %v3097_v46  ;;  %3009 = vmatpush3.bf16.msra.mxu0 %v3097_v46 }
 0x24b   :  { %3041 = vmatprep.subr.bf16.mxu1 %v3098_v17  ;;  %3010 = vmatprep.subr.bf16.mxu0 %v3098_v17  ;;  %v79_v46 = vadd.s32 104, %v4397_v24 }
 0x24c   :  { %v1015_v51 = vsub.f32 %v983_v35, %v999_v5  ;;  %v1062_v53 = vadd.f32 1e-05, %v1030_v60  ;;  %v1012_v3 = vsub.f32 %v980_v7, %v996_v14  ;;  %2698 = vperm.xlu0 %3093, %v2628_v26   ;;  %v69_v26 = vadd.s32 24, %v4397_v24 }
 0x24d   :  { %v951_v32 = vpop.xlane.xlu1 %950  ;;  %v896_v5 = vpop.xlane.xlu0 %895  ;;  %v4437_v23 = vand.u32 7, %v79_v46  ;;  %v4449_v46 = vand.u32 7, %v4397_v24 }
 0x24e   :  { %v1031_v50 = vmax.f32 %v1015_v51, 0.0  ;;  %v981_v35 = vmul.f32 0.0078125, %v951_v32  ;;  %3169 = vrsqrt.f32 %v1062_v53  ;;  %v1028_v14 = vmax.f32 %v1012_v3, 0.0  ;;  %3049 = vmatpush3.bf16.msra.mxu1 %v3098_v17  ;;  %3011 = vmatpush3.bf16.msra.mxu0 %v3098_v17 }
 0x24f   :  { %v68_v3 = vadd.s32 16, %v4397_v24  ;;  %v4417_v53 = vmul.f32 0.0078125, %v896_v5  ;;  %6265 = vst [vmem:[#allocation114_spill] sm:$0xff] %v4437_v23  ;;  %6266 = vst [vmem:[#allocation115_spill] sm:$0xff] %v4449_v46  ;;  %v4464_v46 = vld [vmem:[%s6008_s5] ss:$0 sm:$0xff] }
 0x250   :  { %v1063_v60 = vadd.f32 1e-05, %v1031_v50  ;;  %v1013_v7 = vsub.f32 %v981_v35, %v997_v22  ;;  %v1060_v58 = vadd.f32 1e-05, %v1028_v14  ;;  %2648 = vperm.xlu0 %3093, %v2618_v33   ;;  %v71_v50 = vadd.s32 40, %v4397_v24 }
 0x251   :  { %v898_v51 = vpop.xlane.xlu1 %897  ;;  %v892_v18 = vpop.xlane.xlu0 %891  ;;  %v4421_v14 = vand.u32 7, %v69_v26  ;;  %v81_v33 = vadd.s32 120, %v4397_v24  ;;  %v4430_v17 = vand.u32 7, %v68_v3  ;;  %v70_v3 = vadd.s32 32, %v4397_v24 }
 0x252   :  { %3171 = vrsqrt.f32 %v1063_v60  ;;  %v1029_v32 = vmax.f32 %v1013_v7, 0.0  ;;  %v80_v60 = vadd.s32 112, %v4397_v24  ;;  %v4428_v5 = vmul.f32 0.0078125, %v898_v51 }
 0x253   :  { %3173 = vrsqrt.f32 %v1060_v58  ;;  %v3099_v58 = vld [vmem:[%s6007_s9 + $0x28] sm:$0xff]   ;;  %v4435_v26 = vmul.f32 0.0078125, %v892_v18  ;;  %v4439_v29 = vand.u32 7, %v71_v50  ;;  %v78_v51 = vadd.s32 96, %v4397_v24 }
 0x254   :  { %v1061_v22 = vadd.f32 1e-05, %v1029_v32  ;;  %2708 = vperm.xlu0 %3093, %v2630_v38   ;;  %v74_v32 = vadd.s32 64, %v4397_v24  ;;  %v1002_v38 = vmul.f32 %v4417_v53, %v4417_v53  ;;  %3042 = vmatprep.subr.bf16.mxu1 %v3099_v58  ;;  %v4444_v27 = vand.u32 7, %v81_v33 }
 0x255   :  { %v894_v35 = vpop.xlane.xlu1 %893  ;;  %v961_v7 = vpop.xlane.xlu0 %960  ;;  %3012 = vmatprep.subr.bf16.mxu0 %v3099_v58  ;;  %3050 = vmatpush3.bf16.msra.mxu1 %v3099_v58  ;;  %v4446_v18 = vand.u32 7, %v80_v60  ;;  %v1003_v50 = vmul.f32 %v4428_v5, %v4428_v5  ;;  %v1000_v33 = vmul.f32 %v4435_v26, %v4435_v26  ;;  %v4466_v43 = vand.u32 7, %v78_v51 }
 0x256   :  { %3175 = vrsqrt.f32 %v1061_v22  ;;  %v986_v37 = vmul.f32 0.0078125, %v961_v7  ;;  %v77_v22 = vadd.s32 88, %v4397_v24  ;;  %3013 = vmatpush3.bf16.msra.mxu0 %v3099_v58  ;;  %v4453_v7 = vmul.f32 0.0078125, %v894_v35 }
 0x257   :  { %v4455_v23 = vand.u32 7, %v74_v32  ;;  %6268 = vst [vmem:[#allocation117_spill] sm:$0xff] %v4466_v43  ;;  %v4470_v32 = vand.u32 7, %v70_v3  ;;  %vm1300_vm2 = vcmp.ge.s32.totalorder %v4421_v14, 1  ;;  %vm1493_vm4 = vcmp.ge.s32.totalorder %v4421_v14, 2 }
 0x258   :  { %v1018_v11 = vsub.f32 %v986_v37, %v1002_v38  ;;  %v1046_v37 = vsub.f32 %v4095_v25, %v4379_v41  ;;  %v1001_v51 = vmul.f32 %v4453_v7, %v4453_v7  ;;  %vm1686_vm6 = vcmp.ge.s32.totalorder %v4421_v14, 3 }
 0x259   :  { %v963_v9 = vpop.xlane.xlu1 %962  ;;  %v957_v52 = vpop.xlane.xlu0 %956  ;;  %6267 = vst [vmem:[#allocation116_spill] sm:$0xff] %v4455_v23  ;;  %6270 = vst [vmem:[#allocation119_spill] sm:$0xff] %v4470_v32  ;;  %vm1879_vm8 = vcmp.ge.s32.totalorder %v4421_v14, 4  ;;  %vm2072_vm11 = vcmp.ge.s32.totalorder %v4421_v14, 5  ;;  %vm2265_vm12 = vcmp.ge.s32.totalorder %v4421_v14, 6  ;;  %vm1299_vm13 = vcmp.ge.s32.totalorder %v4430_v17, 1 }
 0x25a   :  { %v987_v56 = vmul.f32 0.0078125, %v963_v9  ;;  %v1034_v60 = vmax.f32 %v1018_v11, 0.0  ;;  %v984_v58 = vmul.f32 0.0078125, %v957_v52  ;;  %v4468_v9 = vand.u32 7, %v77_v22 }
 0x25b   :  { %v3170_v38 = vpop.eup %3169  ;;  %v4473_v11 = vadd.s32 8, %v4397_v24  ;;  %v1047_v52 = vsub.f32 %v4112_v40, %v4381_v48  ;;  %vm1492_vm14 = vcmp.ge.s32.totalorder %v4430_v17, 2  ;;  %vm1685_vm15 = vcmp.ge.s32.totalorder %v4430_v17, 3 }
 0x25c   :  { %v1019_v35 = vsub.f32 %v987_v56, %v1003_v50  ;;  %6269 = vst [vmem:[#allocation118_spill] sm:$0xff] %v4468_v9  ;;  %v1094_v23 = vmul.f32 %v3170_v38, %v1046_v37  ;;  %v1066_v41 = vadd.f32 1e-05, %v1034_v60  ;;  %v1016_v25 = vsub.f32 %v984_v58, %v1000_v33  ;;  %v4480_v56 = vld [vmem:[%s6009_s6] ss:$0 sm:$0xff] }
 0x25d   :  { %v959_v61 = vpop.xlane.xlu1 %958  ;;  %v904_v50 = vpop.xlane.xlu0 %903  ;;  %v1044_v33 = vsub.f32 %v4118_v47, %v4388_v16  ;;  %v1045_v38 = vsub.f32 %v4134_v31, %v4392_v45  ;;  %v1050_v45 = vsub.f32 %v4158_v59, %v4417_v53 }
 0x25e   :  { %v1035_v22 = vmax.f32 %v1019_v35, 0.0  ;;  %v985_v3 = vmul.f32 0.0078125, %v959_v61  ;;  %v1116_v60 = vmul.f32 %v4464_v46, %v1094_v23  ;;  %3177 = vrsqrt.f32 %v1066_v41 }
 0x25f   :  { %v3172_v37 = vpop.eup %3171  ;;  %v1032_v48 = vmax.f32 %v1016_v25, 0.0  ;;  %v4496_v41 = vmul.f32 0.0078125, %v904_v50 }
 0x260   :  { %v3174_v58 = vpop.eup %3173  ;;  %v1095_v61 = vmul.f32 %v3172_v37, %v1047_v52  ;;  %v1067_v35 = vadd.f32 1e-05, %v1035_v22  ;;  %v1017_v40 = vsub.f32 %v985_v3, %v1001_v51  ;;  %v4494_v9 = vadd.f32 %v4480_v56, %v1116_v60 }
 0x261   :  { %v1092_v16 = vmul.f32 %v3174_v58, %v1044_v33  ;;  %v1064_v23 = vadd.f32 1e-05, %v1032_v48  ;;  %v906_v25 = vpop.xlane.xlu1 %905  ;;  %v900_v51 = vpop.xlane.xlu0 %899 }
 0x262   :  { %v1117_v47 = vmul.f32 %v4464_v46, %v1095_v61  ;;  %3179 = vrsqrt.f32 %v1067_v35  ;;  %v1033_v52 = vmax.f32 %v1017_v40, 0.0  ;;  %v4503_v37 = vmul.f32 0.0078125, %v906_v25  ;;  %v3100_v40 = vld [vmem:[%s6007_s9 + $0x20] sm:$0xff]  }
 0x263   :  { %v3176_v22 = vpop.eup %3175  ;;  %v1114_v3 = vmul.f32 %v4464_v46, %v1092_v16  ;;  %3181 = vrsqrt.f32 %v1064_v23  ;;  %v4505_v33 = vmul.f32 0.0078125, %v900_v51  ;;  %3043 = vmatprep.subr.bf16.mxu1 %v3100_v40  ;;  %3014 = vmatprep.subr.bf16.mxu0 %v3100_v40 }
 0x264   :  { %v4508_v50 = vadd.f32 %v4480_v56, %v1117_v47  ;;  %v1093_v60 = vmul.f32 %v3176_v22, %v1045_v38  ;;  %v1065_v58 = vadd.f32 1e-05, %v1033_v52  ;;  %v1006_v47 = vmul.f32 %v4496_v41, %v4496_v41  ;;  %3051 = vmatpush3.bf16.msra.mxu1 %v3100_v40  ;;  %3015 = vmatpush3.bf16.msra.mxu0 %v3100_v40 }
 0x265   :  { %v4516_v53 = vadd.f32 %v4480_v56, %v1114_v3  ;;  %v902_v38 = vpop.xlane.xlu1 %901  ;;  %v969_v25 = vpop.xlane.xlu0 %968  ;;  %v1007_v51 = vmul.f32 %v4503_v37, %v4503_v37  ;;  %v1004_v22 = vmul.f32 %v4505_v33, %v4505_v33 }
 0x266   :  { %v1115_v16 = vmul.f32 %v4464_v46, %v1093_v60  ;;  %3183 = vrsqrt.f32 %v1065_v58  ;;  %v990_v3 = vmul.f32 0.0078125, %v969_v25  ;;  %v6040_v60 = vrot.slane %v4508_v50, 7 }
 0x267   :  { %6271 = vst [vmem:[#allocation120_spill] sm:$0xff] %v4516_v53  ;;  %v4538_v23 = vmul.f32 0.0078125, %v902_v38  ;;  %v6044_v61 = vrot.slane %v4508_v50, 6  ;;  %v1251_v59 = vmul.f32 %v3776_v20, %v4508_v50  ;;  %v6272_v25 = vrot.slane %v4494_v9, 7 }
 0x268   :  { %v4536_v58 = vadd.f32 %v4480_v56, %v1115_v16  ;;  %v1022_v48 = vsub.f32 %v990_v3, %v1006_v47  ;;  %v6273_v47 = vrot.slane %v4494_v9, 6  ;;  %v6045_v3 = vrot.slane %v4494_v9, 5 }
 0x269   :  { %v971_v52 = vpop.xlane.xlu1 %970  ;;  %v1293_v40 = vsel %vm1280_vm1, %v6272_v25, %v6040_v60  ;;  %v965_v31 = vpop.xlane.xlu0 %964  ;;  %v3101_v25 = vld [vmem:[%s6007_s9 + $0x18] sm:$0xff]   ;;  %v1005_v32 = vmul.f32 %v4538_v23, %v4538_v23 }
 0x26a   :  { %v991_v38 = vmul.f32 0.0078125, %v971_v52  ;;  %v1348_v35 = vsel %vm1300_vm2, %v1293_v40, 0.0  ;;  %v1486_v20 = vsel %vm6074_vm3, %v6273_v47, %v6044_v61  ;;  %v1038_v60 = vmax.f32 %v1022_v48, 0.0  ;;  %3044 = vmatprep.subr.bf16.mxu1 %v3101_v25  ;;  %3016 = vmatprep.subr.bf16.mxu0 %v3101_v25 }
 0x26b   :  { %v988_v16 = vmul.f32 0.0078125, %v965_v31  ;;  %v1428_v52 = vmul.f32 %v3852_v1, %v1348_v35  ;;  %v1541_v40 = vsel %vm1493_vm4, %v1486_v20, 0.0  ;;  %v3178_v43 = vpop.eup %3177  ;;  %v6274_v47 = vrot.slane %v4508_v50, 5  ;;  %3052 = vmatpush3.bf16.msra.mxu1 %v3101_v25  ;;  %3017 = vmatpush3.bf16.msra.mxu0 %v3101_v25 }
 0x26c   :  { %v1023_v53 = vsub.f32 %v991_v38, %v1007_v51  ;;  %v4576_v31 = vand.u32 7, %v4473_v11  ;;  %v1098_v1 = vmul.f32 %v3178_v43, %v1050_v45  ;;  %v1070_v48 = vadd.f32 1e-05, %v1038_v60  ;;  %v3102_v11 = vld [vmem:[%s6007_s9 + $0x10] sm:$0xff]  }
 0x26d   :  { %v1679_v61 = vsel %vm1666_vm5, %v6045_v3, %v6274_v47  ;;  %v1020_v35 = vsub.f32 %v988_v16, %v1004_v22  ;;  %v967_v20 = vpop.xlane.xlu1 %966  ;;  %v6047_v51 = vrot.slane %v4508_v50, 4  ;;  %v912_v8 = vpop.xlane.xlu0 %911  ;;  %v1621_v47 = vmul.f32 %v3979_v34, %v1541_v40  ;;  %3045 = vmatprep.subr.bf16.mxu1 %v3102_v11  ;;  %3018 = vmatprep.subr.bf16.mxu0 %v3102_v11 }
 0x26e   :  { %6275 = vst [vmem:[#allocation121_spill] sm:$0xff] %v4576_v31  ;;  %v1039_v38 = vmax.f32 %v1023_v53, 0.0  ;;  %v989_v49 = vmul.f32 0.0078125, %v967_v20  ;;  %v6050_v3 = vrot.slane %v4494_v9, 4  ;;  %v1120_v43 = vmul.f32 %v4464_v46, %v1098_v1 }
 0x26f   :  { %v3180_v31 = vpop.eup %3179  ;;  %3185 = vrsqrt.f32 %v1070_v48  ;;  %v1036_v45 = vmax.f32 %v1020_v35, 0.0  ;;  %v1444_v22 = vadd.f32 %v1428_v52, %v1251_v59  ;;  %v6276_v53 = vsub.f32 %v4167_v36, %v4428_v5  ;;  %3053 = vmatpush3.bf16.msra.mxu1 %v3102_v11  ;;  %3019 = vmatpush3.bf16.msra.mxu0 %v3102_v11  ;;  %v3103_v48 = vld [vmem:[%s6007_s9 + $0x8] sm:$0xff]  }
 0x270   :  { %v3182_v60 = vpop.eup %3181  ;;  %v1071_v25 = vadd.f32 1e-05, %v1039_v38  ;;  %v1021_v20 = vsub.f32 %v989_v49, %v1005_v32  ;;  %v1734_v34 = vsel %vm1686_vm6, %v1679_v61, 0.0  ;;  %v4593_v40 = vadd.f32 %v4480_v56, %v1120_v43  ;;  %3046 = vmatprep.subr.bf16.mxu1 %v3103_v48  ;;  %3020 = vmatprep.subr.bf16.mxu0 %v3103_v48 }
 0x271   :  { %v1099_v16 = vmul.f32 %v3180_v31, %v6276_v53  ;;  %v6277_v59 = vsub.f32 %v4171_v4, %v4435_v26  ;;  %v1068_v5 = vadd.f32 1e-05, %v1036_v45  ;;  %v914_v31 = vpop.xlane.xlu1 %913  ;;  %v1872_v49 = vsel %vm6094_vm7, %v6050_v3, %v6047_v51  ;;  %v908_v1 = vpop.xlane.xlu0 %907 }
 0x272   :  { %3187 = vrsqrt.f32 %v1071_v25  ;;  %v1037_v26 = vmax.f32 %v1021_v20, 0.0  ;;  %v4607_v61 = vmul.f32 0.0078125, %v912_v8  ;;  %v4613_v43 = vmul.f32 0.0078125, %v914_v31 }
 0x273   :  { %v1096_v52 = vmul.f32 %v3182_v60, %v6277_v59  ;;  %v1121_v32 = vmul.f32 %v4464_v46, %v1099_v16  ;;  %v3184_v35 = vpop.eup %3183  ;;  %3189 = vrsqrt.f32 %v1068_v5  ;;  %v1637_v45 = vadd.f32 %v1621_v47, %v1444_v22  ;;  %3054 = vmatpush3.bf16.msra.mxu1 %v3103_v48  ;;  %3021 = vmatpush3.bf16.msra.mxu0 %v3103_v48 }
 0x274   :  { %v6278_v60 = vsub.f32 %v4179_v2, %v4453_v7  ;;  %v1069_v53 = vadd.f32 1e-05, %v1037_v26  ;;  %v4621_v16 = vmul.f32 0.0078125, %v908_v1  ;;  %v1055_v25 = vsub.f32 %v4203_v39, %v4503_v37 }
 0x275   :  { %v1118_v38 = vmul.f32 %v4464_v46, %v1096_v52  ;;  %v4616_v11 = vadd.f32 %v4480_v56, %v1121_v32  ;;  %v1052_v20 = vsub.f32 %v4206_v10, %v4505_v33  ;;  %v910_v22 = vpop.xlane.xlu1 %909  ;;  %v1814_v59 = vmul.f32 %v3919_v44, %v1734_v34  ;;  %v977_v31 = vpop.xlane.xlu0 %976  ;;  %v3104_v33 = vld [vmem:[%s6007_s9] sm:$0xff]  }
 0x276   :  { %v1097_v8 = vmul.f32 %v3184_v35, %v6278_v60  ;;  %3191 = vrsqrt.f32 %v1069_v53  ;;  %v1010_v52 = vmul.f32 %v4607_v61, %v4607_v61  ;;  %v4633_v5 = vmul.f32 0.0078125, %v910_v22  ;;  %3047 = vmatprep.subr.bf16.mxu1 %v3104_v33  ;;  %3022 = vmatprep.subr.bf16.mxu0 %v3104_v33 }
 0x277   :  { %v4636_v37 = vadd.f32 %v4480_v56, %v1118_v38  ;;  %v994_v32 = vmul.f32 0.0078125, %v977_v31  ;;  %v1830_v26 = vadd.f32 %v1814_v59, %v1637_v45  ;;  %v1927_v1 = vsel %vm1879_vm8, %v1872_v49, 0.0  ;;  %3055 = vmatpush3.bf16.msra.mxu1 %v3104_v33  ;;  %3023 = vmatpush3.bf16.msra.mxu0 %v3104_v33 }
 0x278   :  { %v1119_v7 = vmul.f32 %v4464_v46, %v1097_v8  ;;  %v1011_v44 = vmul.f32 %v4613_v43, %v4613_v43  ;;  %v1008_v34 = vmul.f32 %v4621_v16, %v4621_v16  ;;  %v2007_v35 = vmul.f32 %v4226_v63, %v1927_v1 }
 0x279   :  { %v6049_v60 = vrot.slane %v4494_v9, 3  ;;  %v1026_v8 = vsub.f32 %v994_v32, %v1010_v52  ;;  %v979_v48 = vpop.xlane.xlu1 %978  ;;  %v6048_v38 = vrot.slane %v4508_v50, 3  ;;  %v6052_v53 = vrot.slane %v4494_v9, 2  ;;  %v973_v31 = vpop.xlane.xlu0 %972 }
 0x27a   :  { %v6051_v45 = vrot.slane %v4508_v50, 2  ;;  %v4650_v49 = vadd.f32 %v4480_v56, %v1119_v7  ;;  %v1009_v22 = vmul.f32 %v4633_v5, %v4633_v5  ;;  %v995_v59 = vmul.f32 0.0078125, %v979_v48 }
 0x27b   :  { %v2023_v51 = vadd.f32 %v2007_v35, %v1830_v26  ;;  %v1042_v63 = vmax.f32 %v1026_v8, 0.0  ;;  %v992_v52 = vmul.f32 0.0078125, %v973_v31  ;;  %v2065_v32 = vsel %vm2052_vm10, %v6049_v60, %v6048_v38 }
 0x27c   :  { %v2258_v7 = vsel %vm6102_vm9, %v6052_v53, %v6051_v45  ;;  %v3186_v26 = vpop.eup %3185  ;;  %v1027_v1 = vsub.f32 %v995_v59, %v1011_v44  ;;  %v2120_v35 = vsel %vm2072_vm11, %v2065_v32, 0.0  ;;  %v6062_v48 = vrot.slane %v4536_v58, 7 }
 0x27d   :  { %v2313_v8 = vsel %vm2265_vm12, %v2258_v7, 0.0  ;;  %v6279_v31 = vsub.f32 %v4197_v28, %v4496_v41  ;;  %v1074_v60 = vadd.f32 1e-05, %v1042_v63  ;;  %v1024_v3 = vsub.f32 %v992_v52, %v1008_v34  ;;  %v975_v47 = vpop.xlane.xlu1 %974 }
 0x27e   :  { %v2200_v45 = vmul.f32 %v4341_v21, %v2120_v35  ;;  %vm1878_vm2 = vcmp.ge.s32.totalorder %v4430_v17, 4  ;;  %v1043_v44 = vmax.f32 %v1027_v1, 0.0  ;;  %v993_v59 = vmul.f32 0.0078125, %v975_v47 }
 0x27f   :  { %v1102_v38 = vmul.f32 %v3186_v26, %v6279_v31  ;;  %v6061_v32 = vrot.slane %v4536_v58, 6  ;;  %vm2071_vm4 = vcmp.ge.s32.totalorder %v4430_v17, 5  ;;  %v3188_v53 = vpop.eup %3187  ;;  %3193 = vrsqrt.f32 %v1074_v60 }
 0x280   :  { %v1040_v34 = vmax.f32 %v1024_v3, 0.0  ;;  %v2216_v63 = vadd.f32 %v2200_v45, %v2023_v51  ;;  %v3190_v52 = vpop.eup %3189  ;;  %v1103_v21 = vmul.f32 %v3188_v53, %v1055_v25  ;;  %v1075_v26 = vadd.f32 1e-05, %v1043_v44 }
 0x281   :  { %v1124_v41 = vmul.f32 %v4464_v46, %v1102_v38  ;;  %v1025_v35 = vsub.f32 %v993_v59, %v1009_v22  ;;  %v6060_v31 = vrot.slane %v4536_v58, 4  ;;  %vm2264_vm6 = vcmp.ge.s32.totalorder %v4430_v17, 6  ;;  %v2340_v25 = vpop.permute.xlu0 %2339 }
 0x282   :  { %v1100_v1 = vmul.f32 %v3190_v52, %v1052_v20  ;;  %v1072_v7 = vadd.f32 1e-05, %v1040_v34  ;;  %v6059_v60 = vrot.slane %v4536_v58, 3  ;;  %v1125_v3 = vmul.f32 %v4464_v46, %v1103_v21  ;;  %v4707_v52 = vpop.permute.xlu1 %2379 }
 0x283   :  { %v4686_v47 = vadd.f32 %v4480_v56, %v1124_v41  ;;  %3195 = vrsqrt.f32 %v1075_v26  ;;  %v1041_v51 = vmax.f32 %v1025_v35, 0.0  ;;  %v6056_v38 = vrot.slane %v4536_v58, 2  ;;  %v3192_v53 = vpop.eup %3191 }
 0x284   :  { %v1122_v45 = vmul.f32 %v4464_v46, %v1100_v1  ;;  %3197 = vrsqrt.f32 %v1072_v7  ;;  %v2393_v22 = vmul.f32 %v2340_v25, %v2313_v8  ;;  %v1250_v44 = vmul.f32 %v3762_v15, %v4494_v9 }
 0x285   :  { %vm1302_vm8 = vcmp.ge.s32.totalorder %v4439_v29, 1  ;;  %v4702_v20 = vadd.f32 %v4480_v56, %v1125_v3  ;;  %v6280_v59 = vsub.f32 %v4213_v54, %v4538_v23  ;;  %v1073_v34 = vadd.f32 1e-05, %v1041_v51 }
 0x286   :  { %v6281_v8 = vrot.slane %v4494_v9, 7  ;;  %v4716_v7 = vadd.f32 %v4480_v56, %v1122_v45  ;;  %v4718_v21 = vadd.f32 %v2393_v22, %v2216_v63  ;;  %v6283_v23 = vrot.slane %v4494_v9, 6 }
 0x287   :  { %v1101_v41 = vmul.f32 %v3192_v53, %v6280_v59  ;;  %3199 = vrsqrt.f32 %v1073_v34  ;;  %vm1495_vm11 = vcmp.ge.s32.totalorder %v4439_v29, 2  ;;  %vm1688_vm12 = vcmp.ge.s32.totalorder %v4439_v29, 3 }
 0x288   :  { %v1294_v15 = vsel %vm1280_vm1, %v6062_v48, %v6281_v8  ;;  %6282 = vst [vmem:[#allocation122_spill] sm:$0xff] %v4718_v21  ;;  %v1487_v35 = vsel %vm6074_vm3, %v6061_v32, %v6283_v23  ;;  %v6284_v25 = vrot.slane %v4494_v9, 5  ;;  %v6285_v53 = vrot.slane %v4536_v58, 5  ;;  %v2388_v32 = vpop.permute.xlu0 %2387 }
 0x289   :  { %v1347_v26 = vsel %vm1299_vm13, %v1294_v15, 0.0  ;;  %v1123_v1 = vmul.f32 %v4464_v46, %v1101_v41  ;;  %v1540_v63 = vsel %vm1492_vm14, %v1487_v35, 0.0  ;;  %v6287_v59 = vrot.slane %v4494_v9, 3 }
 0x28a   :  { %v1427_v3 = vmul.f32 %v3849_v57, %v1347_v26  ;;  %v1620_v51 = vmul.f32 %v3879_v42, %v1540_v63  ;;  %v1680_v45 = vsel %vm1666_vm5, %v6285_v53, %v6284_v25  ;;  %v6286_v57 = vrot.slane %v4494_v9, 4 }
 0x28b   :  { %v2066_v42 = vsel %vm2052_vm10, %v6059_v60, %v6287_v59  ;;  %v4754_v33 = vadd.f32 %v4480_v56, %v1123_v1  ;;  %v1733_v34 = vsel %vm1685_vm15, %v1680_v45, 0.0  ;;  %v1058_v15 = vsub.f32 %v4233_v0, %v4607_v61  ;;  %v2336_v1 = vpop.permute.xlu1 %2335 }
 0x28c   :  { %v1873_v22 = vsel %vm6094_vm7, %v6060_v31, %v6286_v57  ;;  %v1443_v41 = vadd.f32 %v1427_v3, %v1250_v44  ;;  %v1059_v26 = vsub.f32 %v4237_v30, %v4613_v43  ;;  %v2119_v23 = vsel %vm2071_vm4, %v2066_v42, 0.0 }
 0x28d   :  { %v1926_v8 = vsel %vm1878_vm2, %v1873_v22, 0.0  ;;  %v6288_v35 = vrot.slane %v4494_v9, 2  ;;  %v1813_v63 = vmul.f32 %v3914_v62, %v1733_v34  ;;  %v2199_v61 = vmul.f32 %v4331_v19, %v2119_v23  ;;  %v3194_v22 = vpop.eup %3193 }
 0x28e   :  { %v1636_v3 = vadd.f32 %v1620_v51, %v1443_v41  ;;  %v2006_v25 = vmul.f32 %v3966_v13, %v1926_v8  ;;  %vm1881_vm13 = vcmp.ge.s32.totalorder %v4439_v29, 4  ;;  %v6067_v53 = vrot.slane %v4636_v37, 7 }
 0x28f   :  { %v2259_v44 = vsel %vm6102_vm9, %v6056_v38, %v6288_v35  ;;  %v6054_v45 = vrot.slane %v4650_v49, 7  ;;  %v6066_v57 = vrot.slane %v4636_v37, 6  ;;  %v6053_v51 = vrot.slane %v4650_v49, 6 }
 0x290   :  { %v2312_v43 = vsel %vm2264_vm6, %v2259_v44, 0.0  ;;  %v1829_v59 = vadd.f32 %v1813_v63, %v1636_v3  ;;  %v6065_v62 = vrot.slane %v4636_v37, 5  ;;  %v6055_v13 = vrot.slane %v4650_v49, 5  ;;  %v3196_v44 = vpop.eup %3195 }
 0x291   :  { %v1106_v19 = vmul.f32 %v3194_v22, %v1058_v15  ;;  %v2392_v42 = vmul.f32 %v2336_v1, %v2312_v43  ;;  %v1291_v41 = vsel %vm1280_vm1, %v6067_v53, %v6054_v45  ;;  %v6058_v34 = vrot.slane %v4650_v49, 4  ;;  %v3198_v43 = vpop.eup %3197 }
 0x292   :  { %v2022_v8 = vadd.f32 %v2006_v25, %v1829_v59  ;;  %vm2277_vm14 = vcmp.ge.s32.totalorder %v4444_v27, 6  ;;  %v1350_v23 = vsel %vm1302_vm8, %v1291_v41, 0.0  ;;  %v1484_v15 = vsel %vm6074_vm3, %v6066_v57, %v6053_v51 }
 0x293   :  { %v1677_v35 = vsel %vm1666_vm5, %v6065_v62, %v6055_v13  ;;  %v1056_v1 = vsub.f32 %v4240_v12, %v4621_v16  ;;  %v1128_v3 = vmul.f32 %v4464_v46, %v1106_v19  ;;  %v6068_v63 = vrot.slane %v4636_v37, 2 }
 0x294   :  { %v72_v25 = vadd.s32 48, %v4397_v24  ;;  %v1107_v22 = vmul.f32 %v3196_v44, %v1059_v26  ;;  %v2215_v59 = vadd.f32 %v2199_v61, %v2022_v8  ;;  %v1430_v41 = vmul.f32 %v3855_v55, %v1350_v23  ;;  %v3200_v8 = vpop.eup %3199 }
 0x295   :  { %v6063_v51 = vrot.slane %v4636_v37, 4  ;;  %v4814_v45 = vadd.f32 %v4480_v56, %v1128_v3  ;;  %v1104_v13 = vmul.f32 %v3198_v43, %v1056_v1  ;;  %v1543_v16 = vsel %vm1495_vm11, %v1484_v15, 0.0  ;;  %v6290_v15 = vld [vmem:[#allocation10_spill] sm:$0xff] }
 0x296   :  { %v1736_v19 = vsel %vm1688_vm12, %v1677_v35, 0.0  ;;  %v1057_v38 = vsub.f32 %v4249_v6, %v4633_v5  ;;  %v1129_v26 = vmul.f32 %v4464_v46, %v1107_v22  ;;  %v4823_v61 = vadd.f32 %v2392_v42, %v2215_v59  ;;  %v6292_v22 = vld [vmem:[#allocation25_spill] sm:$0xff] }
 0x297   :  { %vm1311_vm15 = vcmp.ge.s32.totalorder %v4446_v18, 1  ;;  %vm1504_vm2 = vcmp.ge.s32.totalorder %v4446_v18, 2  ;;  %v1870_v55 = vsel %vm6094_vm7, %v6063_v51, %v6058_v34  ;;  %v1126_v23 = vmul.f32 %v4464_v46, %v1104_v13  ;;  %v6291_v13 = vld [vmem:[#allocation43_spill] sm:$0xff] }
 0x298   :  { %v6289_v5 = vrot.slane %v4508_v50, 2  ;;  %v1253_v35 = vmul.f32 %v6290_v15, %v4650_v49  ;;  %vm2074_vm4 = vcmp.ge.s32.totalorder %v4439_v29, 5  ;;  %v4845_v44 = vand.u32 7, %v72_v25 }
 0x299   :  { %v4848_v1 = vadd.f32 %v4480_v56, %v1129_v26  ;;  %v1105_v3 = vmul.f32 %v3200_v8, %v1057_v38  ;;  %vm1697_vm6 = vcmp.ge.s32.totalorder %v4446_v18, 3  ;;  %v1623_v43 = vmul.f32 %v6291_v13, %v1543_v16  ;;  %v6294_v13 = vld [vmem:[#allocation114_spill] sm:$0xff] }
 0x29a   :  { %v4840_v42 = vsel %vm6102_vm9, %v6289_v5, %v6068_v63  ;;  %v1816_v59 = vmul.f32 %v6292_v22, %v1736_v19  ;;  %v4854_v5 = vadd.f32 %v4480_v56, %v1126_v23  ;;  %vm1890_vm8 = vcmp.ge.s32.totalorder %v4446_v18, 4  ;;  %v6293_v19 = vld [vmem:[#allocation6_spill] sm:$0xff] }
 0x29b   :  { %vm2276_vm11 = vcmp.ge.s32.totalorder %v4446_v18, 6  ;;  %v1446_v15 = vadd.f32 %v1430_v41, %v1253_v35  ;;  %v1929_v25 = vsel %vm1881_vm13, %v1870_v55, 0.0  ;;  %v6076_v26 = vrot.slane %v4636_v37, 3 }
 0x29c   :  { %v1127_v38 = vmul.f32 %v4464_v46, %v1105_v3  ;;  %v2243_v8 = vrot.slane %v4814_v45, 2  ;;  %v6064_v16 = vrot.slane %v4848_v1, 2  ;;  %vm2083_vm12 = vcmp.ge.s32.totalorder %v4446_v18, 5 }
 0x29d   :  { %v1262_v23 = vmul.f32 %v6293_v19, %v4814_v45  ;;  %vm2275_vm0 = vcmp.ge.s32.totalorder %v6294_v13, 6  ;;  %v6071_v41 = vrot.slane %v4814_v45, 7  ;;  %v6072_v35 = vrot.slane %v4814_v45, 6 }
 0x29e   :  { %v6081_v55 = vrot.slane %v4814_v45, 5  ;;  %v6069_v22 = vrot.slane %v4650_v49, 3  ;;  %v4873_v46 = vadd.f32 %v4480_v56, %v1127_v38  ;;  %v2246_v3 = vsel %vm6102_vm9, %v2243_v8, %v6064_v16 }
 0x29f   :  { %v6077_v19 = vrot.slane %v4814_v45, 4  ;;  %v6079_v34 = vrot.slane %v4814_v45, 3  ;;  %v6070_v60 = vrot.slane %v4854_v5, 2  ;;  %v2325_v31 = vsel %vm2277_vm14, %v2246_v3, 0.0 }
 0x2a0   :  { %v1639_v48 = vadd.f32 %v1623_v43, %v1446_v15  ;;  %v2242_v38 = vrot.slane %v4873_v46, 2  ;;  %v4887_v51 = vmul.f32 %v2388_v32, %v2325_v31  ;;  %v6075_v16 = vrot.slane %v4873_v46, 7 }
 0x2a1   :  { %v6073_v62 = vrot.slane %v4873_v46, 6  ;;  %v6082_v57 = vrot.slane %v4873_v46, 5  ;;  %v6078_v53 = vrot.slane %v4873_v46, 4  ;;  %v6080_v63 = vrot.slane %v4873_v46, 3 }
 0x2a2   :  { %6295 = vst [vmem:[#allocation10_spill] sm:$0xff] %v4887_v51  ;;  %v2063_v43 = vsel %vm2052_vm10, %v6076_v26, %v6069_v22  ;;  %v2248_v32 = vsel %vm6102_vm9, %v6070_v60, %v2242_v38  ;;  %v1282_v31 = vsel %vm1280_vm1, %v6075_v16, %v6071_v41  ;;  %v2247_v3 = vsel %vm6102_vm9, %v2242_v38, %v2243_v8  ;;  %v6296_v22 = vld [vmem:[#allocation116_spill] sm:$0xff]  ;;  %v6297_v8 = vld [vmem:[#allocation38_spill] sm:$0xff] }
 0x2a3   :  { %v1475_v15 = vsel %vm6074_vm3, %v6073_v62, %v6072_v35  ;;  %vm2438_vm14 = vcmp.lt.s32.totalorder %v4397_v24, 7  ;;  %vm1305_vm13 = vcmp.ge.s32.totalorder %v6296_v22, 1  ;;  %v1359_v60 = vsel %vm1311_vm15, %v1282_v31, 0.0  ;;  %v6298_v16 = vld [vmem:[#allocation84_spill] sm:$0xff] }
 0x2a4   :  { %v1552_v41 = vsel %vm1504_vm2, %v1475_v15, 0.0  ;;  %v1668_v35 = vsel %vm1666_vm5, %v6082_v57, %v6081_v55  ;;  %v1832_v62 = vadd.f32 %v1816_v59, %v1639_v48  ;;  %vm1498_vm3 = vcmp.ge.s32.totalorder %v6296_v22, 2  ;;  %v6302_v55 = vld [vmem:[#allocation95_spill] sm:$0xff] }
 0x2a5   :  { %v1439_v38 = vmul.f32 %v6297_v8, %v1359_v60  ;;  %v2009_v26 = vmul.f32 %v6298_v16, %v1929_v25  ;;  %v2122_v31 = vsel %vm2074_vm4, %v2063_v43, 0.0  ;;  %v1745_v15 = vsel %vm1697_vm6, %v1668_v35, 0.0  ;;  %v6301_v43 = vld [vmem:[#allocation23_spill] sm:$0xff] }
 0x2a6   :  { %v1861_v48 = vsel %vm6094_vm7, %v6078_v53, %v6077_v19  ;;  %v2054_v60 = vsel %vm2052_vm10, %v6080_v63, %v6079_v34  ;;  %v6299_v59 = vrot.slane %v4650_v49, 2  ;;  %v6300_v25 = vrot.slane %v4636_v37, 2 }
 0x2a7   :  { %vm1691_vm15 = vcmp.ge.s32.totalorder %v6296_v22, 3  ;;  %v1455_v35 = vadd.f32 %v1439_v38, %v1262_v23  ;;  %v1632_v8 = vmul.f32 %v6301_v43, %v1552_v41  ;;  %v1938_v19 = vsel %vm1890_vm8, %v1861_v48, 0.0  ;;  %v2384_v41 = vpop.permute.xlu1 %2383  ;;  %v6303_v48 = vld [vmem:[#allocation74_spill] sm:$0xff] }
 0x2a8   :  { %v2256_v16 = vsel %vm6102_vm9, %v6300_v25, %v6299_v59  ;;  %v2324_v53 = vsel %vm2276_vm11, %v2247_v3, 0.0  ;;  %v2131_v34 = vsel %vm2083_vm12, %v2054_v60, 0.0  ;;  %v2025_v63 = vadd.f32 %v2009_v26, %v1832_v62  ;;  %v4972_v25 = vpop.permute.xlu0 %2540  ;;  %v6304_v62 = vld [vmem:[#allocation96_spill] sm:$0xff] }
 0x2a9   :  { %v2202_v57 = vmul.f32 %v6302_v55, %v2122_v31  ;;  %vm1884_vm2 = vcmp.ge.s32.totalorder %v6296_v22, 4  ;;  %v4969_v23 = vsel %vm2275_vm0, %v2248_v32, 0.0  ;;  %v1648_v38 = vadd.f32 %v1632_v8, %v1455_v35  ;;  %v6306_v32 = vld [vmem:[#allocation120_spill] sm:$0xff]  ;;  %v6307_v35 = vld [vmem:[#allocation105_spill] sm:$0xff] }
 0x2aa   :  { %v1825_v59 = vmul.f32 %v6303_v48, %v1745_v15  ;;  %v6085_v3 = vrot.slane %v4848_v1, 1  ;;  %vm2077_vm4 = vcmp.ge.s32.totalorder %v6296_v22, 5  ;;  %v2018_v26 = vmul.f32 %v6304_v62, %v1938_v19 }
 0x2ab   :  { %v2404_v55 = vmul.f32 %v2384_v41, %v2324_v53  ;;  %vm6305_vm6 = vcmp.ge.s32.totalorder %v4439_v29, 6  ;;  %vm2460_vm8 = vcmp.ge.s32.totalorder %v4439_v29, 7  ;;  %v6086_v60 = vrot.slane %v6306_v32, 1  ;;  %v6308_v41 = vld [vmem:[#allocation48_spill] sm:$0xff] }
 0x2ac   :  { %v2315_v31 = vsel %vm6305_vm6, %v2256_v16, 0.0  ;;  %v1841_v43 = vadd.f32 %v1825_v59, %v1648_v38  ;;  %v2211_v8 = vmul.f32 %v6307_v35, %v2131_v34  ;;  %v6083_v15 = vrot.slane %v4616_v11, 7  ;;  %v6309_v59 = vld [vmem:[#allocation3_spill] sm:$0xff] }
 0x2ad   :  { %v6084_v48 = vrot.slane %v4716_v7, 7  ;;  %vm2270_vm0 = vcmp.ge.s32.totalorder %v6296_v22, 6  ;;  %v2218_v56 = vadd.f32 %v2202_v57, %v2025_v63  ;;  %v4991_v53 = vsel %vm2438_vm14, %v6085_v3, %v6086_v60  ;;  %v2553_v3 = vpop.permute.xlu0 %2552  ;;  %v6313_v60 = vld [vmem:[#allocation119_spill] sm:$0xff] }
 0x2ae   :  { %v6087_v19 = vrot.slane %v4616_v11, 6  ;;  %v6088_v16 = vrot.slane %v4716_v7, 6  ;;  %v2034_v34 = vadd.f32 %v2018_v26, %v1841_v43  ;;  %v2395_v38 = vmul.f32 %v6308_v41, %v2315_v31  ;;  %v6311_v41 = vld [vmem:[#allocation115_spill] sm:$0xff] }
 0x2af   :  { %v1256_v62 = vmul.f32 %v6309_v59, %v4716_v7  ;;  %v1288_v57 = vsel %vm1280_vm1, %v6083_v15, %v6084_v48  ;;  %vm6310_vm11 = vcmp.lt.s32.totalorder %v4397_v24, 2  ;;  %v6090_v31 = vrot.slane %v4616_v11, 5  ;;  %v6312_v59 = vld [vmem:[#allocation32_spill] sm:$0xff] }
 0x2b0   :  { %v1353_v63 = vsel %vm1305_vm13, %v1288_v57, 0.0  ;;  %v1481_v26 = vsel %vm6310_vm11, %v6087_v19, %v6088_v16  ;;  %v6091_v43 = vrot.slane %v4716_v7, 5  ;;  %vm2463_vm12 = vcmp.ge.s32.totalorder %v6296_v22, 7  ;;  %v6314_v19 = vld [vmem:[#allocation20_spill] sm:$0xff] }
 0x2b1   :  { %v2227_v35 = vadd.f32 %v2211_v8, %v2034_v34  ;;  %vm2455_vm6 = vcmp.ge.s32.totalorder %v6311_v41, 7  ;;  %v1433_v15 = vmul.f32 %v6312_v59, %v1353_v63  ;;  %v1546_v57 = vsel %vm1498_vm3, %v1481_v26, 0.0  ;;  %v6315_v59 = vld [vmem:[#allocation117_spill] sm:$0xff]  ;;  %v6319_v63 = vld [vmem:[#allocation66_spill] sm:$0xff]  ;;  %v2565_v12 = vpop.permute.xlu0 %2564 }
 0x2b2   :  { %vm1301_vm13 = vcmp.ge.s32.totalorder %v6313_v60, 1  ;;  %v1626_v16 = vmul.f32 %v6314_v19, %v1546_v57  ;;  %v1674_v8 = vsel %vm1666_vm5, %v6090_v31, %v6091_v43  ;;  %v6095_v34 = vrot.slane %v4716_v7, 4 }
 0x2b3   :  { %vm2467_vm3 = vcmp.ge.s32.totalorder %v6315_v59, 7  ;;  %v5031_v26 = vadd.f32 %v2404_v55, %v2227_v35  ;;  %v1449_v48 = vadd.f32 %v1433_v15, %v1256_v62  ;;  %v1739_v30 = vsel %vm1691_vm15, %v1674_v8, 0.0 }
 0x2b4   :  { %vm1494_vm11 = vcmp.ge.s32.totalorder %v6313_v60, 2  ;;  %v6316_v57 = vrot.slane %v4650_v49, 1  ;;  %v6317_v31 = vrot.slane %v4636_v37, 1  ;;  %v6318_v55 = vrot.slane %v4616_v11, 4 }
 0x2b5   :  { %v6097_v62 = vrot.slane %v4616_v11, 2  ;;  %v6098_v35 = vrot.slane %v4716_v7, 2  ;;  %vm1687_vm15 = vcmp.ge.s32.totalorder %v6313_v60, 3  ;;  %v1642_v8 = vadd.f32 %v1626_v16, %v1449_v48 }
 0x2b6   :  { %v2449_v43 = vsel %vm2438_vm14, %v6317_v31, %v6316_v57  ;;  %v1867_v15 = vsel %vm6094_vm7, %v6318_v55, %v6095_v34  ;;  %v1819_v19 = vmul.f32 %v6319_v63, %v1739_v30  ;;  %v6320_v31 = vrot.slane %v4716_v7, 3  ;;  %v6322_v63 = vld [vmem:[#allocation118_spill] sm:$0xff] }
 0x2b7   :  { %v1932_v0 = vsel %vm1884_vm2, %v1867_v15, 0.0  ;;  %v6321_v57 = vrot.slane %v4616_v11, 3  ;;  %vm1880_vm7 = vcmp.ge.s32.totalorder %v6313_v60, 4  ;;  %v2253_v30 = vsel %vm6102_vm9, %v6097_v62, %v6098_v35 }
 0x2b8   :  { %v6100_v48 = vrot.slane %v4616_v11, 1  ;;  %v6101_v16 = vrot.slane %v4716_v7, 1  ;;  %vm2466_vm2 = vcmp.ge.s32.totalorder %v6322_v63, 7  ;;  %v2508_v15 = vsel %vm2460_vm8, %v2449_v43, 0.0 }
 0x2b9   :  { %v2060_v6 = vsel %vm2052_vm10, %v6321_v57, %v6320_v31  ;;  %v1835_v31 = vadd.f32 %v1819_v19, %v1642_v8  ;;  %v6323_v57 = vld [vmem:[#allocation90_spill] sm:$0xff]  ;;  %v2318_v62 = vsel %vm2270_vm0, %v2253_v30, 0.0  ;;  %v2434_v29 = vrot.slane %v4854_v5, 1  ;;  %v2521_v19 = vpop.permute.xlu1 %2520 }
 0x2ba   :  { %v2125_v55 = vsel %vm2077_vm4, %v2060_v6, 0.0  ;;  %v2012_v34 = vmul.f32 %v6323_v57, %v1932_v0  ;;  %v2433_v6 = vrot.slane %v4702_v20, 1  ;;  %vm2073_vm4 = vcmp.ge.s32.totalorder %v6313_v60, 5  ;;  %v6324_v57 = vld [vmem:[#allocation67_spill] sm:$0xff] }
 0x2bb   :  { %v2446_v35 = vsel %vm2438_vm14, %v6100_v48, %v6101_v16  ;;  %v6103_v43 = vrot.slane %v4686_v47, 1  ;;  %vm2468_vm8 = vcmp.ge.s32.totalorder %v6294_v13, 7  ;;  %v2411_v0 = vadd.f32 %v2395_v38, %v2218_v56 }
 0x2bc   :  { %v2028_v8 = vadd.f32 %v2012_v34, %v1835_v31  ;;  %v2205_v51 = vmul.f32 %v6324_v57, %v2125_v55  ;;  %v6104_v30 = vrot.slane %v4873_v46, 1  ;;  %vm2266_vm0 = vcmp.ge.s32.totalorder %v6313_v60, 6  ;;  %v6327_v31 = vld [vmem:[#allocation80_spill] sm:$0xff] }
 0x2bd   :  { %v2588_v28 = vmul.f32 %v4972_v25, %v2508_v15  ;;  %v2442_v48 = vsel %vm2438_vm14, %v2433_v6, %v2434_v29  ;;  %v2443_v16 = vsel %vm2438_vm14, %v6103_v43, %v2433_v6  ;;  %v6325_v56 = vrot.slane %v4636_v37, 7  ;;  %v2569_v39 = vpop.permute.xlu1 %2568 }
 0x2be   :  { %v6326_v38 = vrot.slane %v4508_v50, 7  ;;  %v2221_v55 = vadd.f32 %v2205_v51, %v2028_v8  ;;  %v2398_v57 = vmul.f32 %v6327_v31, %v2318_v62  ;;  %v2511_v25 = vsel %vm2463_vm12, %v2446_v35, 0.0  ;;  %v6329_v8 = vld [vmem:[#allocation28_spill] sm:$0xff] }
 0x2bf   :  { %v2441_v15 = vsel %vm2438_vm14, %v2434_v29, %v6104_v30  ;;  %vm2459_vm9 = vcmp.ge.s32.totalorder %v6313_v60, 7  ;;  %v2503_v6 = vsel %vm2455_vm6, %v4991_v53, 0.0  ;;  %v2591_v43 = vmul.f32 %v2553_v3, %v2511_v25  ;;  %v6333_v3 = vld [vmem:[#allocation121_spill] sm:$0xff]  ;;  %v2525_v25 = vpop.permute.xlu0 %2524  ;;  %v6352_v60 = vld [vmem:[#allocation8_spill] sm:$0xff] }
 0x2c0   :  { %v1292_v34 = vsel %vm1280_vm1, %v6326_v38, %v6325_v56  ;;  %v6328_v56 = vld [vmem:[#allocation9_spill] sm:$0xff]  ;;  %v2414_v22 = vadd.f32 %v2398_v57, %v2221_v55  ;;  %v2515_v35 = vsel %vm2467_vm3, %v2442_v48, 0.0  ;;  %v6330_v29 = vrot.slane %v4636_v37, 6 }
 0x2c1   :  { %v1252_v51 = vmul.f32 %v6328_v56, %v4636_v37  ;;  %v1349_v62 = vsel %vm1301_vm13, %v1292_v34, 0.0  ;;  %v6331_v31 = vrot.slane %v4508_v50, 6  ;;  %vm6332_vm12 = vcmp.lt.s32.totalorder %v4397_v24, 2 }
 0x2c2   :  { %v1429_v38 = vmul.f32 %v6329_v8, %v1349_v62  ;;  %vm2456_vm6 = vcmp.ge.s32.totalorder %v6333_v3, 7  ;;  %v6334_v34 = vrot.slane %v4636_v37, 5  ;;  %v6335_v55 = vrot.slane %v4508_v50, 5 }
 0x2c3   :  { %v1485_v53 = vsel %vm6332_vm12, %v6331_v31, %v6330_v29  ;;  %v6336_v57 = vrot.slane %v4636_v37, 4  ;;  %v6337_v62 = vrot.slane %v4508_v50, 4  ;;  %vm6338_vm13 = vcmp.lt.s32.totalorder %v4397_v24, 4 }
 0x2c4   :  { %v1542_v56 = vsel %vm1494_vm11, %v1485_v53, 0.0  ;;  %v1678_v48 = vsel %vm1666_vm5, %v6335_v55, %v6334_v34  ;;  %v6339_v29 = vrot.slane %v4636_v37, 3  ;;  %v6340_v31 = vrot.slane %v4508_v50, 3  ;;  %v6341_v34 = vld [vmem:[#allocation5_spill] sm:$0xff] }
 0x2c5   :  { %v1871_v8 = vsel %vm6338_vm13, %v6337_v62, %v6336_v57  ;;  %vm1298_vm3 = vcmp.ge.s32.totalorder %v6333_v3, 1  ;;  %v2607_v30 = vadd.f32 %v2591_v43, %v2414_v22  ;;  %v1445_v21 = vadd.f32 %v1429_v38, %v1252_v51  ;;  %v6342_v38 = vld [vmem:[#allocation60_spill] sm:$0xff] }
 0x2c6   :  { %v2064_v53 = vsel %vm2052_vm10, %v6340_v31, %v6339_v29  ;;  %v1622_v55 = vmul.f32 %v6341_v34, %v1542_v56  ;;  %v1735_v36 = vsel %vm1687_vm15, %v1678_v48, 0.0  ;;  %vm2458_vm11 = vcmp.ge.s32.totalorder %v4421_v14, 7  ;;  %v5198_v31 = vpop.permute.xlu1 %2572  ;;  %v6347_v34 = vld [vmem:[#allocation42_spill] sm:$0xff] }
 0x2c7   :  { %v5157_v57 = vmul.f32 %v4707_v52, %v4969_v23  ;;  %v2604_v62 = vadd.f32 %v2588_v28, %v2411_v0  ;;  %v5159_v10 = vmul.f32 %v2521_v19, %v2503_v6  ;;  %v1928_v29 = vsel %vm1880_vm7, %v1871_v8, 0.0  ;;  %v5182_v0 = vpop.permute.xlu0 %2528 }
 0x2c8   :  { %v5163_v43 = vmul.f32 %v2569_v39, %v2515_v35  ;;  %v2514_v51 = vsel %vm2466_vm2, %v2443_v16, 0.0  ;;  %v1638_v22 = vadd.f32 %v1622_v55, %v1445_v21  ;;  %v1815_v56 = vmul.f32 %v6342_v38, %v1735_v36  ;;  %v6343_v16 = vld [vmem:[#allocation39_spill] sm:$0xff] }
 0x2c9   :  { %v5168_v48 = vmul.f32 %v2565_v12, %v2514_v51  ;;  %v2121_v52 = vsel %vm2073_vm4, %v2064_v53, 0.0  ;;  %v2425_v28 = vrot.slane %v4508_v50, 1  ;;  %v2423_v23 = vrot.slane %v4536_v58, 1 }
 0x2ca   :  { %vm1491_vm15 = vcmp.ge.s32.totalorder %v6333_v3, 2  ;;  %vm1684_vm7 = vcmp.ge.s32.totalorder %v6333_v3, 3  ;;  %v5178_v39 = vsel %vm2468_vm8, %v2441_v15, 0.0  ;;  %v1831_v21 = vadd.f32 %v1815_v56, %v1638_v22  ;;  %v6345_v15 = vld [vmem:[#allocation72_spill] sm:$0xff] }
 0x2cb   :  { %v2008_v36 = vmul.f32 %v6343_v16, %v1928_v29  ;;  %v2424_v12 = vrot.slane %v4494_v9, 1  ;;  %vm1877_vm2 = vcmp.ge.s32.totalorder %v6333_v3, 4  ;;  %v2314_v50 = vsel %vm2266_vm0, %v4840_v42, 0.0 }
 0x2cc   :  { %v6344_v19 = vrot.slane %v4636_v37, 1  ;;  %v2716_v35 = vadd.f32 %v6345_v15, %v2604_v62  ;;  %v6346_v8 = vrot.slane %v6306_v32, 1  ;;  %vm2070_vm4 = vcmp.ge.s32.totalorder %v6333_v3, 5  ;;  %v6348_v62 = vld [vmem:[#allocation103_spill] sm:$0xff] }
 0x2cd   :  { %v2024_v53 = vadd.f32 %v2008_v36, %v1831_v21  ;;  %v2201_v55 = vmul.f32 %v6347_v34, %v2121_v52  ;;  %v2451_v37 = vsel %vm2438_vm14, %v2424_v12, %v2425_v28  ;;  %v2436_v42 = vrot.slane %v4814_v45, 1  ;;  %v6349_v52 = vld [vmem:[#allocation106_spill] sm:$0xff] }
 0x2ce   :  { %v2450_v6 = vsel %vm2438_vm14, %v2425_v28, %v6344_v19  ;;  %v2453_v9 = vsel %vm2438_vm14, %v6346_v8, %v2423_v23  ;;  %vm2263_vm8 = vcmp.ge.s32.totalorder %v6333_v3, 6  ;;  %v5206_v29 = vadd.f32 %v6348_v62, %v2607_v30  ;;  %v6355_v8 = vld [vmem:[#allocation52_spill] sm:$0xff] }
 0x2cf   :  { %v2507_v51 = vsel %vm2459_vm9, %v2450_v6, 0.0  ;;  %v5212_v22 = vsel %vm2438_vm14, %v2423_v23, %v2424_v12  ;;  %v1264_v38 = vrot.slane %v6306_v32, 7  ;;  %vm1297_vm0 = vcmp.ge.s32.totalorder %v6311_v41, 1  ;;  %v6370_v3 = vld [vmem:[#allocation4_spill] sm:$0xff] }
 0x2d0   :  { %v2217_v56 = vadd.f32 %v2201_v55, %v2024_v53  ;;  %v2394_v28 = vmul.f32 %v6349_v52, %v2314_v50  ;;  %v6350_v21 = vrot.slane %v4848_v1, 1  ;;  %v1249_v16 = vmul.f32 %v6352_v60, %v4536_v58  ;;  %v6356_v55 = vld [vmem:[#allocation26_spill] sm:$0xff] }
 0x2d1   :  { %v2732_v36 = vmul.f32 %v2716_v35, %v4179_v2  ;;  %v2504_v23 = vsel %vm2456_vm6, %v2453_v9, 0.0  ;;  %v6353_v12 = vrot.slane %v4873_v46, 1  ;;  %v6354_v50 = vrot.slane %v4536_v58, 7  ;;  %v5241_v2 = vpop.permute.xlu0 %2576 }
 0x2d2   :  { %v5221_v30 = vsel %vm2438_vm14, %v2436_v42, %v6350_v21  ;;  %v2410_v15 = vadd.f32 %v2394_v28, %v2217_v56  ;;  %v2587_v53 = vmul.f32 %v6355_v8, %v2507_v51  ;;  %v5239_v34 = vmul.f32 %v2525_v25, %v2504_v23  ;;  %v2533_v51 = vpop.permute.xlu1 %2532 }
 0x2d3   :  { %6351 = vst [vmem:[#allocation43_spill] sm:$0xff] %v5221_v30  ;;  %v5232_v19 = vsel %vm2438_vm14, %v6353_v12, %v2436_v42  ;;  %v1295_v6 = vsel %vm1280_vm1, %v1264_v38, %v6354_v50  ;;  %vm1490_vm9 = vcmp.ge.s32.totalorder %v6311_v41, 2  ;;  %v2506_v9 = vsel %vm2458_vm11, %v2451_v37, 0.0 }
 0x2d4   :  { %v1346_v35 = vsel %vm1298_vm3, %v1295_v6, 0.0  ;;  %v1457_v62 = vrot.slane %v6306_v32, 6  ;;  %v1650_v56 = vrot.slane %v6306_v32, 5  ;;  %vm1683_vm12 = vcmp.ge.s32.totalorder %v6311_v41, 3  ;;  %v6360_v6 = vld [vmem:[#allocation70_spill] sm:$0xff] }
 0x2d5   :  { %v1426_v42 = vmul.f32 %v6356_v55, %v1346_v35  ;;  %v2603_v25 = vadd.f32 %v2587_v53, %v2410_v15  ;;  %v6110_v52 = vrot.slane %v6306_v32, 4  ;;  %v6108_v28 = vrot.slane %v6306_v32, 3 }
 0x2d6   :  { %v6109_v21 = vrot.slane %v6306_v32, 2  ;;  %v6357_v14 = vrot.slane %v4536_v58, 6  ;;  %vm6358_vm6 = vcmp.lt.s32.totalorder %v4397_v24, 2  ;;  %v6359_v23 = vrot.slane %v4536_v58, 5 }
 0x2d7   :  { %v1442_v60 = vadd.f32 %v1426_v42, %v1249_v16  ;;  %v2715_v15 = vadd.f32 %v6360_v6, %v2603_v25  ;;  %v6361_v53 = vrot.slane %v4536_v58, 4  ;;  %v5275_v55 = vmul.f32 %v2533_v51, %v2506_v9  ;;  %v6362_v42 = vld [vmem:[#allocation18_spill] sm:$0xff]  ;;  %v6364_v6 = vld [vmem:[#allocation56_spill] sm:$0xff] }
 0x2d8   :  { %v1488_v37 = vsel %vm6358_vm6, %v1457_v62, %v6357_v14  ;;  %v1681_v12 = vsel %vm1666_vm5, %v1650_v56, %v6359_v23  ;;  %v6363_v23 = vrot.slane %v4536_v58, 3  ;;  %v6365_v51 = vrot.slane %v4536_v58, 2 }
 0x2d9   :  { %v1539_v8 = vsel %vm1491_vm15, %v1488_v37, 0.0  ;;  %v1732_v16 = vsel %vm1684_vm7, %v1681_v12, 0.0  ;;  %v1874_v35 = vsel %vm6338_vm13, %v6110_v52, %v6361_v53  ;;  %v2731_v12 = vmul.f32 %v2715_v15, %v4171_v4  ;;  %v1171_v53 = vpop.permute.xlu0 %1170  ;;  %v6367_v15 = vld [vmem:[#allocation36_spill] sm:$0xff] }
 0x2da   :  { %v1619_v14 = vmul.f32 %v6362_v42, %v1539_v8  ;;  %v1925_v25 = vsel %vm1877_vm2, %v1874_v35, 0.0  ;;  %v2067_v37 = vsel %vm2052_vm10, %v6108_v28, %v6363_v23  ;;  %v1812_v50 = vmul.f32 %v6364_v6, %v1732_v16 }
 0x2db   :  { %v2118_v9 = vsel %vm2070_vm4, %v2067_v37, 0.0  ;;  %vm6366_vm3 = vcmp.lt.s32.totalorder %v4397_v24, 6  ;;  %vm1309_vm11 = vcmp.ge.s32.totalorder %v6315_v59, 1  ;;  %vm1502_vm15 = vcmp.ge.s32.totalorder %v6315_v59, 2  ;;  %v6369_v37 = vld [vmem:[#allocation99_spill] sm:$0xff] }
 0x2dc   :  { %v2260_v8 = vsel %vm6366_vm3, %v6109_v21, %v6365_v51  ;;  %vm1695_vm7 = vcmp.ge.s32.totalorder %v6315_v59, 3  ;;  %vm2457_vm2 = vcmp.ge.s32.totalorder %v4430_v17, 7  ;;  %v1635_v4 = vadd.f32 %v1619_v14, %v1442_v60 }
 0x2dd   :  { %v2005_v16 = vmul.f32 %v6367_v15, %v1925_v25  ;;  %v2311_v58 = vsel %vm2263_vm8, %v2260_v8, 0.0  ;;  %v6368_v35 = vrot.slane %v4848_v1, 7  ;;  %v2745_v23 = vpack.c.bf16 %v2732_v36, %v2731_v12 }
 0x2de   :  { %vm2469_vm4 = vcmp.ge.s32.totalorder %v4446_v18, 7  ;;  %v2198_v6 = vmul.f32 %v6369_v37, %v2118_v9  ;;  %v6113_v60 = vrot.slane %v4848_v1, 6  ;;  %vm1888_vm6 = vcmp.ge.s32.totalorder %v6315_v59, 4 }
 0x2df   :  { %v1296_v42 = vsel %vm1280_vm1, %v6368_v35, %v1264_v38  ;;  %v1828_v14 = vadd.f32 %v1812_v50, %v1635_v4  ;;  %v6112_v8 = vrot.slane %v4848_v1, 5  ;;  %v1248_v15 = vmul.f32 %v1171_v53, %v6306_v32  ;;  %3028 = vmatprep.mubr.bf16.mxu1 %v2745_v23  ;;  %v6371_v38 = vld [vmem:[#allocation113_spill] sm:$0xff]  ;;  %v6374_v23 = vld [vmem:[#allocation40_spill] sm:$0xff] }
 0x2e0   :  { %v1345_v51 = vsel %vm1297_vm0, %v1296_v42, 0.0  ;;  %vm2081_vm8 = vcmp.ge.s32.totalorder %v6315_v59, 5  ;;  %v2391_v36 = vmul.f32 %v6371_v38, %v2311_v58  ;;  %vm6372_vm0 = vcmp.lt.s32.totalorder %v4397_v24, 2  ;;  %v5331_v42 = vpop.permute.xlu1 %2580 }
 0x2e1   :  { %v1425_v25 = vmul.f32 %v6370_v3, %v1345_v51  ;;  %v1489_v12 = vsel %vm6372_vm0, %v6113_v60, %v1457_v62  ;;  %v6123_v9 = vrot.slane %v4702_v20, 7  ;;  %v6122_v50 = vrot.slane %v4702_v20, 6  ;;  %6373 = vst [vmem:[#allocation25_spill] sm:$0xff] %v5331_v42  ;;  %v6375_v3 = vld [vmem:[#allocation24_spill] sm:$0xff]  ;;  %v6380_v60 = vld [vmem:[#allocation37_spill] sm:$0xff] }
 0x2e2   :  { %vm2274_vm13 = vcmp.ge.s32.totalorder %v6315_v59, 6  ;;  %v2021_v4 = vadd.f32 %v2005_v16, %v1828_v14  ;;  %v1538_v53 = vsel %vm1490_vm9, %v1489_v12, 0.0  ;;  %v1682_v58 = vsel %vm1666_vm5, %v6112_v8, %v1650_v56  ;;  %vm6377_vm9 = vmmov %vm6366_vm3 }
 0x2e3   :  { %v1441_v35 = vadd.f32 %v1425_v25, %v1248_v15  ;;  %v1618_v62 = vmul.f32 %v6374_v23, %v1538_v53  ;;  %v1731_v37 = vsel %vm1683_vm12, %v1682_v58, 0.0  ;;  %v6121_v51 = vrot.slane %v4702_v20, 5  ;;  %vm6378_vm12 = vmmov %vm6372_vm0 }
 0x2e4   :  { %v6116_v16 = vrot.slane %v4702_v20, 4  ;;  %v2214_v14 = vadd.f32 %v2198_v6, %v2021_v4  ;;  %v1811_v38 = vmul.f32 %v6375_v3, %v1731_v37  ;;  %v6119_v12 = vrot.slane %v4702_v20, 3  ;;  %v2639_v52 = vpop.permute.xlu1 %2638 }
 0x2e5   :  { %v6111_v28 = vrot.slane %v4702_v20, 2  ;;  %v1634_v56 = vadd.f32 %v1618_v62, %v1441_v35  ;;  %v6120_v25 = vrot.slane %v4854_v5, 7  ;;  %v6117_v15 = vrot.slane %v4854_v5, 6 }
 0x2e6   :  { %v6114_v53 = vrot.slane %v4854_v5, 5  ;;  %v2407_v23 = vadd.f32 %v2391_v36, %v2214_v14  ;;  %v6115_v58 = vrot.slane %v4854_v5, 4  ;;  %v6118_v21 = vrot.slane %v4854_v5, 3 }
 0x2e7   :  { %v6376_v6 = vrot.slane %v4854_v5, 2  ;;  %v5352_v37 = vadd.f32 %v1811_v38, %v1634_v56  ;;  %v1284_v36 = vsel %vm1280_vm1, %v6123_v9, %v6120_v25  ;;  %v1477_v35 = vsel %vm6378_vm12, %v6122_v50, %v6117_v15  ;;  %v6393_v25 = vld [vmem:[#allocation2_spill] sm:$0xff]  ;;  %v6394_v9 = vld [vmem:[#allocation29_spill] sm:$0xff] }
 0x2e8   :  { %v1670_v62 = vsel %vm1666_vm5, %v6121_v51, %v6114_v53  ;;  %v2600_v14 = vadd.f32 %v5239_v34, %v2407_v23  ;;  %v1357_v3 = vsel %vm1309_vm11, %v1284_v36, 0.0  ;;  %v1550_v38 = vsel %vm1502_vm15, %v1477_v35, 0.0  ;;  %v6382_v36 = vld [vmem:[#allocation22_spill] sm:$0xff]  ;;  %vm6388_vm11 = vmmov %vm6372_vm0 }
 0x2e9   :  { %v2249_v4 = vsel %vm6377_vm9, %v6111_v28, %v6376_v6  ;;  %v1743_v56 = vsel %vm1695_vm7, %v1670_v62, 0.0  ;;  %v2505_v6 = vsel %vm2457_vm2, %v5212_v22, 0.0  ;;  %v6379_v28 = vld [vmem:[#allocation12_spill] sm:$0xff]  ;;  %v1437_v53 = vmul.f32 %v6380_v60, %v1357_v3  ;;  %v6383_v62 = vld [vmem:[#allocation71_spill] sm:$0xff] }
 0x2ea   :  { %v1260_v8 = vmul.f32 %v6379_v28, %v4854_v5  ;;  %vm6381_vm3 = vcmp.lt.s32.totalorder %v4397_v24, 4  ;;  %v2585_v23 = vmul.f32 %v5182_v0, %v2505_v6  ;;  %v5395_v17 = vsel %vm2469_vm4, %v5232_v19, 0.0 }
 0x2eb   :  { %v1863_v34 = vsel %vm6381_vm3, %v6116_v16, %v6115_v58  ;;  %v2056_v28 = vsel %vm2052_vm10, %v6119_v12, %v6118_v21  ;;  %v1630_v35 = vmul.f32 %v6382_v36, %v1550_v38  ;;  %v1823_v0 = vmul.f32 %v6383_v62, %v1743_v56  ;;  %v6384_v16 = vld [vmem:[#allocation93_spill] sm:$0xff]  ;;  %v1216_v38 = vpop.permute.xlu0 %1215  ;;  %v6392_v21 = vld [vmem:[#allocation47_spill] sm:$0xff] }
 0x2ec   :  { %v1936_v22 = vsel %vm1888_vm6, %v1863_v34, 0.0  ;;  %v1453_v60 = vadd.f32 %v1437_v53, %v1260_v8  ;;  %v2129_v18 = vsel %vm2081_vm8, %v2056_v28, 0.0  ;;  %v2712_v19 = vadd.f32 %v2639_v52, %v2600_v14  ;;  %v6385_v56 = vld [vmem:[#allocation101_spill] sm:$0xff] }
 0x2ed   :  { %v2322_v3 = vsel %vm2274_vm13, %v2249_v4, 0.0  ;;  %v75_v6 = vadd.s32 72, %v4397_v24  ;;  %v1273_v34 = vrot.slane %v4754_v33, 7  ;;  %v2016_v15 = vmul.f32 %v6384_v16, %v1936_v22  ;;  %vm6398_vm13 = vmmov %vm6372_vm0 }
 0x2ee   :  { %v1646_v58 = vadd.f32 %v1630_v35, %v1453_v60  ;;  %v1466_v8 = vrot.slane %v4754_v33, 6  ;;  %v1659_v53 = vrot.slane %v4754_v33, 5  ;;  %v2209_v36 = vmul.f32 %v6385_v56, %v2129_v18  ;;  %v6390_v56 = vld [vmem:[#allocation112_spill] sm:$0xff] }
 0x2ef   :  { %v5417_v62 = vand.u32 7, %v75_v6  ;;  %v6386_v52 = vrot.slane %v4716_v7, 7  ;;  %v2601_v4 = vadd.f32 %v2585_v23, %v4823_v61  ;;  %v6387_v28 = vrot.slane %v4716_v7, 6 }
 0x2f0   :  { %v1839_v14 = vadd.f32 %v1823_v0, %v1646_v58  ;;  %v6389_v22 = vrot.slane %v4716_v7, 5  ;;  %v76_v35 = vadd.s32 80, %v4397_v24  ;;  %v1257_v61 = vmul.f32 %v1216_v38, %v4754_v33  ;;  %v5437_v58 = vpop.permute.xlu1 %2693 }
 0x2f1   :  { %v1287_v59 = vsel %vm1280_vm1, %v6386_v52, %v1273_v34  ;;  %v1480_v16 = vsel %vm6388_vm11, %v6387_v28, %v1466_v8  ;;  %vm1306_vm15 = vcmp.ge.s32.totalorder %v5417_v62, 1  ;;  %vm1499_vm7 = vcmp.ge.s32.totalorder %v5417_v62, 2  ;;  %v6391_v28 = vld [vmem:[#allocation14_spill] sm:$0xff] }
 0x2f2   :  { %v1673_v60 = vsel %vm1666_vm5, %v6389_v22, %v1659_v53  ;;  %vm1692_vm2 = vcmp.ge.s32.totalorder %v5417_v62, 3  ;;  %v2032_v23 = vadd.f32 %v2016_v15, %v1839_v14  ;;  %v1354_v0 = vsel %vm1306_vm15, %v1287_v59, 0.0  ;;  %vm6408_vm15 = vmmov %vm6372_vm0 }
 0x2f3   :  { %v1547_v18 = vsel %vm1499_vm7, %v1480_v16, 0.0  ;;  %v1740_v6 = vsel %vm1692_vm2, %v1673_v60, 0.0  ;;  %v2402_v52 = vmul.f32 %v6390_v56, %v2322_v3  ;;  %v1434_v22 = vmul.f32 %v6391_v28, %v1354_v0  ;;  %v1226_v3 = vpop.permute.xlu0 %1225 }
 0x2f4   :  { %v1627_v12 = vmul.f32 %v6392_v21, %v1547_v18  ;;  %v1258_v51 = vmul.f32 %v6393_v25, %v4686_v47  ;;  %v2225_v50 = vadd.f32 %v2209_v36, %v2032_v23  ;;  %v1820_v42 = vmul.f32 %v6394_v9, %v1740_v6  ;;  %v2644_v23 = vpop.permute.xlu1 %2643  ;;  %v6397_v18 = vld [vmem:[#allocation34_spill] sm:$0xff] }
 0x2f5   :  { %v5445_v30 = vand.u32 7, %v76_v35  ;;  %v1274_v38 = vrot.slane %v4686_v47, 7  ;;  %v1450_v15 = vadd.f32 %v1434_v22, %v1257_v61  ;;  %vm1308_vm4 = vcmp.ge.s32.totalorder %v6322_v63, 1  ;;  %v6400_v22 = vld [vmem:[#allocation62_spill] sm:$0xff] }
 0x2f6   :  { %v1467_v59 = vrot.slane %v4686_v47, 6  ;;  %vm1501_vm6 = vcmp.ge.s32.totalorder %v6322_v63, 2  ;;  %v2418_v14 = vadd.f32 %v2402_v52, %v2225_v50  ;;  %v6395_v21 = vrot.slane %v4702_v20, 7 }
 0x2f7   :  { %v1286_v9 = vsel %vm1280_vm1, %v1273_v34, %v1274_v38  ;;  %vm1307_vm8 = vcmp.ge.s32.totalorder %v5445_v30, 1  ;;  %v1643_v36 = vadd.f32 %v1627_v12, %v1450_v15  ;;  %v6396_v60 = vrot.slane %v4702_v20, 6 }
 0x2f8   :  { %v1285_v25 = vsel %vm1280_vm1, %v1274_v38, %v6395_v21  ;;  %v1355_v16 = vsel %vm1307_vm8, %v1286_v9, 0.0  ;;  %v1660_v61 = vrot.slane %v4686_v47, 5  ;;  %v5464_v50 = vadd.f32 %v5163_v43, %v2418_v14  ;;  %v6402_v9 = vld [vmem:[#allocation49_spill] sm:$0xff] }
 0x2f9   :  { %v1478_v35 = vsel %vm6372_vm0, %v1467_v59, %v6396_v60  ;;  %v1356_v0 = vsel %vm1308_vm4, %v1285_v25, 0.0  ;;  %v1435_v6 = vmul.f32 %v6397_v18, %v1355_v16  ;;  %v1479_v34 = vsel %vm6398_vm13, %v1466_v8, %v1467_v59  ;;  %v6401_v59 = vld [vmem:[#allocation15_spill] sm:$0xff]  ;;  %v1236_v25 = vpop.permute.xlu0 %1235 }
 0x2fa   :  { %v5469_v56 = vadd.f32 %v1820_v42, %v1643_v36  ;;  %vm1500_vm9 = vcmp.ge.s32.totalorder %v5445_v30, 2  ;;  %v1549_v12 = vsel %vm1501_vm6, %v1478_v35, 0.0  ;;  %v6399_v52 = vrot.slane %v4702_v20, 5  ;;  %v6409_v18 = vld [vmem:[#allocation31_spill] sm:$0xff]  ;;  %vm6420_vm6 = vmmov %vm6372_vm0 }
 0x2fb   :  { %v2597_v28 = vmul.f32 %v5241_v2, %v5395_v17  ;;  %v5481_v38 = vmul.f32 %v2712_v19, %v6400_v22  ;;  %v5483_v15 = vadd.f32 %v1435_v6, %v1258_v51  ;;  %v1548_v42 = vsel %vm1500_vm9, %v1479_v34, 0.0  ;;  %v6403_v51 = vld [vmem:[#allocation21_spill] sm:$0xff]  ;;  %v6412_v22 = vld [vmem:[#allocation16_spill] sm:$0xff] }
 0x2fc   :  { %v1671_v43 = vsel %vm1666_vm5, %v1660_v61, %v6399_v52  ;;  %v5485_v8 = vadd.f32 %v2644_v23, %v2601_v4  ;;  %v1436_v14 = vmul.f32 %v6401_v59, %v1356_v0  ;;  %v1672_v21 = vsel %vm1666_vm5, %v1659_v53, %v1660_v61 }
 0x2fd   :  { %vm1694_vm12 = vcmp.ge.s32.totalorder %v6322_v63, 3  ;;  %v1629_v36 = vmul.f32 %v6402_v9, %v1549_v12  ;;  %vm1693_vm3 = vcmp.ge.s32.totalorder %v5445_v30, 3  ;;  %v1259_v17 = vmul.f32 %v1226_v3, %v4702_v20 }
 0x2fe   :  { %v1742_v2 = vsel %vm1694_vm12, %v1671_v43, 0.0  ;;  %v5495_v19 = vmul.f32 %v6403_v51, %v1548_v42  ;;  %v5498_v4 = vadd.f32 %v2597_v28, %v5031_v26  ;;  %v6404_v16 = vrot.slane %v4873_v46, 7 }
 0x2ff   :  { %v6405_v53 = vrot.slane %v4854_v5, 7  ;;  %vm1310_vm11 = vcmp.ge.s32.totalorder %v6294_v13, 1  ;;  %v1452_v35 = vadd.f32 %v1436_v14, %v1259_v17  ;;  %v6406_v23 = vrot.slane %v4873_v46, 6  ;;  %v6413_v14 = vld [vmem:[#allocation51_spill] sm:$0xff] }
 0x300   :  { %v6407_v3 = vrot.slane %v4854_v5, 6  ;;  %vm1503_vm7 = vcmp.ge.s32.totalorder %v6294_v13, 2  ;;  %v5514_v26 = vsel %vm1693_vm3, %v1672_v21, 0.0  ;;  %v1822_v6 = vmul.f32 %v6409_v18, %v1742_v2  ;;  %vm6429_vm3 = vmmov %vm6420_vm6 }
 0x301   :  { %v1283_v60 = vsel %vm1280_vm1, %v6405_v53, %v6404_v16  ;;  %v6410_v12 = vrot.slane %v4873_v46, 5  ;;  %v6411_v52 = vrot.slane %v4854_v5, 5  ;;  %v1645_v28 = vadd.f32 %v1629_v36, %v1452_v35  ;;  %v1246_v16 = vpop.permute.xlu0 %1245  ;;  %v6416_v53 = vld [vmem:[#allocation33_spill] sm:$0xff] }
 0x302   :  { %v1358_v61 = vsel %vm1310_vm11, %v1283_v60, 0.0  ;;  %v1476_v0 = vsel %vm6408_vm15, %v6407_v3, %v6406_v23  ;;  %vm1696_vm2 = vcmp.ge.s32.totalorder %v6294_v13, 3  ;;  %v1261_v59 = vmul.f32 %v1236_v25, %v4873_v46  ;;  %v6417_v25 = vld [vmem:[#allocation17_spill] sm:$0xff] }
 0x303   :  { %v1551_v34 = vsel %vm1503_vm7, %v1476_v0, 0.0  ;;  %v1669_v43 = vsel %vm1666_vm5, %v6411_v52, %v6410_v12  ;;  %v1438_v42 = vmul.f32 %v6412_v22, %v1358_v61  ;;  %v6414_v2 = vrot.slane %v4848_v1, 7  ;;  %v6423_v22 = vld [vmem:[#allocation53_spill] sm:$0xff] }
 0x304   :  { %v1631_v21 = vmul.f32 %v6413_v14, %v1551_v34  ;;  %v1744_v9 = vsel %vm1696_vm2, %v1669_v43, 0.0  ;;  %v6415_v17 = vrot.slane %v4814_v45, 7  ;;  %vm1312_vm4 = vcmp.ge.s32.totalorder %v4444_v27, 1  ;;  %v6424_v14 = vld [vmem:[#allocation11_spill] sm:$0xff] }
 0x305   :  { %v5534_v36 = vadd.f32 %v1822_v6, %v1645_v28  ;;  %v1824_v60 = vmul.f32 %v6416_v53, %v1744_v9  ;;  %v1454_v35 = vadd.f32 %v1438_v42, %v1261_v59  ;;  %v6418_v3 = vrot.slane %v4848_v1, 6 }
 0x306   :  { %v1281_v51 = vsel %vm1280_vm1, %v6415_v17, %v6414_v2  ;;  %v6419_v0 = vrot.slane %v4814_v45, 6  ;;  %vm1505_vm8 = vcmp.ge.s32.totalorder %v4444_v27, 2  ;;  %v6421_v34 = vrot.slane %v4848_v1, 5 }
 0x307   :  { %v1360_v61 = vsel %vm1312_vm4, %v1281_v51, 0.0  ;;  %v6422_v6 = vrot.slane %v4814_v45, 5  ;;  %v1647_v52 = vadd.f32 %v1631_v21, %v1454_v35  ;;  %vm1698_vm0 = vcmp.ge.s32.totalorder %v4444_v27, 3  ;;  %v6425_v51 = vld [vmem:[#allocation35_spill] sm:$0xff] }
 0x308   :  { %v1440_v23 = vmul.f32 %v6417_v25, %v1360_v61  ;;  %v1474_v18 = vsel %vm6420_vm6, %v6419_v0, %v6418_v3  ;;  %v1263_v28 = vmul.f32 %v1246_v16, %v4848_v1  ;;  %v1254_v9 = vmul.f32 %v6424_v14, %v4593_v40  ;;  %v6427_v0 = vld [vmem:[#allocation30_spill] sm:$0xff] }
 0x309   :  { %v1667_v12 = vsel %vm1666_vm5, %v6422_v6, %v6421_v34  ;;  %v1553_v43 = vsel %vm1505_vm8, %v1474_v18, 0.0  ;;  %v1270_v2 = vrot.slane %v4593_v40, 7  ;;  %v5557_v17 = vadd.f32 %v1824_v60, %v1647_v52 }
 0x30a   :  { %v1633_v42 = vmul.f32 %v6423_v22, %v1553_v43  ;;  %v1746_v59 = vsel %vm1698_vm0, %v1667_v12, 0.0  ;;  %v1456_v61 = vadd.f32 %v1440_v23, %v1263_v28  ;;  %vm1303_vm13 = vcmp.ge.s32.totalorder %v4845_v44, 1 }
 0x30b   :  { %v1826_v53 = vmul.f32 %v6425_v51, %v1746_v59  ;;  %v6426_v21 = vrot.slane %v4650_v49, 7  ;;  %v1463_v35 = vrot.slane %v4593_v40, 6  ;;  %vm1496_vm9 = vcmp.ge.s32.totalorder %v4845_v44, 2  ;;  %v6433_v51 = vld [vmem:[#allocation19_spill] sm:$0xff] }
 0x30c   :  { %v1656_v25 = vrot.slane %v4593_v40, 5  ;;  %v1649_v60 = vadd.f32 %v1633_v42, %v1456_v61  ;;  %vm1689_vm12 = vcmp.ge.s32.totalorder %v4845_v44, 3  ;;  %v1849_v23 = vrot.slane %v4593_v40, 4 }
 0x30d   :  { %v1290_v16 = vsel %vm1280_vm1, %v6426_v21, %v1270_v2  ;;  %v6428_v34 = vrot.slane %v4650_v49, 6  ;;  %v6430_v12 = vrot.slane %v4650_v49, 5  ;;  %vm1882_vm11 = vcmp.ge.s32.totalorder %v4845_v44, 4  ;;  %v6434_v21 = vld [vmem:[#allocation63_spill] sm:$0xff] }
 0x30e   :  { %v1351_v3 = vsel %vm1303_vm13, %v1290_v16, 0.0  ;;  %v5586_v43 = vadd.f32 %v1826_v53, %v1649_v60  ;;  %v6431_v42 = vrot.slane %v4650_v49, 4  ;;  %vm6432_vm15 = vcmp.lt.s32.totalorder %v4397_v24, 4 }
 0x30f   :  { %v1431_v18 = vmul.f32 %v6427_v0, %v1351_v3  ;;  %v1483_v6 = vsel %vm6429_vm3, %v6428_v34, %v1463_v35  ;;  %v1676_v52 = vsel %vm1666_vm5, %v6430_v12, %v1656_v25  ;;  %v6435_v0 = vld [vmem:[#allocation41_spill] sm:$0xff]  ;;  %v6125_v53 = vrot.slane %v4593_v40, 3  ;;  %vm6443_vm0 = vmmov %vm6432_vm15 }
 0x310   :  { %v1544_v28 = vsel %vm1496_vm9, %v1483_v6, 0.0  ;;  %v1737_v22 = vsel %vm1689_vm12, %v1676_v52, 0.0  ;;  %v1869_v59 = vsel %vm6432_vm15, %v6431_v42, %v1849_v23  ;;  %vm2075_vm7 = vcmp.ge.s32.totalorder %v4845_v44, 5 }
 0x311   :  { %v1447_v14 = vadd.f32 %v1431_v18, %v1254_v9  ;;  %v1624_v61 = vmul.f32 %v6433_v51, %v1544_v28  ;;  %v1817_v16 = vmul.f32 %v6434_v21, %v1737_v22  ;;  %v1930_v3 = vsel %vm1882_vm11, %v1869_v59, 0.0 }
 0x312   :  { %v2010_v34 = vmul.f32 %v6435_v0, %v1930_v3  ;;  %v6124_v60 = vrot.slane %v4593_v40, 2  ;;  %vm2268_vm2 = vcmp.ge.s32.totalorder %v4845_v44, 6  ;;  %v6129_v12 = vrot.slane %v4593_v40, 1  ;;  %v6441_v3 = vld [vmem:[#allocation50_spill] sm:$0xff] }
 0x313   :  { %v1640_v6 = vadd.f32 %v1624_v61, %v1447_v14  ;;  %vm2461_vm4 = vcmp.ge.s32.totalorder %v4845_v44, 7  ;;  %v6436_v9 = vrot.slane %v4650_v49, 3  ;;  %v6437_v52 = vrot.slane %v4650_v49, 2  ;;  %v6440_v61 = vld [vmem:[#allocation44_spill] sm:$0xff] }
 0x314   :  { %vm6438_vm6 = vcmp.lt.s32.totalorder %v4397_v24, 6  ;;  %v6127_v22 = vrot.slane %v4754_v33, 4  ;;  %vm1885_vm8 = vcmp.ge.s32.totalorder %v5417_v62, 4  ;;  %v6439_v14 = vrot.slane %v4650_v49, 1 }
 0x315   :  { %v2062_v18 = vsel %vm2052_vm10, %v6436_v9, %v6125_v53  ;;  %v2255_v28 = vsel %vm6438_vm6, %v6437_v52, %v6124_v60  ;;  %v1833_v42 = vadd.f32 %v1817_v16, %v1640_v6  ;;  %v6442_v52 = vrot.slane %v4716_v7, 4  ;;  %v6445_v53 = vld [vmem:[#allocation61_spill] sm:$0xff]  ;;  %vm6448_vm3 = vmmov %vm6438_vm6 }
 0x316   :  { %v2123_v44 = vsel %vm2075_vm7, %v2062_v18, 0.0  ;;  %v2316_v59 = vsel %vm2268_vm2, %v2255_v28, 0.0  ;;  %v2448_v51 = vsel %vm2438_vm14, %v6439_v14, %v6129_v12  ;;  %v6444_v18 = vld [vmem:[#allocation54_spill] sm:$0xff]  ;;  %v6126_v49 = vrot.slane %v4754_v33, 3  ;;  %vm6461_vm2 = vmmov %vm6443_vm0 }
 0x317   :  { %v2203_v21 = vmul.f32 %v6440_v61, %v2123_v44  ;;  %v2396_v0 = vmul.f32 %v6441_v3, %v2316_v59  ;;  %v2509_v9 = vsel %vm2461_vm4, %v2448_v51, 0.0  ;;  %v1866_v16 = vsel %vm6443_vm0, %v6442_v52, %v6127_v22  ;;  %v2664_v61 = vpop.permute.xlu0 %2663  ;;  %v6452_v22 = vld [vmem:[#allocation7_spill] sm:$0xff]  ;;  %vm6469_vm6 = vmmov %vm6448_vm3 }
 0x318   :  { %v2026_v6 = vadd.f32 %v2010_v34, %v1833_v42  ;;  %v2589_v28 = vmul.f32 %v6444_v18, %v2509_v9  ;;  %v1933_v60 = vsel %vm1885_vm8, %v1866_v16, 0.0  ;;  %vm2078_vm13 = vcmp.ge.s32.totalorder %v5417_v62, 5  ;;  %v6449_v16 = vld [vmem:[#allocation97_spill] sm:$0xff] }
 0x319   :  { %v2013_v14 = vmul.f32 %v6445_v53, %v1933_v60  ;;  %v6128_v44 = vrot.slane %v4754_v33, 2  ;;  %vm2271_vm9 = vcmp.ge.s32.totalorder %v5417_v62, 6  ;;  %v6446_v51 = vrot.slane %v4716_v7, 3 }
 0x31a   :  { %v2219_v59 = vadd.f32 %v2203_v21, %v2026_v6  ;;  %v2431_v42 = vrot.slane %v4754_v33, 1  ;;  %vm2464_vm12 = vcmp.ge.s32.totalorder %v5417_v62, 7  ;;  %v6447_v3 = vrot.slane %v4716_v7, 2 }
 0x31b   :  { %v2059_v34 = vsel %vm2052_vm10, %v6446_v51, %v6126_v49  ;;  %v2029_v53 = vadd.f32 %v2013_v14, %v5469_v56  ;;  %v73_v9 = vadd.s32 56, %v4397_v24  ;;  %v6450_v62 = vrot.slane %v4716_v7, 1  ;;  %v6451_v14 = vld [vmem:[#allocation110_spill] sm:$0xff] }
 0x31c   :  { %v2126_v60 = vsel %vm2078_vm13, %v2059_v34, 0.0  ;;  %v2252_v21 = vsel %vm6448_vm3, %v6447_v3, %v6128_v44  ;;  %v2412_v52 = vadd.f32 %v2396_v0, %v2219_v59  ;;  %v1255_v3 = vmul.f32 %v6452_v22, %v4616_v11  ;;  %v6453_v0 = vld [vmem:[#allocation89_spill] sm:$0xff] }
 0x31d   :  { %v2206_v6 = vmul.f32 %v6449_v16, %v2126_v60  ;;  %v2319_v18 = vsel %vm2271_vm9, %v2252_v21, 0.0  ;;  %v2445_v56 = vsel %vm2438_vm14, %v6450_v62, %v2431_v42  ;;  %v135_v49 = vand.u32 7, %v73_v9 }
 0x31e   :  { %v2399_v51 = vmul.f32 %v6451_v14, %v2319_v18  ;;  %v2512_v34 = vsel %vm2464_vm12, %v2445_v56, 0.0  ;;  %v2605_v44 = vadd.f32 %v2589_v28, %v2412_v52  ;;  %v6454_v60 = vrot.slane %v4616_v11, 7  ;;  %v6458_v18 = vld [vmem:[#allocation13_spill] sm:$0xff]  ;;  %vm6476_vm12 = vmmov %vm6461_vm2 }
 0x31f   :  { %v2222_v12 = vadd.f32 %v2206_v6, %v2029_v53  ;;  %v2592_v59 = vmul.f32 %v6453_v0, %v2512_v34  ;;  %vm1304_vm11 = vcmp.ge.s32.totalorder %v135_v49, 1  ;;  %v6455_v21 = vrot.slane %v4616_v11, 6  ;;  %v2679_v6 = vpop.permute.xlu0 %2678  ;;  %v6459_v56 = vld [vmem:[#allocation45_spill] sm:$0xff] }
 0x320   :  { %v1289_v7 = vsel %vm1280_vm1, %v1270_v2, %v6454_v60  ;;  %vm6456_vm15 = vcmp.lt.s32.totalorder %v4397_v24, 2  ;;  %vm1497_vm7 = vcmp.ge.s32.totalorder %v135_v49, 2  ;;  %v6457_v22 = vrot.slane %v4616_v11, 5  ;;  %v6462_v0 = vld [vmem:[#allocation65_spill] sm:$0xff] }
 0x321   :  { %v1482_v9 = vsel %vm6456_vm15, %v1463_v35, %v6455_v21  ;;  %v2717_v53 = vadd.f32 %v2664_v61, %v2605_v44  ;;  %v2415_v52 = vadd.f32 %v2399_v51, %v2222_v12  ;;  %v1352_v16 = vsel %vm1304_vm11, %v1289_v7, 0.0  ;;  %v6463_v61 = vld [vmem:[#allocation27_spill] sm:$0xff]  ;;  %vm6481_vm11 = vmmov %vm6469_vm6 }
 0x322   :  { %v1675_v28 = vsel %vm1666_vm5, %v1656_v25, %v6457_v22  ;;  %v1545_v2 = vsel %vm1497_vm7, %v1482_v9, 0.0  ;;  %v1432_v62 = vmul.f32 %v6458_v18, %v1352_v16  ;;  %vm1690_vm1 = vcmp.ge.s32.totalorder %v135_v49, 3  ;;  %vm6484_vm15 = vmmov %vm6461_vm2 }
 0x323   :  { %v1625_v14 = vmul.f32 %v6459_v56, %v1545_v2  ;;  %v6460_v35 = vrot.slane %v4616_v11, 4  ;;  %v5691_v60 = vmul.f32 %v2717_v53, %v6462_v0  ;;  %v2608_v25 = vadd.f32 %v2592_v59, %v2415_v52  ;;  %v6466_v2 = vld [vmem:[#allocation87_spill] sm:$0xff] }
 0x324   :  { %v1738_v12 = vsel %vm1690_vm1, %v1675_v28, 0.0  ;;  %vm1883_vm5 = vcmp.ge.s32.totalorder %v135_v49, 4  ;;  %v1448_v44 = vadd.f32 %v1432_v62, %v1255_v3  ;;  %v6464_v21 = vrot.slane %v4616_v11, 3 }
 0x325   :  { %v1868_v34 = vsel %vm6461_vm2, %v1849_v23, %v6460_v35  ;;  %v1818_v51 = vmul.f32 %v6463_v61, %v1738_v12  ;;  %v6465_v9 = vrot.slane %v4593_v40, 3  ;;  %v2720_v16 = vadd.f32 %v2679_v6, %v2608_v25  ;;  %v6472_v35 = vld [vmem:[#allocation46_spill] sm:$0xff]  ;;  %v6473_v12 = vld [vmem:[#allocation107_spill] sm:$0xff]  ;;  %vm6488_vm2 = vmmov %vm6469_vm6 }
 0x326   :  { %v1931_v7 = vsel %vm1883_vm5, %v1868_v34, 0.0  ;;  %vm2076_vm4 = vcmp.ge.s32.totalorder %v135_v49, 5  ;;  %v6467_v53 = vrot.slane %v4616_v11, 2  ;;  %v6468_v59 = vrot.slane %v4593_v40, 2 }
 0x327   :  { %v2061_v22 = vsel %vm2052_vm10, %v6465_v9, %v6464_v21  ;;  %v2011_v23 = vmul.f32 %v6466_v2, %v1931_v7  ;;  %v1641_v28 = vadd.f32 %v1625_v14, %v1448_v44  ;;  %vm2269_vm8 = vcmp.ge.s32.totalorder %v135_v49, 6  ;;  %v2689_v7 = vpop.permute.xlu0 %2688 }
 0x328   :  { %v2254_v3 = vsel %vm6469_vm6, %v6468_v59, %v6467_v53  ;;  %v2124_v52 = vsel %vm2076_vm4, %v2061_v22, 0.0  ;;  %v6470_v18 = vrot.slane %v4616_v11, 1  ;;  %v6471_v62 = vrot.slane %v4593_v40, 1  ;;  %v6474_v11 = vld [vmem:[#allocation57_spill] sm:$0xff]  ;;  %v6478_v53 = vld [vmem:[#allocation76_spill] sm:$0xff]  ;;  %vm6496_vm4 = vmmov %vm6476_vm12 }
 0x329   :  { %v5714_v56 = vmul.f32 %v2720_v16, %v4213_v54  ;;  %v2204_v34 = vmul.f32 %v6472_v35, %v2124_v52  ;;  %v2317_v0 = vsel %vm2269_vm8, %v2254_v3, 0.0  ;;  %vm2462_vm0 = vcmp.ge.s32.totalorder %v135_v49, 7 }
 0x32a   :  { %v2447_v6 = vsel %vm2438_vm14, %v6471_v62, %v6470_v18  ;;  %v1834_v25 = vadd.f32 %v1818_v51, %v1641_v28  ;;  %v2397_v61 = vmul.f32 %v6473_v12, %v2317_v0  ;;  %v1853_v44 = vrot.slane %v4686_v47, 4  ;;  %v6479_v28 = vld [vmem:[#allocation92_spill] sm:$0xff] }
 0x32b   :  { %v2510_v14 = vsel %vm2462_vm0, %v2447_v6, 0.0  ;;  %vm1887_vm13 = vcmp.ge.s32.totalorder %v6322_v63, 4  ;;  %v2046_v40 = vrot.slane %v4686_v47, 3  ;;  %vm2080_vm9 = vcmp.ge.s32.totalorder %v6322_v63, 5  ;;  %v6482_v6 = vld [vmem:[#allocation77_spill] sm:$0xff]  ;;  %vm6500_vm0 = vmmov %vm6488_vm2 }
 0x32c   :  { %v2590_v21 = vmul.f32 %v6474_v11, %v2510_v14  ;;  %v2027_v54 = vadd.f32 %v2011_v23, %v1834_v25  ;;  %v6475_v9 = vrot.slane %v4702_v20, 4  ;;  %v2239_v51 = vrot.slane %v4686_v47, 2  ;;  %v6485_v11 = vld [vmem:[#allocation88_spill] sm:$0xff] }
 0x32d   :  { %vm2273_vm3 = vcmp.ge.s32.totalorder %v6322_v63, 6  ;;  %v6477_v16 = vrot.slane %v4702_v20, 3  ;;  %v2735_v59 = vmul.f32 %v5206_v29, %v6478_v53  ;;  %v1858_v23 = vrot.slane %v4848_v1, 4 }
 0x32e   :  { %v1864_v49 = vsel %vm6476_vm12, %v1853_v44, %v6475_v9  ;;  %v2220_v3 = vadd.f32 %v2204_v34, %v2027_v54  ;;  %v6480_v62 = vrot.slane %v4702_v20, 2  ;;  %v6483_v12 = vrot.slane %v6306_v32, 4  ;;  %v2634_v54 = vpop.permute.xlu0 %2633  ;;  %vm6508_vm12 = vmmov %vm6496_vm4 }
 0x32f   :  { %v1935_v22 = vsel %vm1887_vm13, %v1864_v49, 0.0  ;;  %v2057_v2 = vsel %vm2052_vm10, %v2046_v40, %v6477_v16  ;;  %v2747_v25 = vpack.c.bf16 %v5714_v56, %v2735_v59  ;;  %vm1876_vm7 = vcmp.ge.s32.totalorder %v6311_v41, 4 }
 0x330   :  { %v2015_v52 = vmul.f32 %v6479_v28, %v1935_v22  ;;  %v2128_v18 = vsel %vm2080_vm9, %v2057_v2, 0.0  ;;  %v2250_v63 = vsel %vm6481_vm11, %v2239_v51, %v6480_v62  ;;  %v1875_v29 = vsel %vm6484_vm15, %v1858_v23, %v6483_v12  ;;  %v6494_v12 = vld [vmem:[#allocation111_spill] sm:$0xff]  ;;  %vm6515_vm11 = vmmov %vm6496_vm4 }
 0x331   :  { %v2208_v35 = vmul.f32 %v6482_v6, %v2128_v18  ;;  %v2321_v0 = vsel %vm2273_vm3, %v2250_v63, 0.0  ;;  %v2413_v34 = vadd.f32 %v2397_v61, %v2220_v3  ;;  %v1924_v9 = vsel %vm1876_vm7, %v1875_v29, 0.0  ;;  %v6491_v18 = vld [vmem:[#allocation69_spill] sm:$0xff] }
 0x332   :  { %v2031_v14 = vadd.f32 %v2015_v52, %v5534_v36  ;;  %v2401_v20 = vmul.f32 %v6485_v11, %v2321_v0  ;;  %v2051_v49 = vrot.slane %v4848_v1, 3  ;;  %vm2069_vm1 = vcmp.ge.s32.totalorder %v6311_v41, 5  ;;  %v6489_v36 = vld [vmem:[#allocation78_spill] sm:$0xff] }
 0x333   :  { %v6486_v56 = vrot.slane %v6306_v32, 2  ;;  %v6487_v22 = vrot.slane %v4848_v1, 2  ;;  %v2606_v61 = vadd.f32 %v2590_v21, %v2413_v34  ;;  %v2004_v53 = vmul.f32 %v6489_v36, %v1924_v9  ;;  %v6492_v21 = vld [vmem:[#allocation79_spill] sm:$0xff]  ;;  %v6493_v0 = vld [vmem:[#allocation102_spill] sm:$0xff]  ;;  %v5787_v9 = vpop.permute.xlu0 %2698  ;;  %v6502_v36 = vld [vmem:[#allocation64_spill] sm:$0xff] }
 0x334   :  { %v2224_v2 = vadd.f32 %v2208_v35, %v2031_v14  ;;  %vm2262_vm5 = vcmp.ge.s32.totalorder %v6311_v41, 6  ;;  %v6490_v59 = vrot.slane %v6306_v32, 3  ;;  %v1644_v52 = vadd.f32 %v5495_v19, %v5483_v15  ;;  %v6497_v15 = vld [vmem:[#allocation68_spill] sm:$0xff] }
 0x335   :  { %v2261_v16 = vsel %vm6488_vm2, %v6487_v22, %v6486_v56  ;;  %v1821_v62 = vmul.f32 %v6491_v18, %v5514_v26  ;;  %v2718_v63 = vadd.f32 %v6492_v21, %v2606_v61  ;;  %v2020_v35 = vadd.f32 %v2004_v53, %v5352_v37  ;;  %v6501_v61 = vld [vmem:[#allocation55_spill] sm:$0xff]  ;;  %v6504_v18 = vld [vmem:[#allocation100_spill] sm:$0xff] }
 0x336   :  { %v2068_v3 = vsel %vm2052_vm10, %v2051_v49, %v6490_v59  ;;  %v2310_v28 = vsel %vm2262_vm5, %v2261_v16, 0.0  ;;  %v2417_v6 = vadd.f32 %v2401_v20, %v2224_v2  ;;  %v6495_v14 = vrot.slane %v4754_v33, 4  ;;  %v6523_v1 = vld [vmem:[#allocation108_spill] sm:$0xff] }
 0x337   :  { %v2117_v41 = vsel %vm2069_vm1, %v2068_v3, 0.0  ;;  %v2390_v29 = vmul.f32 %v6494_v12, %v2310_v28  ;;  %v1837_v34 = vadd.f32 %v1821_v62, %v1644_v52  ;;  %v2734_v19 = vmul.f32 %v2718_v63, %v6497_v15 }
 0x338   :  { %v2197_v32 = vmul.f32 %v6493_v0, %v2117_v41  ;;  %v1865_v11 = vsel %vm6496_vm4, %v6495_v14, %v1853_v44  ;;  %v2610_v26 = vadd.f32 %v5168_v48, %v2417_v6  ;;  %vm1886_vm6 = vcmp.ge.s32.totalorder %v5445_v30, 4  ;;  %v2649_v0 = vpop.permute.xlu0 %2648 }
 0x339   :  { %v6498_v20 = vrot.slane %v4754_v33, 3  ;;  %v1934_v22 = vsel %vm1886_vm6, %v1865_v11, 0.0  ;;  %vm2079_vm8 = vcmp.ge.s32.totalorder %v5445_v30, 5  ;;  %v6499_v16 = vrot.slane %v4754_v33, 2  ;;  %v6513_v11 = vld [vmem:[#allocation94_spill] sm:$0xff] }
 0x33a   :  { %v2213_v56 = vadd.f32 %v2197_v32, %v2020_v35  ;;  %v2729_v48 = vmul.f32 %v5485_v8, %v6501_v61  ;;  %v2746_v2 = vpack.c.bf16 %v2734_v19, %v5691_v60  ;;  %v2014_v53 = vmul.f32 %v6502_v36, %v1934_v22  ;;  %v6509_v35 = vld [vmem:[#allocation91_spill] sm:$0xff]  ;;  %v6519_v61 = vld [vmem:[#allocation58_spill] sm:$0xff] }
 0x33b   :  { %v2058_v37 = vsel %vm2052_vm10, %v6498_v20, %v2046_v40  ;;  %v2251_v44 = vsel %vm6500_vm0, %v6499_v16, %v2239_v51  ;;  %v2722_v40 = vadd.f32 %v2689_v7, %v2610_v26  ;;  %vm2272_vm13 = vcmp.ge.s32.totalorder %v5445_v30, 6  ;;  %v6505_v7 = vld [vmem:[#allocation85_spill] sm:$0xff]  ;;  %v6516_v26 = vld [vmem:[#allocation59_spill] sm:$0xff]  ;;  %v6520_v36 = vld [vmem:[#allocation98_spill] sm:$0xff] }
 0x33c   :  { %v2127_v59 = vsel %vm2079_vm8, %v2058_v37, 0.0  ;;  %v2406_v3 = vadd.f32 %v2390_v29, %v2213_v56  ;;  %v6503_v28 = vrot.slane %v4686_v47, 1  ;;  %3029 = vmatmul.mubr.bf16.vlgmr.msra.gmra.mxu1 %v2746_v2  ;;  %v2030_v51 = vadd.f32 %v2014_v53, %v1837_v34  ;;  %v6512_v29 = vld [vmem:[#allocation122_spill] sm:$0xff] }
 0x33d   :  { %v2207_v8 = vmul.f32 %v6504_v18, %v2127_v59  ;;  %v2320_v62 = vsel %vm2272_vm13, %v2251_v44, 0.0  ;;  %vm2465_vm9 = vcmp.ge.s32.totalorder %v5445_v30, 7  ;;  %3032 = vmatprep.mubr.bf16.mxu1 %v2747_v25  ;;  %v6506_v47 = vrot.slane %v4873_v46, 4  ;;  %v6521_v59 = vld [vmem:[#allocation75_spill] sm:$0xff]  ;;  %v6524_v18 = vld [vmem:[#allocation73_spill] sm:$0xff] }
 0x33e   :  { %v2444_v52 = vsel %vm2438_vm14, %v2431_v42, %v6503_v28  ;;  %v2599_v60 = vadd.f32 %v5159_v10, %v2406_v3  ;;  %v2400_v21 = vmul.f32 %v6505_v7, %v2320_v62  ;;  %v6507_v33 = vrot.slane %v4854_v5, 4  ;;  %v6522_v28 = vld [vmem:[#allocation109_spill] sm:$0xff] }
 0x33f   :  { %v2513_v63 = vsel %vm2465_vm9, %v2444_v52, 0.0  ;;  %v2223_v6 = vadd.f32 %v2207_v8, %v2030_v51  ;;  %vm1889_vm14 = vcmp.ge.s32.totalorder %v6294_v13, 4  ;;  %v6510_v30 = vrot.slane %v4873_v46, 3 }
 0x340   :  { %v1862_v42 = vsel %vm6508_vm12, %v6507_v33, %v6506_v47  ;;  %v2593_v41 = vmul.f32 %v6509_v35, %v2513_v63  ;;  %v6511_v25 = vrot.slane %v4854_v5, 3  ;;  %v2711_v32 = vadd.f32 %v2634_v54, %v2599_v60  ;;  %v6517_v54 = vld [vmem:[#allocation104_spill] sm:$0xff]  ;;  %v6525_v60 = vld [vmem:[#allocation43_spill] sm:$0xff]  ;;  %v6527_v33 = vld [vmem:[#allocation10_spill] sm:$0xff] }
 0x341   :  { %v1937_v12 = vsel %vm1889_vm14, %v1862_v42, 0.0  ;;  %vm2082_vm3 = vcmp.ge.s32.totalorder %v6294_v13, 5  ;;  %v2602_v34 = vadd.f32 %v5275_v55, %v6512_v29  ;;  %v2416_v14 = vadd.f32 %v2400_v21, %v2223_v6  ;;  %v2704_v21 = vpop.permute.xlu1 %2703  ;;  %v6528_v35 = vld [vmem:[#allocation83_spill] sm:$0xff] }
 0x342   :  { %v2055_v10 = vsel %vm2052_vm10, %v6511_v25, %v6510_v30  ;;  %v2017_v15 = vmul.f32 %v6513_v11, %v1937_v12  ;;  %v6514_v46 = vrot.slane %v4814_v45, 4  ;;  %v2727_v20 = vmul.f32 %v2711_v32, %v6516_v26  ;;  %v6529_v30 = vld [vmem:[#allocation86_spill] sm:$0xff]  ;;  %v3213_v11 = vld [vmem:[%s6000_s0 + $0x30] sm:$0xff] }
 0x343   :  { %v2130_v19 = vsel %vm2082_vm3, %v2055_v10, 0.0  ;;  %v2714_v56 = vadd.f32 %v2649_v0, %v2602_v34  ;;  %vm1891_vm15 = vcmp.ge.s32.totalorder %v4444_v27, 4  ;;  %v2609_v13 = vadd.f32 %v2593_v41, %v2416_v14  ;;  %v6531_v32 = vld [vmem:[#allocation82_spill] sm:$0xff] }
 0x344   :  { %v1860_v5 = vsel %vm6515_vm11, %v6514_v46, %v1858_v23  ;;  %v2210_v37 = vmul.f32 %v6517_v54, %v2130_v19  ;;  %v2033_v55 = vadd.f32 %v2017_v15, %v5557_v17  ;;  %v6518_v16 = vrot.slane %v4814_v45, 3 }
 0x345   :  { %v1939_v22 = vsel %vm1891_vm15, %v1860_v5, 0.0  ;;  %v2743_v23 = vpack.c.bf16 %v5481_v38, %v2727_v20  ;;  %v2730_v2 = vmul.f32 %v2714_v56, %v6519_v61  ;;  %vm2084_vm7 = vcmp.ge.s32.totalorder %v4444_v27, 5  ;;  %v3214_v5 = vld [vmem:[%s6000_s0 + $0x20] sm:$0xff] }
 0x346   :  { %v2053_v44 = vsel %vm2052_vm10, %v6518_v16, %v2051_v49  ;;  %v2019_v53 = vmul.f32 %v6520_v36, %v1939_v22  ;;  %v2738_v3 = vmul.f32 %v2722_v40, %v6521_v59  ;;  %v2721_v17 = vadd.f32 %v6522_v28, %v2609_v13 }
 0x347   :  { %v2226_v52 = vadd.f32 %v2210_v37, %v2033_v55  ;;  %v2132_v51 = vsel %vm2084_vm7, %v2053_v44, 0.0  ;;  %vm2470_vm1 = vcmp.ge.s32.totalorder %v4444_v27, 7  ;;  %3024 = vmatprep.mubr.bf16.mxu0 %v2743_v23  ;;  %v2744_v45 = vpack.c.bf16 %v2730_v2, %v2729_v48  ;;  %v3215_v37 = vld [vmem:[%s6000_s0 + $0x38] sm:$0xff]  ;;  %v3216_v55 = vld [vmem:[%s6000_s0 + $0x28] sm:$0xff]  ;;  %v3217_v2 = vld [vmem:[%s6000_s0 + $0x10] sm:$0xff] }
 0x348   :  { %v2035_v24 = vadd.f32 %v2019_v53, %v5586_v43  ;;  %v2212_v38 = vmul.f32 %v6523_v1, %v2132_v51  ;;  %v2596_v49 = vmul.f32 %v5198_v31, %v5178_v39  ;;  %v2737_v8 = vmul.f32 %v2721_v17, %v6524_v18  ;;  %v6526_v43 = vld [vmem:[#allocation25_spill] sm:$0xff]  ;;  %v2709_v31 = vpop.permute.xlu0 %2708  ;;  %v3218_v17 = vld [vmem:[%s6000_s0] sm:$0xff] }
 0x349   :  { %v2419_v62 = vadd.f32 %v5157_v57, %v2226_v52  ;;  %3025 = vmatmul.mubr.bf16.vlgmr.msra.gmra.mxu0 %v2744_v45  ;;  %v2518_v7 = vsel %vm2470_vm1, %v6525_v60, 0.0  ;;  %v2723_v27 = vadd.f32 %v5437_v58, %v5464_v50  ;;  %v2725_v57 = vadd.f32 %v2704_v21, %v5498_v4  ;;  %v6530_v50 = vld [vmem:[#allocation81_spill] sm:$0xff]  ;;  %v3219_v45 = vld [vmem:[%s6000_s0 + $0x50] sm:$0xff]  ;;  %v3222_v21 = vld [vmem:[%s6000_s0 + $0x8] sm:$0xff] }
 0x34a   :  { %v2228_v40 = vadd.f32 %v2212_v38, %v2035_v24  ;;  %v2748_v48 = vpack.c.bf16 %v2738_v3, %v2737_v8  ;;  %v2598_v47 = vmul.f32 %v6526_v43, %v2518_v7  ;;  %vm6532_vm10 = vcmask 261120   ;;  %v3220_v18 = vld [vmem:[%s6000_s0 + $0x18] sm:$0xff] }
 0x34b   :  { %v2612_v63 = vadd.f32 %v2596_v49, %v2419_v62  ;;  %v2739_v41 = vmul.f32 %v2723_v27, %v6528_v35  ;;  %v2741_v0 = vmul.f32 %v2725_v57, %v6530_v50  ;;  %vm6533_vm2 = vmmov %vm6532_vm10 }
 0x34c   :  { %v2421_v42 = vadd.f32 %v6527_v33, %v2228_v40  ;;  %3033 = vmatmul.mubr.bf16.gmra.mxu1 %v2748_v48  ;;  %vm6534_vm5 = vmmov %vm6533_vm2  ;;  %v3221_v40 = vld [vmem:[%s6000_s0 + $0x40] sm:$0xff]  ;;  %v3224_v33 = vld [vmem:[%s6000_s0 + $0x48] sm:$0xff] }
 0x34d   :  { %v2724_v39 = vadd.f32 %v5787_v9, %v2612_v63  ;;  %v5870_v9 = vld [vmem:[%s6010_s10] ss:$0 sm:$0xff]  ;;  %vm6535_vm4 = vmmov %vm6533_vm2  ;;  %v3223_v63 = vld [vmem:[%s6000_s0 + $0x58] sm:$0xff] }
 0x34e   :  { %v2614_v6 = vadd.f32 %v2598_v47, %v2421_v42  ;;  %vm6536_vm6 = vmmov %vm6533_vm2 }
 0x34f   :  { %v2740_v25 = vmul.f32 %v2724_v39, %v6529_v30  ;;  %vm6537_vm8 = vmmov %vm6533_vm2 }
 0x350   :  { %v2726_v10 = vadd.f32 %v2709_v31, %v2614_v6  ;;  %vm6538_vm0 = vmmov %vm6533_vm2  ;;  %v3225_v6 = vld [vmem:[%s6000_s0 + $0x70] sm:$0xff] }
 0x351   :  { %v2749_v58 = vpack.c.bf16 %v2740_v25, %v2739_v41  ;;  %vm6539_vm13 = vmmov %vm6538_vm0  ;;  %v3226_v25 = vld [vmem:[%s6000_s0 + $0x60] sm:$0xff] }
 0x352   :  { %v2742_v12 = vmul.f32 %v2726_v10, %v6531_v32  ;;  %vm6540_vm9 = vmmov %vm6538_vm0 }
 0x353   :  { %3036 = vmatprep.mubr.bf16.mxu1 %v2749_v58  ;;  %vm6541_vm12 = vmmov %vm6538_vm0 }
 0x354   :  { %v2750_v29 = vpack.c.bf16 %v2742_v12, %v2741_v0  ;;  %vm6542_vm14 = vmmov %vm6538_vm0  ;;  %v3227_v0 = vld [vmem:[%s6000_s0 + $0x78] sm:$0xff] }
 0x355   :  { %vm6543_vm3 = vmmov %vm6538_vm0 }
 0x356   :  { %3037 = vmatmul.mubr.bf16.gmra.mxu1 %v2750_v29  ;;  %vm6544_vm11 = vmmov %vm6538_vm0  ;;  %v3228_v29 = vld [vmem:[%s6000_s0 + $0x68] sm:$0xff] }
 0x357   :  { %vm6545_vm15 = vmmov %vm6538_vm0 }
 0x358   :  { %vm6546_vm7 = vmmov %vm6538_vm0 }
 0x359   :  { %vm6547_vm1 = vmmov %vm6538_vm0 }
 0x3fc   :  { %v3030_v4 = vpop.f32.mrf.mxu1 }
 0x3fd   :  { %v2864_v34 = vadd.f32 %v3030_v4, %v5870_v9 }
 0x3fe   :  { %v2855_v14 = vpop.f32.mrf.mxu1 }
 0x3ff   :  { %v2908_v15 = vadd.f32 %v3213_v11, %v2864_v34  ;;  %v2856_v19 = vadd.f32 %v5870_v9, %v2855_v14 }
 0x400   :  { %v3031_v46 = vpop.f32.mrf.mxu1 }
 0x401   :  { %2924 = vst.msk [vmem:[%s6011_s11 + $0x30] sm:$0xff] %vm6532_vm10, %v2908_v15  ;;  %v2906_v26 = vadd.f32 %v3214_v5, %v2856_v19  ;;  %v2867_v20 = vadd.f32 %v3031_v46, %v5870_v9 }
 0x402   :  { %v2858_v54 = vpop.f32.mrf.mxu1 }
 0x403   :  { %2922 = vst.msk [vmem:[%s6011_s11 + $0x20] sm:$0xff] %vm6533_vm2, %v2906_v26  ;;  %v2909_v56 = vadd.f32 %v3215_v37, %v2867_v20  ;;  %v2859_v13 = vadd.f32 %v5870_v9, %v2858_v54 }
 0x405   :  { %2925 = vst.msk [vmem:[%s6011_s11 + $0x38] sm:$0xff] %vm6534_vm5, %v2909_v56  ;;  %v2907_v22 = vadd.f32 %v3216_v55, %v2859_v13 }
 0x407   :  { %2923 = vst.msk [vmem:[%s6011_s11 + $0x28] sm:$0xff] %vm6535_vm4, %v2907_v22 }
 0x409   :  { %v3026_v16 = vpop.f32.mrf.mxu0 }
 0x40a   :  { %v2848_v44 = vadd.f32 %v3026_v16, %v5870_v9 }
 0x40b   :  { %v2839_v23 = vpop.f32.mrf.mxu0 }
 0x40c   :  { %v3034_v61 = vpop.f32.mrf.mxu1  ;;  %v2904_v36 = vadd.f32 %v3217_v2, %v2848_v44  ;;  %v2840_v53 = vadd.f32 %v5870_v9, %v2839_v23 }
 0x40d   :  { %v2880_v59 = vadd.f32 %v3034_v61, %v5870_v9  ;;  %v3027_v3 = vpop.f32.mrf.mxu0 }
 0x40e   :  { %v2871_v28 = vpop.f32.mrf.mxu1  ;;  %2920 = vst.msk [vmem:[%s6011_s11 + $0x10] sm:$0xff] %vm6536_vm6, %v2904_v36  ;;  %v2902_v52 = vadd.f32 %v3218_v17, %v2840_v53  ;;  %v2851_v51 = vadd.f32 %v3027_v3, %v5870_v9 }
 0x40f   :  { %v2912_v24 = vadd.f32 %v3219_v45, %v2880_v59  ;;  %v2872_v1 = vadd.f32 %v5870_v9, %v2871_v28  ;;  %v2842_v38 = vpop.f32.mrf.mxu0 }
 0x410   :  { %v3035_v49 = vpop.f32.mrf.mxu1  ;;  %2918 = vst.msk [vmem:[%s6011_s11] sm:$0xff] %vm6537_vm8, %v2902_v52  ;;  %v2905_v8 = vadd.f32 %v3220_v18, %v2851_v51  ;;  %v2843_v62 = vadd.f32 %v5870_v9, %v2842_v38 }
 0x411   :  { %2928 = vst.msk [vmem:[%s6011_s11 + $0x50] sm:$0xff] %vm6538_vm0, %v2912_v24  ;;  %v2910_v60 = vadd.f32 %v3221_v40, %v2872_v1  ;;  %v2883_v7 = vadd.f32 %v3035_v49, %v5870_v9 }
 0x412   :  { %v2874_v27 = vpop.f32.mrf.mxu1  ;;  %2921 = vst.msk [vmem:[%s6011_s11 + $0x18] sm:$0xff] %vm6539_vm13, %v2905_v8  ;;  %v2903_v48 = vadd.f32 %v3222_v21, %v2843_v62 }
 0x413   :  { %2926 = vst.msk [vmem:[%s6011_s11 + $0x40] sm:$0xff] %vm6540_vm9, %v2910_v60  ;;  %v2913_v43 = vadd.f32 %v3223_v63, %v2883_v7  ;;  %v2875_v47 = vadd.f32 %v5870_v9, %v2874_v27 }
 0x414   :  { %2919 = vst.msk [vmem:[%s6011_s11 + $0x8] sm:$0xff] %vm6541_vm12, %v2903_v48 }
 0x415   :  { %2929 = vst.msk [vmem:[%s6011_s11 + $0x58] sm:$0xff] %vm6542_vm14, %v2913_v43  ;;  %v2911_v42 = vadd.f32 %v3224_v33, %v2875_v47 }
 0x416   :  { %v3038_v39 = vpop.f32.mrf.mxu1 }
 0x417   :  { %v2896_v31 = vadd.f32 %v3038_v39, %v5870_v9  ;;  %2927 = vst.msk [vmem:[%s6011_s11 + $0x48] sm:$0xff] %vm6543_vm3, %v2911_v42 }
 0x418   :  { %v2887_v57 = vpop.f32.mrf.mxu1 }
 0x419   :  { %v2916_v35 = vadd.f32 %v3225_v6, %v2896_v31  ;;  %v2888_v41 = vadd.f32 %v5870_v9, %v2887_v57 }
 0x41a   :  { %v3039_v30 = vpop.f32.mrf.mxu1 }
 0x41b   :  { %2932 = vst.msk [vmem:[%s6011_s11 + $0x70] sm:$0xff] %vm6544_vm11, %v2916_v35  ;;  %v2914_v10 = vadd.f32 %v3226_v25, %v2888_v41  ;;  %v2899_v58 = vadd.f32 %v3039_v30, %v5870_v9 }
 0x41c   :  { %v2890_v50 = vpop.f32.mrf.mxu1 }
 0x41d   :  { %2930 = vst.msk [vmem:[%s6011_s11 + $0x60] sm:$0xff] %vm6545_vm15, %v2914_v10  ;;  %v2917_v32 = vadd.f32 %v3227_v0, %v2899_v58  ;;  %v2891_v12 = vadd.f32 %v5870_v9, %v2890_v50 }
 0x41f   :  { %2933 = vst.msk [vmem:[%s6011_s11 + $0x78] sm:$0xff] %vm6546_vm7, %v2917_v32  ;;  %v2915_v4 = vadd.f32 %v3228_v29, %v2891_v12 }
 0x421   :  { %2931 = vst.msk [vmem:[%s6011_s11 + $0x68] sm:$0xff] %vm6547_vm1, %v2915_v4 }

</bundles_post_ra>
